<compile_context>
chip_gen: v5e
topology: v5e:2x2
jax: 0.10.0
libtpu: 0.0.40
codegen_flags: <defaults>
</compile_context>

<pallas_src>
import jax
import jax.numpy as jnp
from jax.experimental import pallas as pl
from jax.experimental.pallas import tpu as pltpu

LATENT = 100            # args.latent_dim in the PyTorch template
H1, H2, H3, H4 = 128, 256, 512, 1024
OUT_DIM = 784

K1 = 128                # latent padded to a full lane width
OUT_PAD = 896           # 784 -> 7*128; do NOT round to 1024 (extra tanh/VALU/stores, 0 MXU saved)
BN_EPS = 1e-5


def _tpu_kind():
    try:
        return jax.devices()[0].device_kind.lower()
    except Exception:
        return ""


_KIND = _tpu_kind()
_IS_V7 = "v7" in _KIND
_TCS_PER_CHIP = 2 if _IS_V7 else 1             # v5e/v6e have a single TensorCore
MAX_TB = 512 if _IS_V7 else 1024               # v7x has half the VMEM (64 MiB)
_VMEM_LIMIT_BYTES = (48 if _IS_V7 else 64) * 1024 * 1024


def _cdiv(a, b):
    return -(-a // b)


def _round_up(x, m):
    return _cdiv(x, m) * m


def _leaky_relu(x, slope=0.2):
    return jnp.where(x >= 0, x, slope * x)


def generator_kernel(z_ref, w1_ref, b1_ref, w2_ref, b2_ref, w3_ref, b3_ref,
                     w4_ref, b4_ref, w5_ref, b5_ref, o_ref):
    # TODO(synk): for very small batches the ~3 MiB w4/w5 HBM->VMEM copy is the
    # critical path; streaming them via memory_space=pl.ANY + make_async_copy so
    # their DMA hides under layers 1-3 compute would shave another 1-4 us.

    # Linear(latent -> 128) + LeakyReLU(0.2)
    h = jnp.dot(z_ref[...], w1_ref[...],
                preferred_element_type=jnp.float32) + b1_ref[...]
    h = _leaky_relu(h)

    # Linear(128 -> 256) [+ folded eval-mode BatchNorm1d] + LeakyReLU(0.2)
    h = jnp.dot(h.astype(jnp.bfloat16), w2_ref[...],
                preferred_element_type=jnp.float32) + b2_ref[...]
    h = _leaky_relu(h)

    # Linear(256 -> 512) [+ folded eval-mode BatchNorm1d] + LeakyReLU(0.2)
    h = jnp.dot(h.astype(jnp.bfloat16), w3_ref[...],
                preferred_element_type=jnp.float32) + b3_ref[...]
    h = _leaky_relu(h)

    # Linear(512 -> 1024) [+ folded eval-mode BatchNorm1d] + LeakyReLU(0.2)
    h = jnp.dot(h.astype(jnp.bfloat16), w4_ref[...],
                preferred_element_type=jnp.float32) + b4_ref[...]
    h = _leaky_relu(h)

    # Linear(1024 -> 784 [padded to 896]) + Tanh (EUP slot); store bf16.
    logits = jnp.dot(h.astype(jnp.bfloat16), w5_ref[...],
                     preferred_element_type=jnp.float32) + b5_ref[...]
    o_ref[...] = jnp.tanh(logits).astype(o_ref.dtype)


def _fold_bn(w, b, gamma, beta, mean, var, eps=BN_EPS):
    """Fold eval-mode BatchNorm1d into the preceding Linear: y = x@W' + b'."""
    s = gamma / jnp.sqrt(var + eps)
    return w * s[None, :], b * s + (beta - mean * s)


def prepare_kernel_params(p):
    """Fold BN, pad to lane-dense shapes, cast matmul operands to bf16."""
    # TODO(synk): training-mode BatchNorm1d (batch statistics) is not
    # implemented; this forward matches model.eval() running-stats semantics.
    w1 = jnp.zeros((K1, H1), jnp.float32).at[:LATENT].set(p["w1"])
    b1 = p["b1"]
    w2, b2 = _fold_bn(p["w2"], p["b2"], p["g2"], p["be2"], p["m2"], p["v2"])
    w3, b3 = _fold_bn(p["w3"], p["b3"], p["g3"], p["be3"], p["m3"], p["v3"])
    w4, b4 = _fold_bn(p["w4"], p["b4"], p["g4"], p["be4"], p["m4"], p["v4"])
    w5 = jnp.zeros((H4, OUT_PAD), jnp.float32).at[:, :OUT_DIM].set(p["w5"])
    b5 = jnp.zeros((OUT_PAD,), jnp.float32).at[:OUT_DIM].set(p["b5"])

    def pack(w, b):
        return w.astype(jnp.bfloat16), b.reshape(1, -1).astype(jnp.float32)

    return (*pack(w1, b1), *pack(w2, b2), *pack(w3, b3), *pack(w4, b4),
            *pack(w5, b5))


def _choose_tiles(B):
    """Balanced batch tiles: minimal padding, >=2 tiles only on 2-TC chips."""
    min_tiles = _TCS_PER_CHIP if B > 8 else 1
    n_tiles = max(_cdiv(B, MAX_TB), min_tiles)
    n_tiles = min(n_tiles, max(1, _cdiv(B, 8)))     # never split below 8 rows/tile
    tb = _round_up(_cdiv(B, n_tiles), 8)
    n_tiles = _cdiv(B, tb)
    return tb, n_tiles, tb * n_tiles


@jax.jit
def generator_forward(z, w1, b1, w2, b2, w3, b3, w4, b4, w5, b5):
    B, latent = z.shape
    tb, n_tiles, Bp = _choose_tiles(B)

    zk = z.astype(jnp.bfloat16)
    pad_b, pad_k = Bp - B, K1 - latent
    if pad_b or pad_k:                      # pad only when actually needed
        zk = jnp.pad(zk, ((0, pad_b), (0, pad_k)))

    flops = 2 * Bp * (K1 * H1 + H1 * H2 + H2 * H3 + H3 * H4 + H4 * OUT_PAD)
    param_bytes = 2 * (w1.size + w2.size + w3.size + w4.size + w5.size) \
                + 4 * (b1.size + b2.size + b3.size + b4.size + b5.size)
    bytes_accessed = 2 * Bp * K1 + param_bytes + 2 * Bp * OUT_PAD

    tile = lambda i: (i, 0)                 # z / output tiles (parallel axis)
    full = lambda i: (0, 0)                 # grid-invariant weights & biases
    resident = pl.Buffered(1)               # single-buffer: saves ~3 MiB VMEM

    def wspec(shape):
        return pl.BlockSpec(shape, full, pipeline_mode=resident)

    out = pl.pallas_call(
        generator_kernel,
        out_shape=jax.ShapeDtypeStruct((Bp, OUT_PAD), jnp.bfloat16),
        grid=(n_tiles,),
        in_specs=[
            pl.BlockSpec((tb, K1), tile),
            wspec((K1, H1)), wspec((1, H1)),
            wspec((H1, H2)), wspec((1, H2)),
            wspec((H2, H3)), wspec((1, H3)),
            wspec((H3, H4)), wspec((1, H4)),
            wspec((H4, OUT_PAD)), wspec((1, OUT_PAD)),
        ],
        out_specs=pl.BlockSpec((tb, OUT_PAD), tile),
        compiler_params=pltpu.CompilerParams(
            dimension_semantics=("parallel",),
            vmem_limit_bytes=_VMEM_LIMIT_BYTES),
        cost_estimate=pl.CostEstimate(
            flops=flops,
            transcendentals=Bp * OUT_PAD,
            bytes_accessed=bytes_accessed),
    )(zk, w1, b1, w2, b2, w3, b3, w4, b4, w5, b5)
    # bf16 output halves both the kernel writeback and this depad-slice copy.
    return out[:B, :OUT_DIM]


def init_params(key):
    """torch.nn.Linear-style U(-1/sqrt(fan_in), 1/sqrt(fan_in)) init,
    plus non-trivial BatchNorm running stats / affine params."""
    ks = list(jax.random.split(key, 22))
    it = iter(ks)

    def linear(fan_in, fan_out):
        bound = 1.0 / (fan_in ** 0.5)
        w = jax.random.uniform(next(it), (fan_in, fan_out), jnp.float32,
                               -bound, bound)
        b = jax.random.uniform(next(it), (fan_out,), jnp.float32, -bound, bound)
        return w, b

    def bn(n):
        g = jax.random.uniform(next(it), (n,), jnp.float32, 0.8, 1.2)
        be = jax.random.uniform(next(it), (n,), jnp.float32, -0.1, 0.1)
        m = jax.random.uniform(next(it), (n,), jnp.float32, -0.1, 0.1)
        v = jax.random.uniform(next(it), (n,), jnp.float32, 0.8, 1.2)
        return g, be, m, v

    p = {}
    p["w1"], p["b1"] = linear(LATENT, H1)
    p["w2"], p["b2"] = linear(H1, H2)
    p["g2"], p["be2"], p["m2"], p["v2"] = bn(H2)
    p["w3"], p["b3"] = linear(H2, H3)
    p["g3"], p["be3"], p["m3"], p["v3"] = bn(H3)
    p["w4"], p["b4"] = linear(H3, H4)
    p["g4"], p["be4"], p["m4"], p["v4"] = bn(H4)
    p["w5"], p["b5"] = linear(H4, OUT_DIM)
    return p


def reference_forward(z, p):
    def bn(h, g, be, m, v):
        return (h - m) / jnp.sqrt(v + BN_EPS) * g + be

    h = _leaky_relu(z @ p["w1"] + p["b1"])
    h = _leaky_relu(bn(h @ p["w2"] + p["b2"],
                       p["g2"], p["be2"], p["m2"], p["v2"]))
    h = _leaky_relu(bn(h @ p["w3"] + p["b3"],
                       p["g3"], p["be3"], p["m3"], p["v3"]))
    h = _leaky_relu(bn(h @ p["w4"] + p["b4"],
                       p["g4"], p["be4"], p["m4"], p["v4"]))
    return jnp.tanh(h @ p["w5"] + p["b5"])


if __name__ == "__main__":
    key = jax.random.PRNGKey(0)
    k_z, k_p = jax.random.split(key)

    batch = 2
    z = jax.random.normal(k_z, (batch, LATENT), jnp.float32)
    params = init_params(k_p)
    kparams = prepare_kernel_params(params)

    out = generator_forward(z, *kparams)
    out = jax.block_until_ready(out)

    ref = reference_forward(z, params)
    assert out.shape == (batch, OUT_DIM), out.shape
    max_err = float(jnp.max(jnp.abs(out.astype(jnp.float32) - ref)))
    assert max_err < 5e-2, max_err   # bf16 matmul operands / bf16 output
    print("KERNEL_OK")
</pallas_src>

<mosaic_0001>
module attributes {stable_mosaic.version = 11 : i64} {
  func.func @generator_kernel(%arg0: i32, %arg1: memref<8x128xbf16, #tpu.memory_space<vmem>>, %arg2: memref<128x128xbf16, #tpu.memory_space<vmem>>, %arg3: memref<1x128xf32, #tpu.memory_space<vmem>>, %arg4: memref<128x256xbf16, #tpu.memory_space<vmem>>, %arg5: memref<1x256xf32, #tpu.memory_space<vmem>>, %arg6: memref<256x512xbf16, #tpu.memory_space<vmem>>, %arg7: memref<1x512xf32, #tpu.memory_space<vmem>>, %arg8: memref<512x1024xbf16, #tpu.memory_space<vmem>>, %arg9: memref<1x1024xf32, #tpu.memory_space<vmem>>, %arg10: memref<1024x896xbf16, #tpu.memory_space<vmem>>, %arg11: memref<1x896xf32, #tpu.memory_space<vmem>>, %arg12: memref<8x896xbf16, #tpu.memory_space<vmem>>) attributes {dimension_semantics = [#tpu.dimension_semantics<parallel>], iteration_bounds = array<i64: 1>, scalar_prefetch = 0 : i64, scratch_operands = 0 : i64, tpu.core_type = #tpu.core_type<tc>, window_params = [{transform_indices = @transform_0, window_bounds = array<i64: 8, 128>}, {pipeline_mode = #tpu.pipeline_mode<synchronous>, transform_indices = @transform_1, window_bounds = array<i64: 128, 128>}, {pipeline_mode = #tpu.pipeline_mode<synchronous>, transform_indices = @transform_2, window_bounds = array<i64: 1, 128>}, {pipeline_mode = #tpu.pipeline_mode<synchronous>, transform_indices = @transform_3, window_bounds = array<i64: 128, 256>}, {pipeline_mode = #tpu.pipeline_mode<synchronous>, transform_indices = @transform_4, window_bounds = array<i64: 1, 256>}, {pipeline_mode = #tpu.pipeline_mode<synchronous>, transform_indices = @transform_5, window_bounds = array<i64: 256, 512>}, {pipeline_mode = #tpu.pipeline_mode<synchronous>, transform_indices = @transform_6, window_bounds = array<i64: 1, 512>}, {pipeline_mode = #tpu.pipeline_mode<synchronous>, transform_indices = @transform_7, window_bounds = array<i64: 512, 1024>}, {pipeline_mode = #tpu.pipeline_mode<synchronous>, transform_indices = @transform_8, window_bounds = array<i64: 1, 1024>}, {pipeline_mode = #tpu.pipeline_mode<synchronous>, transform_indices = @transform_9, window_bounds = array<i64: 1024, 896>}, {pipeline_mode = #tpu.pipeline_mode<synchronous>, transform_indices = @transform_10, window_bounds = array<i64: 1, 896>}, {transform_indices = @transform_11, window_bounds = array<i64: 8, 896>}]} {
    %c0 = arith.constant 0 : index
    %c0_0 = arith.constant 0 : index
    %0 = vector.load %arg1[%c0, %c0_0] : memref<8x128xbf16, #tpu.memory_space<vmem>>, vector<8x128xbf16>
    %c0_1 = arith.constant 0 : index
    %c0_2 = arith.constant 0 : index
    %1 = vector.load %arg2[%c0_1, %c0_2] : memref<128x128xbf16, #tpu.memory_space<vmem>>, vector<128x128xbf16>
    %cst = arith.constant dense<0.000000e+00> : vector<8x128xf32>
    %2 = tpu.matmul %0, %1, %cst {dimension_numbers = #tpu.dot_dimension_numbers<[1], [0], [0], [1], [0, 0, 1, 1], [], []>} : vector<8x128xbf16>, vector<128x128xbf16>, vector<8x128xf32> -> vector<8x128xf32>
    %c0_3 = arith.constant 0 : index
    %c0_4 = arith.constant 0 : index
    %3 = vector.load %arg3[%c0_3, %c0_4] : memref<1x128xf32, #tpu.memory_space<vmem>>, vector<1x128xf32>
    %4 = vector.broadcast %3 : vector<1x128xf32> to vector<8x128xf32>
    %5 = arith.addf %2, %4 : vector<8x128xf32>
    %cst_5 = arith.constant 0.000000e+00 : f32
    %6 = vector.broadcast %cst_5 : f32 to vector<8x128xf32>
    %7 = arith.cmpf oge, %5, %6 : vector<8x128xf32>
    %cst_6 = arith.constant 2.000000e-01 : f32
    %8 = vector.broadcast %cst_6 : f32 to vector<8x128xf32>
    %9 = arith.mulf %8, %5 : vector<8x128xf32>
    %10 = arith.select %7, %5, %9 : vector<8x128xi1>, vector<8x128xf32>
    %11 = arith.truncf %10 : vector<8x128xf32> to vector<8x128xbf16>
    %c0_7 = arith.constant 0 : index
    %c0_8 = arith.constant 0 : index
    %12 = vector.load %arg4[%c0_7, %c0_8] : memref<128x256xbf16, #tpu.memory_space<vmem>>, vector<128x256xbf16>
    %cst_9 = arith.constant dense<0.000000e+00> : vector<8x256xf32>
    %13 = tpu.matmul %11, %12, %cst_9 {dimension_numbers = #tpu.dot_dimension_numbers<[1], [0], [0], [1], [0, 0, 1, 1], [], []>} : vector<8x128xbf16>, vector<128x256xbf16>, vector<8x256xf32> -> vector<8x256xf32>
    %c0_10 = arith.constant 0 : index
    %c0_11 = arith.constant 0 : index
    %14 = vector.load %arg5[%c0_10, %c0_11] : memref<1x256xf32, #tpu.memory_space<vmem>>, vector<1x256xf32>
    %15 = vector.broadcast %14 : vector<1x256xf32> to vector<8x256xf32>
    %16 = arith.addf %13, %15 : vector<8x256xf32>
    %cst_12 = arith.constant 0.000000e+00 : f32
    %17 = vector.broadcast %cst_12 : f32 to vector<8x256xf32>
    %18 = arith.cmpf oge, %16, %17 : vector<8x256xf32>
    %cst_13 = arith.constant 2.000000e-01 : f32
    %19 = vector.broadcast %cst_13 : f32 to vector<8x256xf32>
    %20 = arith.mulf %19, %16 : vector<8x256xf32>
    %21 = arith.select %18, %16, %20 : vector<8x256xi1>, vector<8x256xf32>
    %22 = arith.truncf %21 : vector<8x256xf32> to vector<8x256xbf16>
    %c0_14 = arith.constant 0 : index
    %c0_15 = arith.constant 0 : index
    %23 = vector.load %arg6[%c0_14, %c0_15] : memref<256x512xbf16, #tpu.memory_space<vmem>>, vector<256x512xbf16>
    %cst_16 = arith.constant dense<0.000000e+00> : vector<8x512xf32>
    %24 = tpu.matmul %22, %23, %cst_16 {dimension_numbers = #tpu.dot_dimension_numbers<[1], [0], [0], [1], [0, 0, 1, 1], [], []>} : vector<8x256xbf16>, vector<256x512xbf16>, vector<8x512xf32> -> vector<8x512xf32>
    %c0_17 = arith.constant 0 : index
    %c0_18 = arith.constant 0 : index
    %25 = vector.load %arg7[%c0_17, %c0_18] : memref<1x512xf32, #tpu.memory_space<vmem>>, vector<1x512xf32>
    %26 = vector.broadcast %25 : vector<1x512xf32> to vector<8x512xf32>
    %27 = arith.addf %24, %26 : vector<8x512xf32>
    %cst_19 = arith.constant 0.000000e+00 : f32
    %28 = vector.broadcast %cst_19 : f32 to vector<8x512xf32>
    %29 = arith.cmpf oge, %27, %28 : vector<8x512xf32>
    %cst_20 = arith.constant 2.000000e-01 : f32
    %30 = vector.broadcast %cst_20 : f32 to vector<8x512xf32>
    %31 = arith.mulf %30, %27 : vector<8x512xf32>
    %32 = arith.select %29, %27, %31 : vector<8x512xi1>, vector<8x512xf32>
    %33 = arith.truncf %32 : vector<8x512xf32> to vector<8x512xbf16>
    %c0_21 = arith.constant 0 : index
    %c0_22 = arith.constant 0 : index
    %34 = vector.load %arg8[%c0_21, %c0_22] : memref<512x1024xbf16, #tpu.memory_space<vmem>>, vector<512x1024xbf16>
    %cst_23 = arith.constant dense<0.000000e+00> : vector<8x1024xf32>
    %35 = tpu.matmul %33, %34, %cst_23 {dimension_numbers = #tpu.dot_dimension_numbers<[1], [0], [0], [1], [0, 0, 1, 1], [], []>} : vector<8x512xbf16>, vector<512x1024xbf16>, vector<8x1024xf32> -> vector<8x1024xf32>
    %c0_24 = arith.constant 0 : index
    %c0_25 = arith.constant 0 : index
    %36 = vector.load %arg9[%c0_24, %c0_25] : memref<1x1024xf32, #tpu.memory_space<vmem>>, vector<1x1024xf32>
    %37 = vector.broadcast %36 : vector<1x1024xf32> to vector<8x1024xf32>
    %38 = arith.addf %35, %37 : vector<8x1024xf32>
    %cst_26 = arith.constant 0.000000e+00 : f32
    %39 = vector.broadcast %cst_26 : f32 to vector<8x1024xf32>
    %40 = arith.cmpf oge, %38, %39 : vector<8x1024xf32>
    %cst_27 = arith.constant 2.000000e-01 : f32
    %41 = vector.broadcast %cst_27 : f32 to vector<8x1024xf32>
    %42 = arith.mulf %41, %38 : vector<8x1024xf32>
    %43 = arith.select %40, %38, %42 : vector<8x1024xi1>, vector<8x1024xf32>
    %44 = arith.truncf %43 : vector<8x1024xf32> to vector<8x1024xbf16>
    %c0_28 = arith.constant 0 : index
    %c0_29 = arith.constant 0 : index
    %45 = vector.load %arg10[%c0_28, %c0_29] : memref<1024x896xbf16, #tpu.memory_space<vmem>>, vector<1024x896xbf16>
    %cst_30 = arith.constant dense<0.000000e+00> : vector<8x896xf32>
    %46 = tpu.matmul %44, %45, %cst_30 {dimension_numbers = #tpu.dot_dimension_numbers<[1], [0], [0], [1], [0, 0, 1, 1], [], []>} : vector<8x1024xbf16>, vector<1024x896xbf16>, vector<8x896xf32> -> vector<8x896xf32>
    %c0_31 = arith.constant 0 : index
    %c0_32 = arith.constant 0 : index
    %47 = vector.load %arg11[%c0_31, %c0_32] : memref<1x896xf32, #tpu.memory_space<vmem>>, vector<1x896xf32>
    %48 = vector.broadcast %47 : vector<1x896xf32> to vector<8x896xf32>
    %49 = arith.addf %46, %48 : vector<8x896xf32>
    %50 = math.tanh %49 : vector<8x896xf32>
    %51 = arith.truncf %50 : vector<8x896xf32> to vector<8x896xbf16>
    %c0_33 = arith.constant 0 : index
    %c0_34 = arith.constant 0 : index
    %52 = vector.load %arg12[%c0_33, %c0_34] : memref<8x896xbf16, #tpu.memory_space<vmem>>, vector<8x896xbf16>
    tpu.vector_store %arg12[%c0_33, %c0_34], %51 {strides = array<i32>} : memref<8x896xbf16, #tpu.memory_space<vmem>>, vector<8x896xbf16>,
    return
  }
  func.func @transform_0(%arg0: i32) -> (i32, i32) {
    %c0_i32 = arith.constant 0 : i32
    %c0_i32_0 = arith.constant 0 : i32
    return %arg0, %c0_i32 : i32, i32
  }
  func.func @transform_1(%arg0: i32) -> (i32, i32) {
    %c0_i32 = arith.constant 0 : i32
    %c0_i32_0 = arith.constant 0 : i32
    %c0_i32_1 = arith.constant 0 : i32
    return %c0_i32, %c0_i32_0 : i32, i32
  }
  func.func @transform_2(%arg0: i32) -> (i32, i32) {
    %c0_i32 = arith.constant 0 : i32
    %c0_i32_0 = arith.constant 0 : i32
    %c0_i32_1 = arith.constant 0 : i32
    return %c0_i32, %c0_i32_0 : i32, i32
  }
  func.func @transform_3(%arg0: i32) -> (i32, i32) {
    %c0_i32 = arith.constant 0 : i32
    %c0_i32_0 = arith.constant 0 : i32
    %c0_i32_1 = arith.constant 0 : i32
    return %c0_i32, %c0_i32_0 : i32, i32
  }
  func.func @transform_4(%arg0: i32) -> (i32, i32) {
    %c0_i32 = arith.constant 0 : i32
    %c0_i32_0 = arith.constant 0 : i32
    %c0_i32_1 = arith.constant 0 : i32
    return %c0_i32, %c0_i32_0 : i32, i32
  }
  func.func @transform_5(%arg0: i32) -> (i32, i32) {
    %c0_i32 = arith.constant 0 : i32
    %c0_i32_0 = arith.constant 0 : i32
    %c0_i32_1 = arith.constant 0 : i32
    return %c0_i32, %c0_i32_0 : i32, i32
  }
  func.func @transform_6(%arg0: i32) -> (i32, i32) {
    %c0_i32 = arith.constant 0 : i32
    %c0_i32_0 = arith.constant 0 : i32
    %c0_i32_1 = arith.constant 0 : i32
    return %c0_i32, %c0_i32_0 : i32, i32
  }
  func.func @transform_7(%arg0: i32) -> (i32, i32) {
    %c0_i32 = arith.constant 0 : i32
    %c0_i32_0 = arith.constant 0 : i32
    %c0_i32_1 = arith.constant 0 : i32
    return %c0_i32, %c0_i32_0 : i32, i32
  }
  func.func @transform_8(%arg0: i32) -> (i32, i32) {
    %c0_i32 = arith.constant 0 : i32
    %c0_i32_0 = arith.constant 0 : i32
    %c0_i32_1 = arith.constant 0 : i32
    return %c0_i32, %c0_i32_0 : i32, i32
  }
  func.func @transform_9(%arg0: i32) -> (i32, i32) {
    %c0_i32 = arith.constant 0 : i32
    %c0_i32_0 = arith.constant 0 : i32
    %c0_i32_1 = arith.constant 0 : i32
    return %c0_i32, %c0_i32_0 : i32, i32
  }
  func.func @transform_10(%arg0: i32) -> (i32, i32) {
    %c0_i32 = arith.constant 0 : i32
    %c0_i32_0 = arith.constant 0 : i32
    %c0_i32_1 = arith.constant 0 : i32
    return %c0_i32, %c0_i32_0 : i32, i32
  }
  func.func @transform_11(%arg0: i32) -> (i32, i32) {
    %c0_i32 = arith.constant 0 : i32
    %c0_i32_0 = arith.constant 0 : i32
    return %arg0, %c0_i32 : i32, i32
  }
}

</mosaic_0001>

<bundles_post_ra>
// kernel: generator_forward.1
= control target key start
LH: loop header
LB: loop body
LE: loop exit
PB: predicated region body
PF: predicated region fallthrough
CT: control target
= control target key end

     0   :  { %16 = vsyncpa [#allocation3], 0  ;;  %s11184_s0 = inlined_call_operand.vmem [shape: bf16[8,128], index: 0, kind: input, shape index: {}]   ;;  %s11185_s1 = inlined_call_operand.hbm [shape: bf16[128,128], index: 1, kind: input, shape index: {}]   ;;  %s11186_s2 = inlined_call_operand.hbm [shape: f32[1,128], index: 2, kind: input, shape index: {}]   ;;  %s11187_s3 = inlined_call_operand.hbm [shape: bf16[128,256], index: 3, kind: input, shape index: {}]   ;;  %s11188_s4 = inlined_call_operand.hbm [shape: f32[1,256], index: 4, kind: input, shape index: {}]   ;;  %s11189_s5 = inlined_call_operand.hbm [shape: bf16[256,512], index: 5, kind: input, shape index: {}]   ;;  %s11190_s6 = inlined_call_operand.hbm [shape: f32[1,512], index: 6, kind: input, shape index: {}]   ;;  %s11191_s7 = inlined_call_operand.hbm [shape: bf16[512,1024], index: 7, kind: input, shape index: {}]   ;;  %s11192_s8 = inlined_call_operand.hbm [shape: f32[1,1024], index: 8, kind: input, shape index: {}]   ;;  %s11193_s9 = inlined_call_operand.hbm [shape: bf16[1024,896], index: 9, kind: input, shape index: {}]   ;;  %s11194_s10 = inlined_call_operand.hbm [shape: f32[1,896], index: 10, kind: input, shape index: {}]   ;;  %s11195_s11 = inlined_call_operand.vmem [shape: bf16[8,896], index: 11, kind: output, shape index: {}]  }
   0x1   :  { %17 = vsyncpa [#allocation5], 0 }
   0x2   :  { %18 = vsyncpa [#allocation8], 0 }
   0x3   :  { %19 = vsyncpa [#allocation11], 0 }
   0x4   :  { %20 = vsyncpa [#allocation14], 0  ;;  %s42_s19 = sshll.u32 %s11186_s2, 4  ;;  %s43_s19 = int_to_ptr.hbm [resolvable:$true] %s42_s19 }
   0x5   :  { %21 = vsyncpa [#allocation17], 0  ;;  %s10757_s20 = smov [#allocation4]   ;;  %s66_s24 = sshll.u32 %s11188_s4, 4  ;;  %s67_s24 = int_to_ptr.hbm [resolvable:$true] %s66_s24 }
   0x6   :  { %s44_s21 = sshll.u32 %s10757_s20, 4  ;;  %s10758_s25 = smov [#allocation7]   ;;  %s45_s21 = int_to_ptr.vmem [resolvable:$true] %s44_s21 }
   0x7   :  { %47 = dma.hbm_to_vmem [thread:$0]  %s43_s19, 16, %s45_s21, [#allocation5]  }
   0x8   :  { %s68_s26 = sshll.u32 %s10758_s25, 4  ;;  %s90_s29 = sshll.u32 %s11190_s6, 4  ;;  %s69_s26 = int_to_ptr.vmem [resolvable:$true] %s68_s26  ;;  %s91_s29 = int_to_ptr.hbm [resolvable:$true] %s90_s29 }
   0x9   :  { %71 = dma.hbm_to_vmem [thread:$0]  %s67_s24, 32, %s69_s26, [#allocation8]  }
   0xa   :  { %s114_s12 = sshll.u32 %s11192_s8, 4  ;;  %s10759_s13 = smov [#allocation10]   ;;  %s115_s12 = int_to_ptr.hbm [resolvable:$true] %s114_s12 }
   0xb   :  { %s92_s14 = sshll.u32 %s10759_s13, 4  ;;  %s10760_s4 = smov [#allocation13]   ;;  %s93_s14 = int_to_ptr.vmem [resolvable:$true] %s92_s14 }
   0xc   :  { %95 = dma.hbm_to_vmem [thread:$0]  %s91_s29, 64, %s93_s14, [#allocation11]  }
   0xd   :  { %s116_s15 = sshll.u32 %s10760_s4, 4  ;;  %s28_s18 = sshll.u32 %s11185_s1, 4  ;;  %s117_s15 = int_to_ptr.vmem [resolvable:$true] %s116_s15  ;;  %s29_s18 = int_to_ptr.hbm [resolvable:$true] %s28_s18 }
   0xe   :  { %119 = dma.hbm_to_vmem [thread:$0]  %s115_s12, 128, %s117_s15, [#allocation14]  }
   0xf   :  { %s10761_s6 = smov [#allocation2]   ;;  %s52_s8 = sshll.u32 %s11187_s3, 4  ;;  %s53_s8 = int_to_ptr.hbm [resolvable:$true] %s52_s8 }
  0x10   :  { %s30_s19 = sshll.u32 %s10761_s6, 4  ;;  %s10762_s22 = smov 64   ;;  %s31_s19 = int_to_ptr.vmem [resolvable:$true] %s30_s19 }
  0x11   :  { %s10763_s23 = smov 4   ;;  %s10764_s24 = smov [#allocation6]  }
  0x12   :  { %36 = dma.hbm_to_vmem [thread:$0]  %s29_s18, 1024, %s31_s19, [#allocation3], %s10762_s22, %s10762_s22, %s10763_s23  }
  0x13   :  { %s54_s25 = sshll.u32 %s10764_s24, 4  ;;  %s10765_s26 = smov 128   ;;  %s55_s25 = int_to_ptr.vmem [resolvable:$true] %s54_s25 }
  0x14   :  { %s10766_s27 = smov 8   ;;  %s76_s29 = sshll.u32 %s11189_s5, 4  ;;  %s77_s29 = int_to_ptr.hbm [resolvable:$true] %s76_s29 }
  0x15   :  { %60 = dma.hbm_to_vmem [thread:$0]  %s53_s8, 2048, %s55_s25, [#allocation5], %s10765_s26, %s10765_s26, %s10766_s27  }
  0x16   :  { %s10767_s2 = smov [#allocation9]   ;;  %s100_s13 = sshll.u32 %s11191_s7, 4  ;;  %s101_s13 = int_to_ptr.hbm [resolvable:$true] %s100_s13 }
  0x17   :  { %s78_s30 = sshll.u32 %s10767_s2, 4  ;;  %s10768_s14 = smov 256   ;;  %s79_s30 = int_to_ptr.vmem [resolvable:$true] %s78_s30 }
  0x18   :  { %s10769_s4 = smov 16   ;;  %s10770_s15 = smov [#allocation12]  }
  0x19   :  { %84 = dma.hbm_to_vmem [thread:$0]  %s77_s29, 8192, %s79_s30, [#allocation8], %s10768_s14, %s10768_s14, %s10769_s4  }
  0x1a   :  { %s102_s16 = sshll.u32 %s10770_s15, 4  ;;  %s10771_s17 = smov 512   ;;  %s103_s16 = int_to_ptr.vmem [resolvable:$true] %s102_s16 }
  0x1b   :  { %s10772_s18 = smov 32   ;;  %s124_s19 = sshll.u32 %s11193_s9, 4  ;;  %s125_s19 = int_to_ptr.hbm [resolvable:$true] %s124_s19 }
  0x1c   :  { %108 = dma.hbm_to_vmem [thread:$0]  %s101_s13, 32768, %s103_s16, [#allocation11], %s10771_s17, %s10771_s17, %s10772_s18  }
  0x1d   :  { %s10773_s20 = smov [#allocation15]   ;;  %s138_s22 = sshll.u32 %s11194_s10, 4  ;;  %s139_s22 = int_to_ptr.hbm [resolvable:$true] %s138_s22 }
  0x1e   :  { %s126_s21 = sshll.u32 %s10773_s20, 4  ;;  %s10774_s23 = smov 448   ;;  %s127_s21 = int_to_ptr.vmem [resolvable:$true] %s126_s21 }
  0x1f   :  { %s10775_s24 = smov 28   ;;  %s10776_s25 = smov [#allocation16]  }
  0x20   :  { %132 = dma.hbm_to_vmem [thread:$0]  %s125_s19, 57344, %s127_s21, [#allocation14], %s10774_s23, %s10774_s23, %s10775_s24  }
  0x21   :  { %s140_s26 = sshll.u32 %s10776_s25, 4  ;;  %s141_s26 = int_to_ptr.vmem [resolvable:$true] %s140_s26 }
  0x22   :  { %143 = dma.hbm_to_vmem [thread:$0]  %s139_s22, 112, %s141_s26, [#allocation17]  }
  0x23   :  { %10745 = dma.done.wait [#allocation3], 1024  }
  0x24   :  { %10746 = vsyncadd [#allocation3], 4294966272 }
  0x25   :  { %10747 = dma.done.wait [#allocation5], 2064  }
  0x26   :  { %10748 = vsyncadd [#allocation5], 4294965232 }
  0x27   :  { %10749 = dma.done.wait [#allocation8], 8224  }
  0x28   :  { %10750 = vsyncadd [#allocation8], 4294959072 }
  0x29   :  { %10751 = dma.done.wait [#allocation11], 32832  }
  0x2a   :  { %10752 = vsyncadd [#allocation11], 4294934464 }
  0x2b   :  { %10753 = dma.done.wait [#allocation14], 57472  }
  0x2c   :  { %10754 = vsyncadd [#allocation14], 4294909824 }
  0x2d   :  { %10755 = dma.done.wait [#allocation17], 112  }
  0x2e   :  { %10756 = vsyncadd [#allocation17], 4294967184  ;;  %v9682_v0 = vld [vmem:[#allocation2 + $0x38] sm:$0xff]  ;;  %v9681_v1 = vld [vmem:[#allocation2 + $0x30] sm:$0xff] }
  0x2f   :  { %253 = vmatpush.bf16.msra.mxu0 %v9682_v0  ;;  %v6597_v2 = vld [vmem:[#allocation6 + $0x70] sm:$0xf]  ;;  %v9698_v3 = vld [vmem:[#allocation6 + $0x74] sm:$0xf0]  ;;  %v9697_v4 = vld [vmem:[#allocation6 + $0x74] sm:$0xf] }
  0x30   :  { %v6598_v5 = vor.u32 %v9698_v3, %v6597_v2  ;;  %v6599_v6 = vld [vmem:[#allocation6 + $0x78] sm:$0xf0]  ;;  %v6589_v7 = vld [vmem:[#allocation6 + $0x60] sm:$0xf]  ;;  %v9696_v8 = vld [vmem:[#allocation6 + $0x64] sm:$0xf0] }
  0x31   :  { %v6602_v9 = vor.u32 %v9697_v4, %v6599_v6  ;;  %v9695_v10 = vld [vmem:[#allocation6 + $0x64] sm:$0xf]  ;;  %v6591_v11 = vld [vmem:[#allocation6 + $0x68] sm:$0xf0]  ;;  %v6590_v13 = vor.u32 %v9696_v8, %v6589_v7  ;;  %v6581_v15 = vld [vmem:[#allocation6 + $0x50] sm:$0xf] }
  0x32   :  { %v9680_v12 = vld [vmem:[#allocation2 + $0x28] sm:$0xff]  ;;  %372 = vmatpush.bf16.msra.mxu1 %v6598_v5  ;;  %v6594_v14 = vor.u32 %v9695_v10, %v6591_v11  ;;  %v9694_v16 = vld [vmem:[#allocation6 + $0x54] sm:$0xf0]  ;;  %v9693_v17 = vld [vmem:[#allocation6 + $0x54] sm:$0xf] }
  0x33   :  { %254 = vmatpush.bf16.msra.mxu0 %v9681_v1  ;;  %385 = vmatpush.bf16.msra.mxu2 %v6602_v9  ;;  %v6583_v18 = vld [vmem:[#allocation6 + $0x58] sm:$0xf0]  ;;  %v6582_v20 = vor.u32 %v9694_v16, %v6581_v15  ;;  %v6573_v22 = vld [vmem:[#allocation6 + $0x40] sm:$0xf]  ;;  %v9692_v23 = vld [vmem:[#allocation6 + $0x44] sm:$0xf0] }
  0x34   :  { %v9679_v19 = vld [vmem:[#allocation2 + $0x20] sm:$0xff]  ;;  %v6586_v21 = vor.u32 %v9693_v17, %v6583_v18  ;;  %v6575_v25 = vld [vmem:[#allocation6 + $0x48] sm:$0xf0]  ;;  %v9678_v26 = vld [vmem:[#allocation2 + $0x18] sm:$0xff]  ;;  %v6574_v27 = vor.u32 %v9692_v23, %v6573_v22 }
  0x35   :  { %v9691_v24 = vld [vmem:[#allocation6 + $0x44] sm:$0xf]  ;;  %v6565_v29 = vld [vmem:[#allocation6 + $0x30] sm:$0xf]  ;;  %v9690_v30 = vld [vmem:[#allocation6 + $0x34] sm:$0xf0] }
  0x36   :  { %373 = vmatpush.bf16.msra.mxu1 %v6590_v13  ;;  %v6578_v28 = vor.u32 %v9691_v24, %v6575_v25  ;;  %v9689_v31 = vld [vmem:[#allocation6 + $0x34] sm:$0xf]  ;;  %v6567_v32 = vld [vmem:[#allocation6 + $0x38] sm:$0xf0]  ;;  %v6566_v34 = vor.u32 %v9690_v30, %v6565_v29  ;;  %v6557_v36 = vld [vmem:[#allocation6 + $0x20] sm:$0xf] }
  0x37   :  { %255 = vmatpush.bf16.msra.mxu0 %v9680_v12  ;;  %386 = vmatpush.bf16.msra.mxu2 %v6594_v14  ;;  %v9677_v33 = vld [vmem:[#allocation2 + $0x10] sm:$0xff]  ;;  %v6570_v35 = vor.u32 %v9689_v31, %v6567_v32  ;;  %v9688_v37 = vld [vmem:[#allocation6 + $0x24] sm:$0xf0]  ;;  %v9687_v38 = vld [vmem:[#allocation6 + $0x24] sm:$0xf] }
  0x38   :  { %v6559_v39 = vld [vmem:[#allocation6 + $0x28] sm:$0xf0]  ;;  %v6558_v41 = vor.u32 %v9688_v37, %v6557_v36  ;;  %v9675_v43 = vld [vmem:[#allocation2] sm:$0xff]  ;;  %v6549_v45 = vld [vmem:[#allocation6 + $0x10] sm:$0xf] }
  0x39   :  { %v9676_v40 = vld [vmem:[#allocation2 + $0x8] sm:$0xff]  ;;  %v6562_v42 = vor.u32 %v9687_v38, %v6559_v39  ;;  %v184_v44 = vld [vmem:[%s11184_s0] sm:$0xf]  ;;  %v9686_v46 = vld [vmem:[#allocation6 + $0x14] sm:$0xf0] }
  0x3a   :  { %374 = vmatpush.bf16.msra.mxu1 %v6582_v20  ;;  %v9685_v47 = vld [vmem:[#allocation6 + $0x14] sm:$0xf]  ;;  %v6550_v48 = vor.u32 %v9686_v46, %v6549_v45  ;;  %v6551_v49 = vld [vmem:[#allocation6 + $0x18] sm:$0xf0]  ;;  %v6541_v51 = vld [vmem:[#allocation6] sm:$0xf] }
  0x3b   :  { %256 = vmatpush.bf16.msra.mxu0 %v9679_v19  ;;  %387 = vmatpush.bf16.msra.mxu2 %v6586_v21  ;;  %v6554_v50 = vor.u32 %v9685_v47, %v6551_v49  ;;  %v9684_v52 = vld [vmem:[#allocation6 + $0x4] sm:$0xf0]  ;;  %v9683_v53 = vld [vmem:[#allocation6 + $0x4] sm:$0xf]  ;;  %v6543_v55 = vld [vmem:[#allocation6 + $0x8] sm:$0xf0] }
  0x3c   :  { %v6542_v54 = vor.u32 %v9684_v52, %v6541_v51  ;;  %v6546_v56 = vor.u32 %v9683_v53, %v6543_v55  ;;  %v6717_v57 = vld [vmem:[#allocation9 + $0xe0] sm:$0xf]  ;;  %v9729_v58 = vld [vmem:[#allocation9 + $0xec] sm:$0xf0]  ;;  %v9727_v59 = vld [vmem:[#allocation9 + $0xe4] sm:$0xf] }
  0x3d   :  { %v6718_v60 = vor.u32 %v9729_v58, %v6717_v57  ;;  %v6719_v61 = vld [vmem:[#allocation9 + $0xf0] sm:$0xf0]  ;;  %v6701_v62 = vld [vmem:[#allocation9 + $0xc0] sm:$0xf]  ;;  %v9725_v63 = vld [vmem:[#allocation9 + $0xcc] sm:$0xf0] }
  0x3e   :  { %375 = vmatpush.bf16.msra.mxu1 %v6574_v27  ;;  %v6722_v0 = vor.u32 %v9727_v59, %v6719_v61  ;;  %v9723_v1 = vld [vmem:[#allocation9 + $0xc4] sm:$0xf]  ;;  %v6703_v2 = vld [vmem:[#allocation9 + $0xd0] sm:$0xf0]  ;;  %v6845_v3 = vld [vmem:[#allocation9 + $0x1e0] sm:$0xf]  ;;  %v6702_v4 = vor.u32 %v9725_v63, %v6701_v62 }
  0x3f   :  { %257 = vmatpush.bf16.msra.mxu0 %v9678_v26  ;;  %388 = vmatpush.bf16.msra.mxu2 %v6578_v28  ;;  %v9761_v5 = vld [vmem:[#allocation9 + $0x1ec] sm:$0xf0]  ;;  %v9759_v6 = vld [vmem:[#allocation9 + $0x1e4] sm:$0xf]  ;;  %v6847_v7 = vld [vmem:[#allocation9 + $0x1f0] sm:$0xf0]  ;;  %v6706_v8 = vor.u32 %v9723_v1, %v6703_v2 }
  0x40   :  { %800 = vmatpush.bf16.msra.mxu3 %v6718_v60  ;;  %v6846_v9 = vor.u32 %v9761_v5, %v6845_v3  ;;  %v6850_v10 = vor.u32 %v9759_v6, %v6847_v7  ;;  %v6685_v11 = vld [vmem:[#allocation9 + $0xa0] sm:$0xf]  ;;  %v9721_v12 = vld [vmem:[#allocation9 + $0xac] sm:$0xf0]  ;;  %v9719_v13 = vld [vmem:[#allocation9 + $0xa4] sm:$0xf] }
  0x41   :  { %v6687_v14 = vld [vmem:[#allocation9 + $0xb0] sm:$0xf0]  ;;  %v6829_v15 = vld [vmem:[#allocation9 + $0x1c0] sm:$0xf]  ;;  %v9757_v16 = vld [vmem:[#allocation9 + $0x1cc] sm:$0xf0]  ;;  %v6686_v20 = vor.u32 %v9721_v12, %v6685_v11 }
  0x42   :  { %376 = vmatpush.bf16.msra.mxu1 %v6566_v34  ;;  %v6830_v17 = vor.u32 %v9757_v16, %v6829_v15  ;;  %v9755_v18 = vld [vmem:[#allocation9 + $0x1c4] sm:$0xf]  ;;  %v6831_v19 = vld [vmem:[#allocation9 + $0x1d0] sm:$0xf0]  ;;  %v6669_v22 = vld [vmem:[#allocation9 + $0x80] sm:$0xf]  ;;  %v6690_v24 = vor.u32 %v9719_v13, %v6687_v14 }
  0x43   :  { %258 = vmatpush.bf16.msra.mxu0 %v9677_v33  ;;  %389 = vmatpush.bf16.msra.mxu2 %v6570_v35  ;;  %v6834_v21 = vor.u32 %v9755_v18, %v6831_v19  ;;  %v9717_v23 = vld [vmem:[#allocation9 + $0x8c] sm:$0xf0]  ;;  %v6813_v25 = vld [vmem:[#allocation9 + $0x1a0] sm:$0xf]  ;;  %v9751_v27 = vld [vmem:[#allocation9 + $0x1a4] sm:$0xf] }
  0x44   :  { %801 = vmatpush.bf16.msra.mxu3 %v6702_v4  ;;  %v9753_v26 = vld [vmem:[#allocation9 + $0x1ac] sm:$0xf0]  ;;  %v9715_v28 = vld [vmem:[#allocation9 + $0x84] sm:$0xf]  ;;  %v6671_v29 = vld [vmem:[#allocation9 + $0x90] sm:$0xf0]  ;;  %v6670_v34 = vor.u32 %v9717_v23, %v6669_v22 }
  0x45   :  { %v6815_v30 = vld [vmem:[#allocation9 + $0x1b0] sm:$0xf0]  ;;  %v6814_v31 = vor.u32 %v9753_v26, %v6813_v25  ;;  %v6797_v33 = vld [vmem:[#allocation9 + $0x180] sm:$0xf]  ;;  %v9749_v35 = vld [vmem:[#allocation9 + $0x18c] sm:$0xf0]  ;;  %v6674_v38 = vor.u32 %v9715_v28, %v6671_v29 }
  0x46   :  { %377 = vmatpush.bf16.msra.mxu1 %v6558_v41  ;;  %v6818_v32 = vor.u32 %v9751_v27, %v6815_v30  ;;  %v9747_v36 = vld [vmem:[#allocation9 + $0x184] sm:$0xf]  ;;  %v6799_v37 = vld [vmem:[#allocation9 + $0x190] sm:$0xf0]  ;;  %v6653_v39 = vld [vmem:[#allocation9 + $0x60] sm:$0xf] }
  0x47   :  { %259 = vmatpush.bf16.msra.mxu0 %v9676_v40  ;;  %390 = vmatpush.bf16.msra.mxu2 %v6562_v42  ;;  %v9713_v40 = vld [vmem:[#allocation9 + $0x6c] sm:$0xf0]  ;;  %v9711_v41 = vld [vmem:[#allocation9 + $0x64] sm:$0xf]  ;;  %v6655_v42 = vld [vmem:[#allocation9 + $0x70] sm:$0xf0] }
  0x48   :  { %802 = vmatpush.bf16.msra.mxu3 %v6686_v20  ;;  %v6781_v45 = vld [vmem:[#allocation9 + $0x160] sm:$0xf]  ;;  %v6654_v46 = vor.u32 %v9713_v40, %v6653_v39  ;;  %v9745_v47 = vld [vmem:[#allocation9 + $0x16c] sm:$0xf0]  ;;  %v6783_v49 = vld [vmem:[#allocation9 + $0x170] sm:$0xf0] }
  0x49   :  { %v6637_v51 = vld [vmem:[#allocation9 + $0x40] sm:$0xf]  ;;  %v9709_v52 = vld [vmem:[#allocation9 + $0x4c] sm:$0xf0]  ;;  %v9707_v53 = vld [vmem:[#allocation9 + $0x44] sm:$0xf]  ;;  %v6782_v55 = vor.u32 %v9745_v47, %v6781_v45 }
  0x4a   :  { %378 = vmatpush.bf16.msra.mxu1 %v6550_v48  ;;  %v9743_v48 = vld [vmem:[#allocation9 + $0x164] sm:$0xf]  ;;  %v6765_v57 = vld [vmem:[#allocation9 + $0x140] sm:$0xf]  ;;  %v6638_v58 = vor.u32 %v9709_v52, %v6637_v51  ;;  %v9741_v59 = vld [vmem:[#allocation9 + $0x14c] sm:$0xf0] }
  0x4b   :  { %260 = vmatpush.bf16.msra.mxu0 %v9675_v43  ;;  %391 = vmatpush.bf16.msra.mxu2 %v6554_v50  ;;  %v6798_v43 = vor.u32 %v9749_v35, %v6797_v33  ;;  %v6658_v50 = vor.u32 %v9711_v41, %v6655_v42  ;;  %v9739_v60 = vld [vmem:[#allocation9 + $0x144] sm:$0xf]  ;;  %v6767_v61 = vld [vmem:[#allocation9 + $0x150] sm:$0xf0]  ;;  %v6621_v63 = vld [vmem:[#allocation9 + $0x20] sm:$0xf]  ;;  %v6766_v4 = vor.u32 %v9741_v59, %v6765_v57 }
  0x4c   :  { %803 = vmatpush.bf16.msra.mxu3 %v6670_v34  ;;  %v10487_v1 = vld [vmem:[#allocation4] ss:$0 sm:$0xff]  ;;  %v9703_v2 = vld [vmem:[#allocation9 + $0x24] sm:$0xf]  ;;  %v6623_v3 = vld [vmem:[#allocation9 + $0x30] sm:$0xf0]  ;;  %v6770_v5 = vor.u32 %v9739_v60, %v6767_v61 }
  0x4d   :  { %v6605_v6 = vld [vmem:[#allocation9] sm:$0xf]  ;;  %v6751_v11 = vld [vmem:[#allocation9 + $0x130] sm:$0xf0]  ;;  %v6626_v13 = vor.u32 %v9703_v2, %v6623_v3  ;;  %v9701_v14 = vld [vmem:[#allocation9 + $0xc] sm:$0xf0] }
  0x4e   :  { %261 = vmatmul.bf16.vlgmr.msra.gmra.mxu0 %v184_v44  ;;  %379 = vmatpush.bf16.msra.mxu1 %v6542_v54  ;;  %v6802_v44 = vor.u32 %v9747_v36, %v6799_v37  ;;  %v6639_v54 = vld [vmem:[#allocation9 + $0x50] sm:$0xf0]  ;;  %v6749_v7 = vld [vmem:[#allocation9 + $0x120] sm:$0xf]  ;;  %v9699_v15 = vld [vmem:[#allocation9 + $0x4] sm:$0xf]  ;;  %v6606_v27 = vor.u32 %v9701_v14, %v6605_v6 }
  0x4f   :  { %392 = vmatpush.bf16.msra.mxu2 %v6546_v56  ;;  %813 = vmatpush.bf16.msrb.mxu0 %v6846_v9  ;;  %v6786_v56 = vor.u32 %v9743_v48, %v6783_v49  ;;  %v6642_v62 = vor.u32 %v9707_v53, %v6639_v54  ;;  %v9737_v9 = vld [vmem:[#allocation9 + $0x12c] sm:$0xf0]  ;;  %v6607_v16 = vld [vmem:[#allocation9 + $0x10] sm:$0xf0]  ;;  %v6725_v18 = vld [vmem:[#allocation9 + $0xe8] sm:$0xf] }
  0x50   :  { %804 = vmatpush.bf16.msra.mxu3 %v6654_v46  ;;  %v9730_v19 = vld [vmem:[#allocation9 + $0xf4] sm:$0xf0]  ;;  %v9728_v20 = vld [vmem:[#allocation9 + $0xec] sm:$0xf]  ;;  %v6750_v22 = vor.u32 %v9737_v9, %v6749_v7  ;;  %v9733_v25 = vld [vmem:[#allocation9 + $0x10c] sm:$0xf0]  ;;  %v6610_v33 = vor.u32 %v9699_v15, %v6607_v16 }
  0x51   :  { %v9731_v28 = vld [vmem:[#allocation9 + $0x104] sm:$0xf]  ;;  %v6735_v29 = vld [vmem:[#allocation9 + $0x110] sm:$0xf0]  ;;  %v6853_v30 = vld [vmem:[#allocation9 + $0x1e8] sm:$0xf]  ;;  %v6726_v34 = vor.u32 %v9730_v19, %v6725_v18 }
  0x52   :  { %826 = vmatpush.bf16.msrb.mxu1 %v6722_v0  ;;  %v9705_v0 = vld [vmem:[#allocation9 + $0x2c] sm:$0xf0]  ;;  %v9760_v35 = vld [vmem:[#allocation9 + $0x1ec] sm:$0xf]  ;;  %v6855_v36 = vld [vmem:[#allocation9 + $0x1f8] sm:$0xf0] }
  0x53   :  { %839 = vmatpush.bf16.msrb.mxu2 %v6850_v10  ;;  %814 = vmatpush.bf16.msrb.mxu0 %v6830_v17  ;;  %v9735_v10 = vld [vmem:[#allocation9 + $0x124] sm:$0xf]  ;;  %v6709_v39 = vld [vmem:[#allocation9 + $0xc8] sm:$0xf]  ;;  %v9726_v40 = vld [vmem:[#allocation9 + $0xd4] sm:$0xf0]  ;;  %v6858_v47 = vor.u32 %v9760_v35, %v6855_v36 }
  0x54   :  { %805 = vmatpush.bf16.msra.mxu3 %v6638_v58  ;;  %v6754_v23 = vor.u32 %v9735_v10, %v6751_v11  ;;  %v9724_v42 = vld [vmem:[#allocation9 + $0xcc] sm:$0xf]  ;;  %v6710_v48 = vor.u32 %v9726_v40, %v6709_v39  ;;  %v9722_v51 = vld [vmem:[#allocation9 + $0xb4] sm:$0xf0]  ;;  %v6695_v54 = vld [vmem:[#allocation9 + $0xb8] sm:$0xf0] }
  0x55   :  { %v9720_v52 = vld [vmem:[#allocation9 + $0xac] sm:$0xf]  ;;  %v9758_v57 = vld [vmem:[#allocation9 + $0x1d4] sm:$0xf0]  ;;  %v6839_v60 = vld [vmem:[#allocation9 + $0x1d8] sm:$0xf0] }
  0x56   :  { %827 = vmatpush.bf16.msrb.mxu1 %v6706_v8  ;;  %v6622_v8 = vor.u32 %v9705_v0, %v6621_v63  ;;  %v9756_v58 = vld [vmem:[#allocation9 + $0x1cc] sm:$0xf]  ;;  %v9718_v63 = vld [vmem:[#allocation9 + $0x94] sm:$0xf0]  ;;  %v6679_v2 = vld [vmem:[#allocation9 + $0x98] sm:$0xf0] }
  0x57   :  { %840 = vmatpush.bf16.msrb.mxu2 %v6834_v21  ;;  %815 = vmatpush.bf16.msrb.mxu0 %v6814_v31  ;;  %v6727_v21 = vld [vmem:[#allocation9 + $0xf8] sm:$0xf0]  ;;  %v9762_v31 = vld [vmem:[#allocation9 + $0x1f4] sm:$0xf0]  ;;  %v6842_v61 = vor.u32 %v9756_v58, %v6839_v60  ;;  %v9716_v0 = vld [vmem:[#allocation9 + $0x8c] sm:$0xf] }
  0x58   :  { %806 = vmatpush.bf16.msra.mxu3 %v6622_v8  ;;  %v6854_v45 = vor.u32 %v9762_v31, %v6853_v30  ;;  %v6682_v3 = vor.u32 %v9716_v0, %v6679_v2  ;;  %v9752_v6 = vld [vmem:[#allocation9 + $0x1ac] sm:$0xf]  ;;  %v6823_v8 = vld [vmem:[#allocation9 + $0x1b8] sm:$0xf0]  ;;  %v6661_v10 = vld [vmem:[#allocation9 + $0x68] sm:$0xf] }
  0x59   :  { %v6826_v9 = vor.u32 %v9752_v6, %v6823_v8  ;;  %v9714_v11 = vld [vmem:[#allocation9 + $0x74] sm:$0xf0]  ;;  %v6663_v14 = vld [vmem:[#allocation9 + $0x78] sm:$0xf0]  ;;  %v6805_v16 = vld [vmem:[#allocation9 + $0x188] sm:$0xf] }
  0x5a   :  { %828 = vmatpush.bf16.msrb.mxu1 %v6690_v24  ;;  %v6733_v24 = vld [vmem:[#allocation9 + $0x100] sm:$0xf]  ;;  %v9748_v18 = vld [vmem:[#allocation9 + $0x18c] sm:$0xf]  ;;  %v9706_v35 = vld [vmem:[#allocation9 + $0x34] sm:$0xf0] }
  0x5b   :  { %841 = vmatpush.bf16.msrb.mxu2 %v6818_v32  ;;  %816 = vmatpush.bf16.msrb.mxu0 %v6798_v43  ;;  %v6734_v41 = vor.u32 %v9733_v25, %v6733_v24  ;;  %v6711_v43 = vld [vmem:[#allocation9 + $0xd8] sm:$0xf0]  ;;  %v9708_v24 = vld [vmem:[#allocation9 + $0x4c] sm:$0xf]  ;;  %v6773_v39 = vld [vmem:[#allocation9 + $0x148] sm:$0xf] }
  0x5c   :  { %807 = vmatpush.bf16.msra.mxu3 %v6606_v27  ;;  %v6714_v49 = vor.u32 %v9724_v42, %v6711_v43  ;;  %v9744_v30 = vld [vmem:[#allocation9 + $0x16c] sm:$0xf]  ;;  %v9742_v40 = vld [vmem:[#allocation9 + $0x154] sm:$0xf0]  ;;  %v6741_v58 = vld [vmem:[#allocation9 + $0x108] sm:$0xf] }
  0x5d   :  { %v9704_v36 = vld [vmem:[#allocation9 + $0x2c] sm:$0xf]  ;;  %v6774_v42 = vor.u32 %v9742_v40, %v6773_v39  ;;  %v7597_v8 = vld [vmem:[#allocation12 + $0x5c0] sm:$0xf] }
  0x5e   :  { %829 = vmatpush.bf16.msrb.mxu1 %v6674_v38  ;;  %v6730_v38 = vor.u32 %v9728_v20, %v6727_v21  ;;  %v6807_v20 = vld [vmem:[#allocation9 + $0x198] sm:$0xf0]  ;;  %v9740_v43 = vld [vmem:[#allocation9 + $0x14c] sm:$0xf]  ;;  %v10007_v39 = vld [vmem:[#allocation12 + $0x79c] sm:$0xf0] }
  0x5f   :  { %842 = vmatpush.bf16.msrb.mxu2 %v6802_v44  ;;  %817 = vmatpush.bf16.msrb.mxu0 %v6782_v55  ;;  %v6738_v44 = vor.u32 %v9731_v28, %v6735_v29  ;;  %v6698_v55 = vor.u32 %v9720_v52, %v6695_v54  ;;  %v6810_v21 = vor.u32 %v9748_v18, %v6807_v20  ;;  %v6789_v28 = vld [vmem:[#allocation9 + $0x168] sm:$0xf]  ;;  %v9746_v29 = vld [vmem:[#allocation9 + $0x174] sm:$0xf0]  ;;  %v9736_v54 = vld [vmem:[#allocation9 + $0x12c] sm:$0xf] }
  0x60   :  { %852 = vmatpush.bf16.msrb.mxu3 %v6726_v34  ;;  %v6790_v31 = vor.u32 %v9746_v29, %v6789_v28  ;;  %v6629_v34 = vld [vmem:[#allocation9 + $0x28] sm:$0xf]  ;;  %v9732_v60 = vld [vmem:[#allocation9 + $0x10c] sm:$0xf]  ;;  %v9943_v20 = vld [vmem:[#allocation12 + $0x59c] sm:$0xf0] }
  0x61   :  { %v6757_v52 = vld [vmem:[#allocation9 + $0x128] sm:$0xf]  ;;  %v9807_v29 = vld [vmem:[#allocation12 + $0x15c] sm:$0xf0] }
  0x62   :  { %830 = vmatpush.bf16.msrb.mxu1 %v6658_v50  ;;  %v6693_v50 = vld [vmem:[#allocation9 + $0xa8] sm:$0xf] }
  0x63   :  { %843 = vmatpush.bf16.msrb.mxu2 %v6786_v56  ;;  %818 = vmatpush.bf16.msrb.mxu0 %v6766_v4  ;;  %v6694_v53 = vor.u32 %v9722_v51, %v6693_v50  ;;  %v6837_v56 = vld [vmem:[#allocation9 + $0x1c8] sm:$0xf] }
  0x64   :  { %853 = vmatpush.bf16.msrb.mxu3 %v6710_v48  ;;  %v6838_v59 = vor.u32 %v9758_v57, %v6837_v56  ;;  %v6821_v4 = vld [vmem:[#allocation9 + $0x1a8] sm:$0xf]  ;;  %v9700_v48 = vld [vmem:[#allocation9 + $0xc] sm:$0xf]  ;;  %v6759_v56 = vld [vmem:[#allocation9 + $0x138] sm:$0xf0] }
  0x65   :  { %v6762_v57 = vor.u32 %v9736_v54, %v6759_v56  ;;  %v6957_v54 = vld [vmem:[#allocation12 + $0xc0] sm:$0xf] }
  0x66   :  { %831 = vmatpush.bf16.msrb.mxu1 %v6642_v62  ;;  %v6677_v62 = vld [vmem:[#allocation9 + $0x88] sm:$0xf]  ;;  %v9791_v56 = vld [vmem:[#allocation12 + $0xdc] sm:$0xf0] }
  0x67   :  { %844 = vmatpush.bf16.msrb.mxu2 %v6770_v5  ;;  %819 = vmatpush.bf16.msrb.mxu0 %v6750_v22  ;;  %v9754_v5 = vld [vmem:[#allocation9 + $0x1b4] sm:$0xf0]  ;;  %v6645_v22 = vld [vmem:[#allocation9 + $0x48] sm:$0xf] }
  0x68   :  { %854 = vmatpush.bf16.msrb.mxu3 %v6694_v53  ;;  %v6822_v7 = vor.u32 %v9754_v5, %v6821_v4  ;;  %v9738_v53 = vld [vmem:[#allocation9 + $0x134] sm:$0xf0]  ;;  %v7085_v4 = vld [vmem:[#allocation12 + $0x1c0] sm:$0xf] }
  0x69   :  { %v9823_v5 = vld [vmem:[#allocation12 + $0x1dc] sm:$0xf0] }
  0x6a   :  { %832 = vmatpush.bf16.msrb.mxu1 %v6626_v13  ;;  %v6662_v13 = vor.u32 %v9714_v11, %v6661_v10  ;;  %v7086_v10 = vor.u32 %v9823_v5, %v7085_v4  ;;  %v9951_v11 = vld [vmem:[#allocation12 + $0x5dc] sm:$0xf0] }
  0x6b   :  { %845 = vmatpush.bf16.msrb.mxu2 %v6754_v23  ;;  %820 = vmatpush.bf16.msrb.mxu0 %v6734_v41  ;;  %v9710_v23 = vld [vmem:[#allocation9 + $0x54] sm:$0xf0]  ;;  %v9783_v4 = vld [vmem:[#allocation12 + $0x9c] sm:$0xf0] }
  0x6c   :  { %v6646_v25 = vor.u32 %v9710_v23, %v6645_v22  ;;  %v9887_v22 = vld [vmem:[#allocation12 + $0x3dc] sm:$0xf0] }
  0x6d   :  { %v7853_v23 = vld [vmem:[#allocation12 + $0x7c0] sm:$0xf] }
  0x6e   :  { %833 = vmatpush.bf16.msrb.mxu1 %v6610_v33  ;;  %v7437_v5 = vld [vmem:[#allocation12 + $0x480] sm:$0xf] }
  0x6f   :  { %846 = vmatpush.bf16.msrb.mxu2 %v6738_v44  ;;  %865 = vmatpush.bf16.msra.mxu0 %v6854_v45  ;;  %v6775_v44 = vld [vmem:[#allocation9 + $0x158] sm:$0xf0]  ;;  %v6613_v45 = vld [vmem:[#allocation9 + $0x8] sm:$0xf] }
  0x73   :  { %866 = vmatpush.bf16.msra.mxu0 %v6838_v59  ;;  %v9734_v59 = vld [vmem:[#allocation9 + $0x114] sm:$0xf0] }
  0x77   :  { %867 = vmatpush.bf16.msra.mxu0 %v6822_v7 }
  0xcb   :  { %v262_v12 = vpop.f32.mrf.mxu0 }
  0xcc   :  { %v263_v17 = vadd.f32 %v10487_v1, %v262_v12  ;;  %v6678_v1 = vor.u32 %v9718_v63, %v6677_v62  ;;  %v9712_v12 = vld [vmem:[#allocation9 + $0x6c] sm:$0xf]  ;;  %v6743_v62 = vld [vmem:[#allocation9 + $0x118] sm:$0xf0] }
  0xcd   :  { %v6666_v15 = vor.u32 %v9712_v12, %v6663_v14  ;;  %v286_v63 = vld [vmem:[#allocation7] sm:$0x3]  ;;  %v6746_v0 = vor.u32 %v9732_v60, %v6743_v62  ;;  %v7053_v14 = vld [vmem:[#allocation12 + $0x180] sm:$0xf] }
  0xce   :  { %v267_v26 = vmul.f32 0.2, %v263_v17  ;;  %vm266_vm0 = vcmp.ge.f32.partialorder %v263_v17, 0.0  ;;  %855 = vmatpush.bf16.msrb.mxu3 %v6678_v1  ;;  %v288_v1 = vperm.slane %v286_v63, 0  ;;  %v289_v7 = vperm.slane %v286_v63, 1 }
  0xcf   :  { %v7245_v60 = vld [vmem:[#allocation12 + $0x300] sm:$0xf] }
  0xd0   :  { %v268_v32 = vsel %vm266_vm0, %v263_v17, %v267_v26  ;;  %v9750_v17 = vld [vmem:[#allocation9 + $0x194] sm:$0xf0]  ;;  %v6647_v26 = vld [vmem:[#allocation9 + $0x58] sm:$0xf0]  ;;  %v9863_v62 = vld [vmem:[#allocation12 + $0x31c] sm:$0xf0] }
  0xd1   :  { %v269_v37 = vpack.c.bf16 %v268_v32, %v268_v32  ;;  %v6806_v19 = vor.u32 %v9750_v17, %v6805_v16  ;;  %v6650_v27 = vor.u32 %v9708_v24, %v6647_v26  ;;  %v6791_v32 = vld [vmem:[#allocation9 + $0x178] sm:$0xf0]  ;;  %v7598_v16 = vor.u32 %v9951_v11, %v7597_v8  ;;  %v7565_v17 = vld [vmem:[#allocation12 + $0x580] sm:$0xf] }
  0xd2   :  { %856 = vmatpush.bf16.msrb.mxu3 %v6662_v13  ;;  %v6794_v33 = vor.u32 %v9744_v30, %v6791_v32  ;;  %v10015_v24 = vld [vmem:[#allocation12 + $0x7dc] sm:$0xf0]  ;;  %v7566_v28 = vor.u32 %v9943_v20, %v7565_v17 }
  0xd3   :  { %v264_v46 = vpop.f32.mrf.mxu0  ;;  %380 = vmatmul.bf16.vlgmr.msra.gmra.mxu1 %v269_v37  ;;  %393 = vmatmul.bf16.vlgmr.msra.gmra.mxu2 %v269_v37  ;;  %v6630_v37 = vor.u32 %v9706_v35, %v6629_v34  ;;  %v7533_v30 = vld [vmem:[#allocation12 + $0x540] sm:$0xf]  ;;  %v7854_v35 = vor.u32 %v10015_v24, %v7853_v23 }
  0xd4   :  { %878 = vmatpush.bf16.msra.mxu1 %v6730_v38  ;;  %891 = vmatpush.bf16.msra.mxu2 %v6858_v47  ;;  %v6631_v38 = vld [vmem:[#allocation9 + $0x38] sm:$0xf0]  ;;  %v6778_v46 = vor.u32 %v9740_v43, %v6775_v44  ;;  %v9702_v47 = vld [vmem:[#allocation9 + $0x14] sm:$0xf0]  ;;  %v7309_v34 = vld [vmem:[#allocation12 + $0x380] sm:$0xf] }
  0xd5   :  { %868 = vmatpush.bf16.msra.mxu0 %v6806_v19  ;;  %v6634_v41 = vor.u32 %v9704_v36, %v6631_v38  ;;  %v6614_v50 = vor.u32 %v9702_v47, %v6613_v45  ;;  %v7341_v19 = vld [vmem:[#allocation12 + $0x3c0] sm:$0xf] }
  0xd6   :  { %857 = vmatpush.bf16.msrb.mxu3 %v6646_v25  ;;  %v7821_v38 = vld [vmem:[#allocation12 + $0x780] sm:$0xf] }
  0xd7   :  { %v9799_v44 = vld [vmem:[#allocation12 + $0x11c] sm:$0xf0] }
  0xd8   :  { %879 = vmatpush.bf16.msra.mxu1 %v6714_v49  ;;  %892 = vmatpush.bf16.msra.mxu2 %v6842_v61  ;;  %v6615_v49 = vld [vmem:[#allocation9 + $0x18] sm:$0xf0]  ;;  %v6742_v61 = vor.u32 %v9734_v59, %v6741_v58  ;;  %v7501_v45 = vld [vmem:[#allocation12 + $0x500] sm:$0xf] }
  0xd9   :  { %869 = vmatpush.bf16.msra.mxu0 %v6790_v31  ;;  %v6618_v51 = vor.u32 %v9700_v48, %v6615_v49  ;;  %v9935_v31 = vld [vmem:[#allocation12 + $0x55c] sm:$0xf0]  ;;  %v7822_v49 = vor.u32 %v10007_v39, %v7821_v38  ;;  %v9811_v39 = vld [vmem:[#allocation12 + $0x184] sm:$0xf] }
  0xda   :  { %858 = vmatpush.bf16.msrb.mxu3 %v6630_v37  ;;  %v9879_v37 = vld [vmem:[#allocation12 + $0x39c] sm:$0xf0] }
  0xdb   :  { %v7310_v47 = vor.u32 %v9879_v37, %v7309_v34  ;;  %v7277_v48 = vld [vmem:[#allocation12 + $0x340] sm:$0xf] }
  0xdc   :  { %880 = vmatpush.bf16.msra.mxu1 %v6698_v55  ;;  %893 = vmatpush.bf16.msra.mxu2 %v6826_v9  ;;  %v6758_v55 = vor.u32 %v9738_v53, %v6757_v52  ;;  %v9999_v52 = vld [vmem:[#allocation12 + $0x75c] sm:$0xf0] }
  0xdd   :  { %870 = vmatpush.bf16.msra.mxu0 %v6774_v42  ;;  %v7534_v42 = vor.u32 %v9935_v31, %v7533_v30  ;;  %v9919_v58 = vld [vmem:[#allocation12 + $0x4dc] sm:$0xf0]  ;;  %v9819_v30 = vld [vmem:[#allocation12 + $0x1c4] sm:$0xf] }
  0xde   :  { %859 = vmatpush.bf16.msrb.mxu3 %v6614_v50  ;;  %v9871_v50 = vld [vmem:[#allocation12 + $0x35c] sm:$0xf0]  ;;  %v7087_v31 = vld [vmem:[#allocation12 + $0x1e0] sm:$0xf0] }
  0xdf   :  { %v7278_v59 = vor.u32 %v9871_v50, %v7277_v48  ;;  %v7757_v63 = vld [vmem:[#allocation12 + $0x700] sm:$0xf]  ;;  %v7090_v37 = vor.u32 %v9819_v30, %v7087_v31  ;;  %v7311_v50 = vld [vmem:[#allocation12 + $0x3a0] sm:$0xf0] }
  0xe0   :  { %881 = vmatpush.bf16.msra.mxu1 %v6682_v3  ;;  %894 = vmatpush.bf16.msra.mxu2 %v6810_v21  ;;  %v7213_v8 = vld [vmem:[#allocation12 + $0x2c0] sm:$0xf]  ;;  %v9931_v30 = vld [vmem:[#allocation12 + $0x544] sm:$0xf] }
  0xe1   :  { %871 = vmatpush.bf16.msra.mxu0 %v6758_v55  ;;  %v7725_v11 = vld [vmem:[#allocation12 + $0x6c0] sm:$0xf]  ;;  %v7535_v31 = vld [vmem:[#allocation12 + $0x560] sm:$0xf0] }
  0xe2   :  { %v9775_v17 = vld [vmem:[#allocation12 + $0x5c] sm:$0xf0] }
  0xe3   :  { %v9847_v23 = vld [vmem:[#allocation12 + $0x29c] sm:$0xf0] }
  0xe4   :  { %882 = vmatpush.bf16.msra.mxu1 %v6666_v15  ;;  %895 = vmatpush.bf16.msra.mxu2 %v6794_v33  ;;  %v9815_v15 = vld [vmem:[#allocation12 + $0x19c] sm:$0xf0]  ;;  %v7342_v33 = vor.u32 %v9887_v22, %v7341_v19 }
  0xe5   :  { %872 = vmatpush.bf16.msra.mxu0 %v6742_v61  ;;  %v7054_v26 = vor.u32 %v9815_v15, %v7053_v14  ;;  %v6893_v15 = vld [vmem:[#allocation12 + $0x40] sm:$0xf] }
  0xe6   :  { %v9903_v19 = vld [vmem:[#allocation12 + $0x45c] sm:$0xf0] }
  0xe7   :  { %v7693_v24 = vld [vmem:[#allocation12 + $0x680] sm:$0xf] }
  0xe8   :  { %883 = vmatpush.bf16.msra.mxu1 %v6650_v27  ;;  %896 = vmatpush.bf16.msra.mxu2 %v6778_v46  ;;  %v7021_v27 = vld [vmem:[#allocation12 + $0x140] sm:$0xf] }
  0xe9   :  { %v7022_v40 = vor.u32 %v9807_v29, %v7021_v27  ;;  %v9927_v46 = vld [vmem:[#allocation12 + $0x51c] sm:$0xf0] }
  0xea   :  { %v7502_v55 = vor.u32 %v9927_v46, %v7501_v45  ;;  %v6861_v27 = vld [vmem:[#allocation12] sm:$0xf]  ;;  %v9803_v46 = vld [vmem:[#allocation12 + $0x144] sm:$0xf] }
  0xeb   :  { %v9839_v34 = vld [vmem:[#allocation12 + $0x25c] sm:$0xf0] }
  0xec   :  { %884 = vmatpush.bf16.msra.mxu1 %v6634_v41  ;;  %897 = vmatpush.bf16.msra.mxu2 %v6762_v57  ;;  %v6989_v41 = vld [vmem:[#allocation12 + $0x100] sm:$0xf] }
  0xed   :  { %v6990_v53 = vor.u32 %v9799_v44, %v6989_v41  ;;  %v7469_v57 = vld [vmem:[#allocation12 + $0x4c0] sm:$0xf] }
  0xee   :  { %v9831_v41 = vld [vmem:[#allocation12 + $0x21c] sm:$0xf0] }
  0xf0   :  { %885 = vmatpush.bf16.msra.mxu1 %v6618_v51  ;;  %898 = vmatpush.bf16.msra.mxu2 %v6746_v0  ;;  %v7789_v51 = vld [vmem:[#allocation12 + $0x740] sm:$0xf] }
  0xf1   :  { %v7790_v61 = vor.u32 %v9999_v52, %v7789_v51  ;;  %v9991_v0 = vld [vmem:[#allocation12 + $0x71c] sm:$0xf0]  ;;  %v9795_v52 = vld [vmem:[#allocation12 + $0x104] sm:$0xf] }
 0x150   :  { %v381_v2 = vpop.f32.mrf.mxu1 }
 0x151   :  { %v382_v3 = vadd.f32 %v381_v2, %v288_v1  ;;  %v6958_v1 = vor.u32 %v9791_v56, %v6957_v54  ;;  %v6925_v2 = vld [vmem:[#allocation12 + $0x80] sm:$0xf]  ;;  %v7279_v56 = vld [vmem:[#allocation12 + $0x360] sm:$0xf0] }
 0x152   :  { %v6926_v14 = vor.u32 %v9783_v4, %v6925_v2  ;;  %v9859_v4 = vld [vmem:[#allocation12 + $0x304] sm:$0xf] }
 0x153   :  { %vm398_vm1 = vcmp.ge.f32.partialorder %v382_v3, 0.0  ;;  %v400_v6 = vmul.f32 0.2, %v382_v3 }
 0x155   :  { %v402_v9 = vsel %vm398_vm1, %v382_v3, %v400_v6  ;;  %v7470_v3 = vor.u32 %v9919_v58, %v7469_v57  ;;  %v9911_v6 = vld [vmem:[#allocation12 + $0x49c] sm:$0xf0] }
 0x156   :  { %v10870_v12 = vpack.c.bf16 %v402_v9, %v402_v9  ;;  %v394_v13 = vpop.f32.mrf.mxu2  ;;  %v7758_v9 = vor.u32 %v9991_v0, %v7757_v63  ;;  %v9967_v63 = vld [vmem:[#allocation12 + $0x65c] sm:$0xf0]  ;;  %v9787_v0 = vld [vmem:[#allocation12 + $0xc4] sm:$0xf] }
 0x157   :  { %v395_v18 = vadd.f32 %v394_v13, %v289_v7  ;;  %v7246_v7 = vor.u32 %v9863_v62, %v7245_v60  ;;  %v9983_v13 = vld [vmem:[#allocation12 + $0x6dc] sm:$0xf0] }
 0x158   :  { %v383_v21 = vpop.f32.mrf.mxu1  ;;  %808 = vmatmul.bf16.vlgmr.msra.gmra.mxu3 %v10870_v12  ;;  %834 = vmatmul.bf16.vlgmr.msrb.gmra.mxu1 %v10870_v12  ;;  %v7726_v22 = vor.u32 %v9983_v13, %v7725_v11  ;;  %v9895_v60 = vld [vmem:[#allocation12 + $0x41c] sm:$0xf0] }
 0x159   :  { %vm399_vm2 = vcmp.ge.f32.partialorder %v395_v18, 0.0  ;;  %v401_v25 = vmul.f32 0.2, %v395_v18  ;;  %2474 = vmatpush.bf16.msra.mxu3 %v7086_v10  ;;  %2500 = vmatpush.bf16.msrb.mxu1 %v7598_v16  ;;  %v9855_v10 = vld [vmem:[#allocation12 + $0x2dc] sm:$0xf0]  ;;  %v7438_v16 = vor.u32 %v9911_v6, %v7437_v5 }
 0x15a   :  { %v7214_v20 = vor.u32 %v9855_v10, %v7213_v8  ;;  %v7181_v21 = vld [vmem:[#allocation12 + $0x280] sm:$0xf]  ;;  %v7247_v5 = vld [vmem:[#allocation12 + $0x320] sm:$0xf0] }
 0x15b   :  { %v403_v32 = vsel %vm399_vm2, %v395_v18, %v401_v25  ;;  %v7405_v18 = vld [vmem:[#allocation12 + $0x440] sm:$0xf]  ;;  %v7182_v29 = vor.u32 %v9847_v23, %v7181_v21  ;;  %v9947_v6 = vld [vmem:[#allocation12 + $0x5c4] sm:$0xf] }
 0x15c   :  { %v10874_v36 = vpack.c.bf16 %v403_v32, %v403_v32  ;;  %v9975_v25 = vld [vmem:[#allocation12 + $0x69c] sm:$0xf0]  ;;  %v7599_v8 = vld [vmem:[#allocation12 + $0x5e0] sm:$0xf0] }
 0x15d   :  { %2475 = vmatpush.bf16.msra.mxu3 %v7054_v26  ;;  %2501 = vmatpush.bf16.msrb.mxu1 %v7566_v28  ;;  %v7406_v26 = vor.u32 %v9903_v19, %v7405_v18  ;;  %v9767_v28 = vld [vmem:[#allocation12 + $0x1c] sm:$0xf0]  ;;  %v7694_v32 = vor.u32 %v9975_v25, %v7693_v24  ;;  %v7215_v18 = vld [vmem:[#allocation12 + $0x2e0] sm:$0xf0] }
 0x15e   :  { %v396_v43 = vpop.f32.mrf.mxu2  ;;  %821 = vmatmul.bf16.vlgmr.msrb.gmra.mxu0 %v10874_v36  ;;  %847 = vmatmul.bf16.vlgmr.msrb.gmra.mxu2 %v10874_v36  ;;  %v7629_v10 = vld [vmem:[#allocation12 + $0x600] sm:$0xf]  ;;  %v9939_v19 = vld [vmem:[#allocation12 + $0x584] sm:$0xf] }
 0x15f   :  { %2487 = vmatpush.bf16.msrb.mxu0 %v7342_v33  ;;  %2513 = vmatpush.bf16.msrb.mxu2 %v7854_v35  ;;  %v7149_v33 = vld [vmem:[#allocation12 + $0x240] sm:$0xf]  ;;  %v6862_v35 = vor.u32 %v9767_v28, %v6861_v27  ;;  %v7343_v43 = vld [vmem:[#allocation12 + $0x3e0] sm:$0xf0] }
 0x160   :  { %v7150_v38 = vor.u32 %v9839_v34, %v7149_v33  ;;  %v9959_v11 = vld [vmem:[#allocation12 + $0x61c] sm:$0xf0]  ;;  %v10011_v23 = vld [vmem:[#allocation12 + $0x7c4] sm:$0xf]  ;;  %v7538_v33 = vor.u32 %v9931_v30, %v7535_v31 }
 0x161   :  { %2476 = vmatpush.bf16.msra.mxu3 %v7022_v40  ;;  %2502 = vmatpush.bf16.msrb.mxu1 %v7534_v42  ;;  %v7055_v40 = vld [vmem:[#allocation12 + $0x1a0] sm:$0xf0]  ;;  %v7630_v13 = vor.u32 %v9959_v11, %v7629_v10 }
 0x162   :  { %v9883_v42 = vld [vmem:[#allocation12 + $0x3c4] sm:$0xf]  ;;  %v7058_v44 = vor.u32 %v9811_v39, %v7055_v40 }
 0x163   :  { %2488 = vmatpush.bf16.msrb.mxu0 %v7310_v47  ;;  %2514 = vmatpush.bf16.msrb.mxu2 %v7822_v49  ;;  %v7023_v47 = vld [vmem:[#allocation12 + $0x160] sm:$0xf0]  ;;  %v7346_v48 = vor.u32 %v9883_v42, %v7343_v43 }
 0x164   :  { %v9875_v49 = vld [vmem:[#allocation12 + $0x384] sm:$0xf]  ;;  %v7026_v51 = vor.u32 %v9803_v46, %v7023_v47 }
 0x165   :  { %2477 = vmatpush.bf16.msra.mxu3 %v6990_v53  ;;  %2503 = vmatpush.bf16.msrb.mxu1 %v7502_v55  ;;  %v6991_v53 = vld [vmem:[#allocation12 + $0x120] sm:$0xf0]  ;;  %v7314_v54 = vor.u32 %v9875_v49, %v7311_v50 }
 0x166   :  { %v9867_v55 = vld [vmem:[#allocation12 + $0x344] sm:$0xf]  ;;  %v6994_v57 = vor.u32 %v9795_v52, %v6991_v53 }
 0x167   :  { %2489 = vmatpush.bf16.msrb.mxu0 %v7278_v59  ;;  %2515 = vmatpush.bf16.msrb.mxu2 %v7790_v61  ;;  %v7282_v58 = vor.u32 %v9867_v55, %v7279_v56  ;;  %v7373_v59 = vld [vmem:[#allocation12 + $0x400] sm:$0xf]  ;;  %v7855_v24 = vld [vmem:[#allocation12 + $0x7e0] sm:$0xf0] }
 0x168   :  { %860 = vmatmul.bf16.vlgmr.msrb.gmra.mxu3 %v10870_v12  ;;  %886 = vmatmul.bf16.vlgmr.msra.gmra.mxu1 %v10870_v12  ;;  %v6894_v12 = vor.u32 %v9775_v17, %v6893_v15  ;;  %v7661_v61 = vld [vmem:[#allocation12 + $0x640] sm:$0xf]  ;;  %v7374_v62 = vor.u32 %v9895_v60, %v7373_v59  ;;  %v6927_v15 = vld [vmem:[#allocation12 + $0xa0] sm:$0xf0]  ;;  %v7858_v25 = vor.u32 %v10011_v23, %v7855_v24 }
 0x169   :  { %2478 = vmatpush.bf16.msra.mxu3 %v6958_v1  ;;  %2504 = vmatpush.bf16.msrb.mxu1 %v7470_v3  ;;  %v6959_v1 = vld [vmem:[#allocation12 + $0xe0] sm:$0xf0]  ;;  %v7662_v2 = vor.u32 %v9967_v63, %v7661_v61 }
 0x16a   :  { %v6962_v3 = vor.u32 %v9787_v0, %v6959_v1  ;;  %v9843_v27 = vld [vmem:[#allocation12 + $0x284] sm:$0xf] }
 0x16b   :  { %2490 = vmatpush.bf16.msrb.mxu0 %v7246_v7  ;;  %2516 = vmatpush.bf16.msrb.mxu2 %v7758_v9  ;;  %v7250_v7 = vor.u32 %v9859_v4, %v7247_v5  ;;  %v7602_v9 = vor.u32 %v9947_v6, %v7599_v8  ;;  %v10003_v34 = vld [vmem:[#allocation12 + $0x784] sm:$0xf] }
 0x16c   :  { %v6863_v39 = vld [vmem:[#allocation12 + $0x20] sm:$0xf0] }
 0x16d   :  { %2479 = vmatpush.bf16.msra.mxu3 %v6926_v14  ;;  %2505 = vmatpush.bf16.msrb.mxu1 %v7438_v16  ;;  %v9779_v14 = vld [vmem:[#allocation12 + $0x84] sm:$0xf] }
 0x16e   :  { %873 = vmatmul.bf16.vlgmr.msra.gmra.mxu0 %v10874_v36  ;;  %899 = vmatmul.bf16.vlgmr.msra.gmra.mxu2 %v10874_v36  ;;  %v7117_v36 = vld [vmem:[#allocation12 + $0x200] sm:$0xf]  ;;  %v9851_v16 = vld [vmem:[#allocation12 + $0x2c4] sm:$0xf]  ;;  %v6930_v17 = vor.u32 %v9779_v14, %v6927_v15  ;;  %v10882_v14 = vld [vmem:[#allocation10] sm:$0xf] }
 0x16f   :  { %2491 = vmatpush.bf16.msrb.mxu0 %v7214_v20  ;;  %2517 = vmatpush.bf16.msrb.mxu2 %v7726_v22  ;;  %v7118_v45 = vor.u32 %v9831_v41, %v7117_v36  ;;  %v7567_v20 = vld [vmem:[#allocation12 + $0x5a0] sm:$0xf0]  ;;  %v7218_v21 = vor.u32 %v9851_v16, %v7215_v18 }
 0x170   :  { %v7570_v22 = vor.u32 %v9939_v19, %v7567_v20  ;;  %v9835_v40 = vld [vmem:[#allocation12 + $0x244] sm:$0xf] }
 0x171   :  { %2480 = vmatpush.bf16.msra.mxu3 %v6894_v12  ;;  %2506 = vmatpush.bf16.msrb.mxu1 %v7406_v26  ;;  %v9771_v12 = vld [vmem:[#allocation12 + $0x44] sm:$0xf] }
 0x172   :  { %v6895_v26 = vld [vmem:[#allocation12 + $0x60] sm:$0xf0] }
 0x173   :  { %2492 = vmatpush.bf16.msrb.mxu0 %v7182_v29  ;;  %2518 = vmatpush.bf16.msrb.mxu2 %v7694_v32  ;;  %v6898_v28 = vor.u32 %v9771_v12, %v6895_v26  ;;  %v7183_v29 = vld [vmem:[#allocation12 + $0x2a0] sm:$0xf0]  ;;  %v9824_v12 = vld [vmem:[#allocation12 + $0x1e4] sm:$0xf0] }
 0x174   :  { %v7186_v32 = vor.u32 %v9843_v27, %v7183_v29  ;;  %v7151_v41 = vld [vmem:[#allocation12 + $0x260] sm:$0xf0] }
 0x175   :  { %2481 = vmatpush.bf16.msra.mxu3 %v6862_v35  ;;  %2507 = vmatpush.bf16.msrb.mxu1 %v7374_v62  ;;  %v7823_v35 = vld [vmem:[#allocation12 + $0x7a0] sm:$0xf0] }
 0x176   :  { %v9923_v42 = vld [vmem:[#allocation12 + $0x504] sm:$0xf] }
 0x177   :  { %2493 = vmatpush.bf16.msrb.mxu0 %v7150_v38  ;;  %2519 = vmatpush.bf16.msrb.mxu2 %v7662_v2  ;;  %v9763_v38 = vld [vmem:[#allocation12 + $0x4] sm:$0xf] }
 0x178   :  { %v6866_v36 = vor.u32 %v9763_v38, %v6863_v39  ;;  %v7503_v43 = vld [vmem:[#allocation12 + $0x520] sm:$0xf0]  ;;  %v7349_v38 = vld [vmem:[#allocation12 + $0x3c8] sm:$0xf] }
 0x179   :  { %2526 = vmatpush.bf16.msrb.mxu3 %v7090_v37  ;;  %2552 = vmatpush.bf16.msra.mxu1 %v7602_v9  ;;  %v7826_v37 = vor.u32 %v10003_v34, %v7823_v35  ;;  %v9995_v46 = vld [vmem:[#allocation12 + $0x744] sm:$0xf]  ;;  %v9888_v39 = vld [vmem:[#allocation12 + $0x3e4] sm:$0xf0] }
 0x17a   :  { %v7791_v47 = vld [vmem:[#allocation12 + $0x760] sm:$0xf0] }
 0x17b   :  { %2494 = vmatpush.bf16.msrb.mxu0 %v7118_v45  ;;  %2520 = vmatpush.bf16.msrb.mxu2 %v7630_v13  ;;  %v7506_v45 = vor.u32 %v9923_v42, %v7503_v43  ;;  %v9827_v49 = vld [vmem:[#allocation12 + $0x204] sm:$0xf]  ;;  %v7350_v43 = vor.u32 %v9888_v39, %v7349_v38  ;;  %v9848_v38 = vld [vmem:[#allocation12 + $0x2a4] sm:$0xf0] }
 0x17c   :  { %v7119_v50 = vld [vmem:[#allocation12 + $0x220] sm:$0xf0]  ;;  %v7541_v39 = vld [vmem:[#allocation12 + $0x548] sm:$0xf] }
 0x17d   :  { %2527 = vmatpush.bf16.msrb.mxu3 %v7058_v44  ;;  %2553 = vmatpush.bf16.msra.mxu1 %v7570_v22  ;;  %v7154_v44 = vor.u32 %v9835_v40, %v7151_v41  ;;  %v7122_v52 = vor.u32 %v9827_v49, %v7119_v50  ;;  %v7471_v53 = vld [vmem:[#allocation12 + $0x4e0] sm:$0xf0]  ;;  %v474_v49 = vperm.slane %v10882_v14, 2 }
 0x17e   :  { %v7759_v55 = vld [vmem:[#allocation12 + $0x720] sm:$0xf0] }
 0x17f   :  { %2539 = vmatpush.bf16.msra.mxu0 %v7346_v48  ;;  %2565 = vmatpush.bf16.msra.mxu2 %v7858_v25  ;;  %v7794_v48 = vor.u32 %v9995_v46, %v7791_v47  ;;  %v7439_v59 = vld [vmem:[#allocation12 + $0x4a0] sm:$0xf0]  ;;  %v7093_v25 = vld [vmem:[#allocation12 + $0x1c8] sm:$0xf] }
 0x180   :  { %v9979_v61 = vld [vmem:[#allocation12 + $0x6c4] sm:$0xf]  ;;  %v7094_v31 = vor.u32 %v9824_v12, %v7093_v25  ;;  %v9808_v46 = vld [vmem:[#allocation12 + $0x164] sm:$0xf0] }
 0x181   :  { %2528 = vmatpush.bf16.msrb.mxu3 %v7026_v51  ;;  %2554 = vmatpush.bf16.msra.mxu1 %v7538_v33  ;;  %v9915_v51 = vld [vmem:[#allocation12 + $0x4c4] sm:$0xf]  ;;  %v7317_v47 = vld [vmem:[#allocation12 + $0x388] sm:$0xf] }
 0x182   :  { %v7474_v56 = vor.u32 %v9915_v51, %v7471_v53  ;;  %v7727_v62 = vld [vmem:[#allocation12 + $0x6e0] sm:$0xf0]  ;;  %v6997_v53 = vld [vmem:[#allocation12 + $0x108] sm:$0xf] }
 0x183   :  { %2540 = vmatpush.bf16.msra.mxu0 %v7314_v54  ;;  %2566 = vmatpush.bf16.msra.mxu2 %v7826_v37  ;;  %v9987_v54 = vld [vmem:[#allocation12 + $0x704] sm:$0xf]  ;;  %v7730_v63 = vor.u32 %v9979_v61, %v7727_v62  ;;  %v9816_v37 = vld [vmem:[#allocation12 + $0x1a4] sm:$0xf0] }
 0x184   :  { %v9899_v0 = vld [vmem:[#allocation12 + $0x444] sm:$0xf]  ;;  %v7861_v25 = vld [vmem:[#allocation12 + $0x7c8] sm:$0xf] }
 0x185   :  { %2529 = vmatpush.bf16.msrb.mxu3 %v6994_v57  ;;  %2555 = vmatpush.bf16.msra.mxu1 %v7506_v45  ;;  %v7762_v57 = vor.u32 %v9987_v54, %v7759_v55  ;;  %v7407_v1 = vld [vmem:[#allocation12 + $0x460] sm:$0xf0] }
 0x186   :  { %v9971_v2 = vld [vmem:[#allocation12 + $0x684] sm:$0xf] }
 0x187   :  { %2541 = vmatpush.bf16.msra.mxu0 %v7282_v58  ;;  %2567 = vmatpush.bf16.msra.mxu2 %v7794_v48  ;;  %v9907_v58 = vld [vmem:[#allocation12 + $0x484] sm:$0xf]  ;;  %v9880_v48 = vld [vmem:[#allocation12 + $0x3a4] sm:$0xf0] }
 0x188   :  { %v7442_v60 = vor.u32 %v9907_v58, %v7439_v59  ;;  %v7695_v4 = vld [vmem:[#allocation12 + $0x6a0] sm:$0xf0]  ;;  %v9872_v58 = vld [vmem:[#allocation12 + $0x364] sm:$0xf0]  ;;  %v475_v59 = vperm.slane %v10882_v14, 3 }
 0x189   :  { %2530 = vmatpush.bf16.msrb.mxu3 %v6962_v3  ;;  %2556 = vmatpush.bf16.msra.mxu1 %v7474_v56  ;;  %v7410_v3 = vor.u32 %v9899_v0, %v7407_v1  ;;  %v7698_v5 = vor.u32 %v9971_v2, %v7695_v4  ;;  %v9891_v6 = vld [vmem:[#allocation12 + $0x404] sm:$0xf]  ;;  %v9800_v56 = vld [vmem:[#allocation12 + $0x124] sm:$0xf0] }
 0x18a   :  { %v9963_v8 = vld [vmem:[#allocation12 + $0x644] sm:$0xf]  ;;  %v6965_v1 = vld [vmem:[#allocation12 + $0xc8] sm:$0xf] }
 0x18b   :  { %2542 = vmatpush.bf16.msra.mxu0 %v7250_v7  ;;  %2568 = vmatpush.bf16.msra.mxu2 %v7762_v57  ;;  %v7375_v7 = vld [vmem:[#allocation12 + $0x420] sm:$0xf0]  ;;  %v7285_v57 = vld [vmem:[#allocation12 + $0x348] sm:$0xf] }
 0x18c   :  { %v7378_v9 = vor.u32 %v9891_v6, %v7375_v7  ;;  %v7663_v10 = vld [vmem:[#allocation12 + $0x660] sm:$0xf0]  ;;  %v7286_v0 = vor.u32 %v9872_v58, %v7285_v57  ;;  %v9792_v2 = vld [vmem:[#allocation12 + $0xe4] sm:$0xf0]  ;;  %v7095_v57 = vld [vmem:[#allocation12 + $0x1e8] sm:$0xf0] }
 0x18d   :  { %2531 = vmatpush.bf16.msrb.mxu3 %v6930_v17  ;;  %2557 = vmatpush.bf16.msra.mxu1 %v7442_v60  ;;  %v7666_v11 = vor.u32 %v9963_v8, %v7663_v10  ;;  %v9955_v15 = vld [vmem:[#allocation12 + $0x604] sm:$0xf]  ;;  %v472_v17 = vperm.slane %v10882_v14, 0  ;;  %v9864_v4 = vld [vmem:[#allocation12 + $0x324] sm:$0xf0]  ;;  %v6966_v10 = vor.u32 %v9792_v2, %v6965_v1 }
 0x18e   :  { %v7631_v16 = vld [vmem:[#allocation12 + $0x620] sm:$0xf0]  ;;  %v9952_v8 = vld [vmem:[#allocation12 + $0x5e4] sm:$0xf0] }
 0x18f   :  { %2543 = vmatpush.bf16.msra.mxu0 %v7218_v21  ;;  %2569 = vmatpush.bf16.msra.mxu2 %v7730_v63  ;;  %v7634_v18 = vor.u32 %v9955_v15, %v7631_v16  ;;  %v473_v21 = vperm.slane %v10882_v14, 1  ;;  %v6998_v63 = vor.u32 %v9800_v56, %v6997_v53  ;;  %v9784_v16 = vld [vmem:[#allocation12 + $0xa4] sm:$0xf0]  ;;  %v9820_v56 = vld [vmem:[#allocation12 + $0x1cc] sm:$0xf] }
 0x190   :  { %v9928_v53 = vld [vmem:[#allocation12 + $0x524] sm:$0xf0]  ;;  %v7098_v2 = vor.u32 %v9820_v56, %v7095_v57 }
 0x191   :  { %2532 = vmatpush.bf16.msrb.mxu3 %v6898_v28  ;;  %2558 = vmatpush.bf16.msra.mxu1 %v7410_v3  ;;  %v7253_v3 = vld [vmem:[#allocation12 + $0x308] sm:$0xf] }
 0x192   :  { %v7254_v15 = vor.u32 %v9864_v4, %v7253_v3  ;;  %v9920_v1 = vld [vmem:[#allocation12 + $0x4e4] sm:$0xf0] }
 0x193   :  { %2544 = vmatpush.bf16.msra.mxu0 %v7186_v32  ;;  %2570 = vmatpush.bf16.msra.mxu2 %v7698_v5  ;;  %v7061_v32 = vld [vmem:[#allocation12 + $0x188] sm:$0xf] }
 0x194   :  { %v7062_v42 = vor.u32 %v9816_v37, %v7061_v32  ;;  %v7605_v5 = vld [vmem:[#allocation12 + $0x5c8] sm:$0xf] }
 0x195   :  { %2533 = vmatpush.bf16.msrb.mxu3 %v6866_v36  ;;  %2559 = vmatpush.bf16.msra.mxu1 %v7378_v9  ;;  %v7189_v37 = vld [vmem:[#allocation12 + $0x288] sm:$0xf] }
 0x196   :  { %v7765_v3 = vld [vmem:[#allocation12 + $0x708] sm:$0xf] }
 0x197   :  { %2545 = vmatpush.bf16.msra.mxu0 %v7154_v44  ;;  %2571 = vmatpush.bf16.msra.mxu2 %v7666_v11  ;;  %v7029_v44 = vld [vmem:[#allocation12 + $0x148] sm:$0xf] }
 0x198   :  { %v7030_v51 = vor.u32 %v9808_v46, %v7029_v44  ;;  %v6933_v11 = vld [vmem:[#allocation12 + $0x88] sm:$0xf]  ;;  %v7190_v44 = vor.u32 %v9848_v38, %v7189_v37  ;;  %v7287_v37 = vld [vmem:[#allocation12 + $0x368] sm:$0xf0] }
 0x199   :  { %v6869_v46 = vld [vmem:[#allocation12 + $0x8] sm:$0xf] }
 0x19a   :  { %v9992_v4 = vld [vmem:[#allocation12 + $0x724] sm:$0xf0] }
 0x19b   :  { %2546 = vmatpush.bf16.msra.mxu0 %v7122_v52  ;;  %2572 = vmatpush.bf16.msra.mxu2 %v7634_v18  ;;  %v7318_v52 = vor.u32 %v9880_v48, %v7317_v47  ;;  %v9856_v18 = vld [vmem:[#allocation12 + $0x2e4] sm:$0xf0] }
 0x19c   :  { %v9768_v47 = vld [vmem:[#allocation12 + $0x24] sm:$0xf0] }
 0x19d   :  { %v6870_v58 = vor.u32 %v9768_v47, %v6869_v46  ;;  %v9788_v46 = vld [vmem:[#allocation12 + $0xcc] sm:$0xf]  ;;  %v9960_v57 = vld [vmem:[#allocation12 + $0x624] sm:$0xf0] }
 0x19e   :  { %v6967_v47 = vld [vmem:[#allocation12 + $0xe8] sm:$0xf0] }
 0x1d5   :  { %v835_v13 = vpop.f32.mrf.mxu1 }
 0x1d6   :  { %v836_v26 = vadd.f32 %v835_v13, %v473_v21 }
 0x1db   :  { %v809_v19 = vpop.f32.mrf.mxu3  ;;  %v822_v20 = vpop.f32.mrf.mxu0 }
 0x1dc   :  { %v810_v22 = vadd.f32 %v809_v19, %v472_v17  ;;  %v7221_v17 = vld [vmem:[#allocation12 + $0x2c8] sm:$0xf] }
 0x1dd   :  { %v837_v23 = vpop.f32.mrf.mxu1 }
 0x1de   :  { %v823_v24 = vadd.f32 %v822_v20, %v810_v22  ;;  %v7606_v22 = vor.u32 %v9952_v8, %v7605_v5  ;;  %v7573_v23 = vld [vmem:[#allocation12 + $0x588] sm:$0xf]  ;;  %v9812_v5 = vld [vmem:[#allocation12 + $0x18c] sm:$0xf] }
 0x1df   :  { %v7351_v8 = vld [vmem:[#allocation12 + $0x3e8] sm:$0xf0] }
 0x1e0   :  { %vm904_vm3 = vcmp.ge.f32.partialorder %v823_v24, 0.0  ;;  %v908_v27 = vmul.f32 0.2, %v823_v24 }
 0x1e1   :  { %v848_v28 = vpop.f32.mrf.mxu2 }
 0x1e2   :  { %v912_v29 = vsel %vm904_vm3, %v823_v24, %v908_v27  ;;  %v849_v30 = vadd.f32 %v848_v28, %v836_v26  ;;  %v9944_v24 = vld [vmem:[#allocation12 + $0x5a4] sm:$0xf0]  ;;  %v6934_v28 = vor.u32 %v9784_v16, %v6933_v11  ;;  %v7766_v11 = vor.u32 %v9992_v4, %v7765_v3 }
 0x1e3   :  { %v10886_v33 = vpack.c.bf16 %v912_v29, %v912_v29  ;;  %v811_v34 = vpop.f32.mrf.mxu3  ;;  %v824_v35 = vpop.f32.mrf.mxu0  ;;  %v10016_v26 = vld [vmem:[#allocation12 + $0x7e4] sm:$0xf0]  ;;  %v7222_v29 = vor.u32 %v9856_v18, %v7221_v17 }
 0x1e4   :  { %vm905_vm4 = vcmp.ge.f32.partialorder %v849_v30, 0.0  ;;  %v909_v40 = vmul.f32 0.2, %v849_v30  ;;  %v7574_v34 = vor.u32 %v9944_v24, %v7573_v23  ;;  %v7862_v35 = vor.u32 %v10016_v26, %v7861_v25  ;;  %v7733_v17 = vld [vmem:[#allocation12 + $0x6c8] sm:$0xf] }
 0x1e5   :  { %v887_v36 = vpop.f32.mrf.mxu1  ;;  %2482 = vmatmul.bf16.vlgmr.msra.gmra.mxu3 %v10886_v33  ;;  %v9984_v18 = vld [vmem:[#allocation12 + $0x6e4] sm:$0xf0]  ;;  %v7319_v23 = vld [vmem:[#allocation12 + $0x3a8] sm:$0xf0] }
 0x1e6   :  { %v913_v41 = vsel %vm905_vm4, %v849_v30, %v909_v40  ;;  %2578 = vmatpush.bf16.msra.mxu3 %v7094_v31  ;;  %v888_v6 = vadd.f32 %v887_v36, %v475_v59  ;;  %v6901_v30 = vld [vmem:[#allocation12 + $0x48] sm:$0xf]  ;;  %v7734_v25 = vor.u32 %v9984_v18, %v7733_v17 }
 0x1e7   :  { %v10889_v45 = vpack.c.bf16 %v913_v41, %v913_v41  ;;  %v9776_v31 = vld [vmem:[#allocation12 + $0x64] sm:$0xf0] }
 0x1e8   :  { %v9936_v40 = vld [vmem:[#allocation12 + $0x564] sm:$0xf0] }
 0x1e9   :  { %v850_v50 = vpop.f32.mrf.mxu2  ;;  %2495 = vmatmul.bf16.vlgmr.msrb.gmra.mxu0 %v10889_v45  ;;  %v7829_v36 = vld [vmem:[#allocation12 + $0x788] sm:$0xf]  ;;  %v7542_v48 = vor.u32 %v9936_v40, %v7541_v39 }
 0x1ea   :  { %2579 = vmatpush.bf16.msra.mxu3 %v7062_v42  ;;  %2591 = vmatpush.bf16.msrb.mxu0 %v7350_v43  ;;  %v10008_v41 = vld [vmem:[#allocation12 + $0x7a4] sm:$0xf0]  ;;  %v6902_v43 = vor.u32 %v9776_v31, %v6901_v30  ;;  %v9796_v31 = vld [vmem:[#allocation12 + $0x10c] sm:$0xf] }
 0x1eb   :  { %v861_v54 = vpop.f32.mrf.mxu3  ;;  %v874_v55 = vpop.f32.mrf.mxu0  ;;  %v7157_v50 = vld [vmem:[#allocation12 + $0x248] sm:$0xf] }
 0x1ec   :  { %v862_v60 = vadd.f32 %v861_v54, %v474_v49  ;;  %v7830_v49 = vor.u32 %v10008_v41, %v7829_v36  ;;  %v7797_v54 = vld [vmem:[#allocation12 + $0x748] sm:$0xf] }
 0x1ed   :  { %v889_v61 = vpop.f32.mrf.mxu1  ;;  %v9904_v26 = vld [vmem:[#allocation12 + $0x464] sm:$0xf0] }
 0x1ee   :  { %v875_v62 = vadd.f32 %v874_v55, %v862_v60  ;;  %2580 = vmatpush.bf16.msra.mxu3 %v7030_v51  ;;  %2592 = vmatpush.bf16.msrb.mxu0 %v7318_v52  ;;  %v9840_v51 = vld [vmem:[#allocation12 + $0x264] sm:$0xf0] }
 0x1ef   :  { %v7509_v52 = vld [vmem:[#allocation12 + $0x508] sm:$0xf]  ;;  %v7158_v59 = vor.u32 %v9840_v51, %v7157_v50  ;;  %v9948_v50 = vld [vmem:[#allocation12 + $0x5cc] sm:$0xf] }
 0x1f0   :  { %vm906_vm5 = vcmp.ge.f32.partialorder %v875_v62, 0.0  ;;  %v910_v7 = vmul.f32 0.2, %v875_v62  ;;  %v10000_v55 = vld [vmem:[#allocation12 + $0x764] sm:$0xf0]  ;;  %v7510_v61 = vor.u32 %v9928_v53, %v7509_v52 }
 0x1f1   :  { %v900_v9 = vpop.f32.mrf.mxu2  ;;  %v7125_v60 = vld [vmem:[#allocation12 + $0x208] sm:$0xf]  ;;  %v7607_v51 = vld [vmem:[#allocation12 + $0x5e8] sm:$0xf0] }
 0x1f2   :  { %v914_v13 = vsel %vm906_vm5, %v875_v62, %v910_v7  ;;  %v901_v14 = vadd.f32 %v900_v9, %v888_v6  ;;  %2581 = vmatpush.bf16.msra.mxu3 %v6998_v63  ;;  %2593 = vmatpush.bf16.msrb.mxu0 %v7286_v0  ;;  %v7798_v62 = vor.u32 %v10000_v55, %v7797_v54  ;;  %v9832_v63 = vld [vmem:[#allocation12 + $0x224] sm:$0xf0]  ;;  %v7063_v6 = vld [vmem:[#allocation12 + $0x1a8] sm:$0xf0] }
 0x1f3   :  { %v10894_v19 = vpack.c.bf16 %v914_v13, %v914_v13  ;;  %v863_v20 = vpop.f32.mrf.mxu3  ;;  %v876_v21 = vpop.f32.mrf.mxu0  ;;  %v7477_v0 = vld [vmem:[#allocation12 + $0x4c8] sm:$0xf]  ;;  %v9884_v7 = vld [vmem:[#allocation12 + $0x3cc] sm:$0xf]  ;;  %v7126_v9 = vor.u32 %v9832_v63, %v7125_v60  ;;  %v6970_v55 = vor.u32 %v9788_v46, %v6967_v47  ;;  %v7610_v60 = vor.u32 %v9948_v50, %v7607_v51  ;;  %v9817_v46 = vld [vmem:[#allocation12 + $0x1ac] sm:$0xf0] }
 0x1f4   :  { %vm907_vm6 = vcmp.ge.f32.partialorder %v901_v14, 0.0  ;;  %v911_v12 = vmul.f32 0.2, %v901_v14  ;;  %v7445_v13 = vld [vmem:[#allocation12 + $0x488] sm:$0xf]  ;;  %v7354_v16 = vor.u32 %v9884_v7, %v7351_v8 }
 0x1f5   :  { %2508 = vmatmul.bf16.vlgmr.msrb.gmra.mxu1 %v10894_v19  ;;  %2534 = vmatmul.bf16.vlgmr.msrb.gmra.mxu3 %v10886_v33  ;;  %v9804_v20 = vld [vmem:[#allocation12 + $0x14c] sm:$0xf]  ;;  %v9976_v30 = vld [vmem:[#allocation12 + $0x6a4] sm:$0xf0]  ;;  %v7357_v47 = vld [vmem:[#allocation12 + $0x3d0] sm:$0xf] }
 0x1f6   :  { %v915_v27 = vsel %vm907_vm6, %v901_v14, %v911_v12  ;;  %2582 = vmatpush.bf16.msra.mxu3 %v6966_v10  ;;  %2594 = vmatpush.bf16.msrb.mxu0 %v7254_v15  ;;  %v7478_v10 = vor.u32 %v9920_v1, %v7477_v0  ;;  %v9912_v14 = vld [vmem:[#allocation12 + $0x4a4] sm:$0xf0]  ;;  %v7066_v15 = vor.u32 %v9812_v5, %v7063_v6  ;;  %v7031_v21 = vld [vmem:[#allocation12 + $0x168] sm:$0xf0] }
 0x1f7   :  { %v10898_v32 = vpack.c.bf16 %v915_v27, %v915_v27  ;;  %2604 = vmatpush.bf16.msrb.mxu1 %v7606_v22  ;;  %v9876_v22 = vld [vmem:[#allocation12 + $0x38c] sm:$0xf]  ;;  %v7446_v24 = vor.u32 %v9912_v14, %v7445_v13  ;;  %v7413_v12 = vld [vmem:[#allocation12 + $0x448] sm:$0xf]  ;;  %v7034_v27 = vor.u32 %v9804_v20, %v7031_v21 }
 0x1f8   :  { %v7414_v38 = vor.u32 %v9904_v26, %v7413_v12  ;;  %v7381_v40 = vld [vmem:[#allocation12 + $0x408] sm:$0xf]  ;;  %v9940_v63 = vld [vmem:[#allocation12 + $0x58c] sm:$0xf] }
 0x1f9   :  { %v902_v42 = vpop.f32.mrf.mxu2  ;;  %2521 = vmatmul.bf16.vlgmr.msrb.gmra.mxu2 %v10898_v32  ;;  %2547 = vmatmul.bf16.vlgmr.msra.gmra.mxu0 %v10889_v45  ;;  %v9896_v36 = vld [vmem:[#allocation12 + $0x424] sm:$0xf0]  ;;  %v7575_v0 = vld [vmem:[#allocation12 + $0x5a8] sm:$0xf0] }
 0x1fa   :  { %2583 = vmatpush.bf16.msra.mxu3 %v6934_v28  ;;  %2595 = vmatpush.bf16.msrb.mxu0 %v7222_v29  ;;  %v7322_v28 = vor.u32 %v9876_v22, %v7319_v23  ;;  %v7701_v29 = vld [vmem:[#allocation12 + $0x688] sm:$0xf]  ;;  %v7382_v52 = vor.u32 %v9896_v36, %v7381_v40  ;;  %v10012_v1 = vld [vmem:[#allocation12 + $0x7cc] sm:$0xf]  ;;  %v7578_v8 = vor.u32 %v9940_v63, %v7575_v0 }
 0x1fb   :  { %2605 = vmatpush.bf16.msrb.mxu1 %v7574_v34  ;;  %2617 = vmatpush.bf16.msrb.mxu2 %v7862_v35  ;;  %v6999_v34 = vld [vmem:[#allocation12 + $0x128] sm:$0xf0]  ;;  %v7702_v39 = vor.u32 %v9976_v30, %v7701_v29  ;;  %v7637_v54 = vld [vmem:[#allocation12 + $0x608] sm:$0xf]  ;;  %v7101_v29 = vld [vmem:[#allocation12 + $0x1d0] sm:$0xf] }
 0x1fc   :  { %v9868_v35 = vld [vmem:[#allocation12 + $0x34c] sm:$0xf]  ;;  %v7002_v41 = vor.u32 %v9796_v31, %v6999_v34  ;;  %v7638_v3 = vor.u32 %v9960_v57, %v7637_v54  ;;  %v9825_v30 = vld [vmem:[#allocation12 + $0x1ec] sm:$0xf0] }
 0x1fd   :  { %v7290_v42 = vor.u32 %v9868_v35, %v7287_v37  ;;  %v9772_v6 = vld [vmem:[#allocation12 + $0x4c] sm:$0xf] }
 0x1fe   :  { %2584 = vmatpush.bf16.msra.mxu3 %v6902_v43  ;;  %2596 = vmatpush.bf16.msrb.mxu0 %v7190_v44  ;;  %v7669_v43 = vld [vmem:[#allocation12 + $0x648] sm:$0xf]  ;;  %v6903_v7 = vld [vmem:[#allocation12 + $0x68] sm:$0xf0] }
 0x1ff   :  { %2606 = vmatpush.bf16.msrb.mxu1 %v7542_v48  ;;  %2618 = vmatpush.bf16.msrb.mxu2 %v7830_v49  ;;  %v9968_v44 = vld [vmem:[#allocation12 + $0x664] sm:$0xf0]  ;;  %v9860_v48 = vld [vmem:[#allocation12 + $0x30c] sm:$0xf]  ;;  %v6906_v17 = vor.u32 %v9772_v6, %v6903_v7  ;;  %v7005_v6 = vld [vmem:[#allocation12 + $0x110] sm:$0xf] }
 0x200   :  { %v7255_v49 = vld [vmem:[#allocation12 + $0x328] sm:$0xf0]  ;;  %v7670_v53 = vor.u32 %v9968_v44, %v7669_v43  ;;  %v7069_v44 = vld [vmem:[#allocation12 + $0x190] sm:$0xf] }
 0x201   :  { %v7258_v56 = vor.u32 %v9860_v48, %v7255_v49  ;;  %v9932_v13 = vld [vmem:[#allocation12 + $0x54c] sm:$0xf]  ;;  %v9889_v48 = vld [vmem:[#allocation12 + $0x3ec] sm:$0xf0]  ;;  %v7070_v54 = vor.u32 %v9817_v46, %v7069_v44 }
 0x202   :  { %2585 = vmatpush.bf16.msra.mxu3 %v6870_v58  ;;  %2597 = vmatpush.bf16.msrb.mxu0 %v7158_v59  ;;  %v9780_v58 = vld [vmem:[#allocation12 + $0x8c] sm:$0xf]  ;;  %v9801_v7 = vld [vmem:[#allocation12 + $0x12c] sm:$0xf0] }
 0x203   :  { %2607 = vmatpush.bf16.msrb.mxu1 %v7510_v61  ;;  %2619 = vmatpush.bf16.msrb.mxu2 %v7798_v62  ;;  %v6935_v59 = vld [vmem:[#allocation12 + $0xa8] sm:$0xf0]  ;;  %v6909_v46 = vld [vmem:[#allocation12 + $0x50] sm:$0xf] }
 0x204   :  { %v9852_v61 = vld [vmem:[#allocation12 + $0x2cc] sm:$0xf]  ;;  %v6938_v4 = vor.u32 %v9780_v58, %v6935_v59  ;;  %v7037_v58 = vld [vmem:[#allocation12 + $0x150] sm:$0xf] }
 0x205   :  { %2560 = vmatmul.bf16.vlgmr.msra.gmra.mxu1 %v10894_v19  ;;  %2586 = vmatmul.bf16.vlgmr.msra.gmra.mxu3 %v10886_v33  ;;  %v7223_v62 = vld [vmem:[#allocation12 + $0x2e8] sm:$0xf0]  ;;  %v9809_v59 = vld [vmem:[#allocation12 + $0x16c] sm:$0xf0] }
 0x206   :  { %2630 = vmatpush.bf16.msrb.mxu3 %v7098_v2  ;;  %2598 = vmatpush.bf16.msrb.mxu0 %v7126_v9  ;;  %v7863_v2 = vld [vmem:[#allocation12 + $0x7e8] sm:$0xf0]  ;;  %v7226_v5 = vor.u32 %v9852_v61, %v7223_v62  ;;  %v9881_v61 = vld [vmem:[#allocation12 + $0x3ac] sm:$0xf0] }
 0x207   :  { %2608 = vmatpush.bf16.msrb.mxu1 %v7478_v10  ;;  %2620 = vmatpush.bf16.msrb.mxu2 %v7766_v11  ;;  %v7866_v9 = vor.u32 %v10012_v1, %v7863_v2  ;;  %v9844_v10 = vld [vmem:[#allocation12 + $0x28c] sm:$0xf]  ;;  %v7038_v2 = vor.u32 %v9809_v59, %v7037_v58  ;;  %v6877_v58 = vld [vmem:[#allocation12 + $0x10] sm:$0xf] }
 0x208   :  { %v7191_v11 = vld [vmem:[#allocation12 + $0x2a8] sm:$0xf0]  ;;  %v9769_v59 = vld [vmem:[#allocation12 + $0x2c] sm:$0xf0] }
 0x209   :  { %2573 = vmatmul.bf16.vlgmr.msra.gmra.mxu2 %v10898_v32  ;;  %2599 = vmatmul.bf16.vlgmr.msrb.gmra.mxu0 %v10889_v45  ;;  %v7543_v14 = vld [vmem:[#allocation12 + $0x568] sm:$0xf0]  ;;  %v7194_v18 = vor.u32 %v9844_v10, %v7191_v11 }
 0x20a   :  { %2631 = vmatpush.bf16.msrb.mxu3 %v7066_v15  ;;  %2643 = vmatpush.bf16.msra.mxu0 %v7354_v16  ;;  %v10004_v15 = vld [vmem:[#allocation12 + $0x78c] sm:$0xf]  ;;  %v7546_v22 = vor.u32 %v9932_v13, %v7543_v14 }
 0x20b   :  { %2609 = vmatpush.bf16.msrb.mxu1 %v7446_v24  ;;  %2621 = vmatpush.bf16.msrb.mxu2 %v7734_v25  ;;  %v7831_v16 = vld [vmem:[#allocation12 + $0x7a8] sm:$0xf0] }
 0x20c   :  { %v9764_v20 = vld [vmem:[#allocation12 + $0xc] sm:$0xf]  ;;  %v7834_v23 = vor.u32 %v10004_v15, %v7831_v16  ;;  %v7006_v15 = vor.u32 %v9801_v7, %v7005_v6  ;;  %v6878_v6 = vor.u32 %v9769_v59, %v6877_v58  ;;  %v9789_v58 = vld [vmem:[#allocation12 + $0xd4] sm:$0xf] }
 0x20d   :  { %v6871_v21 = vld [vmem:[#allocation12 + $0x28] sm:$0xf0]  ;;  %v6975_v59 = vld [vmem:[#allocation12 + $0xf0] sm:$0xf0] }
 0x20e   :  { %2632 = vmatpush.bf16.msrb.mxu3 %v7034_v27  ;;  %2644 = vmatpush.bf16.msra.mxu0 %v7322_v28  ;;  %v9836_v24 = vld [vmem:[#allocation12 + $0x24c] sm:$0xf]  ;;  %v6874_v31 = vor.u32 %v9764_v20, %v6871_v21  ;;  %v6973_v20 = vld [vmem:[#allocation12 + $0xd0] sm:$0xf] }
 0x20f   :  { %2610 = vmatpush.bf16.msrb.mxu1 %v7414_v38  ;;  %2622 = vmatpush.bf16.msrb.mxu2 %v7702_v39  ;;  %v7159_v25 = vld [vmem:[#allocation12 + $0x268] sm:$0xf0]  ;;  %v9793_v21 = vld [vmem:[#allocation12 + $0xec] sm:$0xf0] }
 0x210   :  { %v9924_v12 = vld [vmem:[#allocation12 + $0x50c] sm:$0xf]  ;;  %v7162_v34 = vor.u32 %v9836_v24, %v7159_v25  ;;  %v7613_v24 = vld [vmem:[#allocation12 + $0x5d0] sm:$0xf] }
 0x211   :  { %v7511_v26 = vld [vmem:[#allocation12 + $0x528] sm:$0xf0]  ;;  %v9953_v25 = vld [vmem:[#allocation12 + $0x5ec] sm:$0xf0] }
 0x212   :  { %2633 = vmatpush.bf16.msrb.mxu3 %v7002_v41  ;;  %2645 = vmatpush.bf16.msra.mxu0 %v7290_v42  ;;  %v9996_v27 = vld [vmem:[#allocation12 + $0x74c] sm:$0xf]  ;;  %v7514_v37 = vor.u32 %v9924_v12, %v7511_v26  ;;  %v7102_v41 = vor.u32 %v9825_v30, %v7101_v29 }
 0x213   :  { %2611 = vmatpush.bf16.msrb.mxu1 %v7382_v52  ;;  %2623 = vmatpush.bf16.msrb.mxu2 %v7670_v53  ;;  %v7799_v28 = vld [vmem:[#allocation12 + $0x768] sm:$0xf0] }
 0x214   :  { %v9828_v35 = vld [vmem:[#allocation12 + $0x20c] sm:$0xf]  ;;  %v7802_v38 = vor.u32 %v9996_v27, %v7799_v28  ;;  %v6974_v28 = vor.u32 %v9793_v21, %v6973_v20  ;;  %v7071_v20 = vld [vmem:[#allocation12 + $0x1b0] sm:$0xf0] }
 0x215   :  { %v7127_v39 = vld [vmem:[#allocation12 + $0x228] sm:$0xf0]  ;;  %v9885_v21 = vld [vmem:[#allocation12 + $0x3d4] sm:$0xf] }
 0x216   :  { %2634 = vmatpush.bf16.msrb.mxu3 %v6970_v55  ;;  %2646 = vmatpush.bf16.msra.mxu0 %v7258_v56  ;;  %v9916_v40 = vld [vmem:[#allocation12 + $0x4cc] sm:$0xf]  ;;  %v7130_v49 = vor.u32 %v9828_v35, %v7127_v39  ;;  %v7358_v55 = vor.u32 %v9889_v48, %v7357_v47  ;;  %v7614_v35 = vor.u32 %v9953_v25, %v7613_v24  ;;  %v7581_v39 = vld [vmem:[#allocation12 + $0x590] sm:$0xf] }
 0x217   :  { %2656 = vmatpush.bf16.msra.mxu1 %v7610_v60  ;;  %2624 = vmatpush.bf16.msrb.mxu2 %v7638_v3  ;;  %v7479_v36 = vld [vmem:[#allocation12 + $0x4e8] sm:$0xf0]  ;;  %v7325_v60 = vld [vmem:[#allocation12 + $0x390] sm:$0xf] }
 0x218   :  { %2612 = vmatmul.bf16.vlgmr.msrb.gmra.mxu1 %v10894_v19  ;;  %v9988_v42 = vld [vmem:[#allocation12 + $0x70c] sm:$0xf]  ;;  %v7482_v50 = vor.u32 %v9916_v40, %v7479_v36  ;;  %v7326_v3 = vor.u32 %v9881_v61, %v7325_v60  ;;  %v9945_v40 = vld [vmem:[#allocation12 + $0x5ac] sm:$0xf0] }
 0x219   :  { %v7767_v43 = vld [vmem:[#allocation12 + $0x728] sm:$0xf0]  ;;  %v7869_v36 = vld [vmem:[#allocation12 + $0x7d0] sm:$0xf]  ;;  %v7582_v48 = vor.u32 %v9945_v40, %v7581_v39 }
 0x21a   :  { %2635 = vmatpush.bf16.msrb.mxu3 %v6938_v4  ;;  %2647 = vmatpush.bf16.msra.mxu0 %v7226_v5  ;;  %v7770_v51 = vor.u32 %v9988_v42, %v7767_v43  ;;  %v9908_v52 = vld [vmem:[#allocation12 + $0x48c] sm:$0xf]  ;;  %v9777_v47 = vld [vmem:[#allocation12 + $0x6c] sm:$0xf0] }
 0x21b   :  { %2657 = vmatpush.bf16.msra.mxu1 %v7578_v8  ;;  %2669 = vmatpush.bf16.msra.mxu2 %v7866_v9  ;;  %v7447_v53 = vld [vmem:[#allocation12 + $0x4a8] sm:$0xf0]  ;;  %v7293_v8 = vld [vmem:[#allocation12 + $0x350] sm:$0xf] }
 0x21c   :  { %2625 = vmatmul.bf16.vlgmr.msrb.gmra.mxu2 %v10898_v32  ;;  %v9980_v56 = vld [vmem:[#allocation12 + $0x6cc] sm:$0xf]  ;;  %v7450_v62 = vor.u32 %v9908_v52, %v7447_v53  ;;  %v9873_v9 = vld [vmem:[#allocation12 + $0x36c] sm:$0xf0] }
 0x21d   :  { %v7735_v57 = vld [vmem:[#allocation12 + $0x6e8] sm:$0xf0]  ;;  %v7294_v16 = vor.u32 %v9873_v9, %v7293_v8  ;;  %v7549_v52 = vld [vmem:[#allocation12 + $0x550] sm:$0xf] }
 0x21e   :  { %2636 = vmatpush.bf16.msrb.mxu3 %v6906_v17  ;;  %2648 = vmatpush.bf16.msra.mxu0 %v7194_v18  ;;  %v7738_v63 = vor.u32 %v9980_v56, %v7735_v57  ;;  %v9900_v0 = vld [vmem:[#allocation12 + $0x44c] sm:$0xf]  ;;  %v9937_v53 = vld [vmem:[#allocation12 + $0x56c] sm:$0xf0]  ;;  %v6910_v56 = vor.u32 %v9777_v47, %v6909_v46  ;;  %v9797_v46 = vld [vmem:[#allocation12 + $0x114] sm:$0xf] }
 0x21f   :  { %2658 = vmatpush.bf16.msra.mxu1 %v7546_v22  ;;  %2670 = vmatpush.bf16.msra.mxu2 %v7834_v23  ;;  %v7415_v1 = vld [vmem:[#allocation12 + $0x468] sm:$0xf0]  ;;  %v7261_v22 = vld [vmem:[#allocation12 + $0x310] sm:$0xf]  ;;  %v7550_v60 = vor.u32 %v9937_v53, %v7549_v52  ;;  %v7007_v47 = vld [vmem:[#allocation12 + $0x130] sm:$0xf0] }
 0x220   :  { %v9972_v4 = vld [vmem:[#allocation12 + $0x68c] sm:$0xf]  ;;  %v7418_v10 = vor.u32 %v9900_v0, %v7415_v1  ;;  %v9865_v23 = vld [vmem:[#allocation12 + $0x32c] sm:$0xf0] }
 0x221   :  { %v7703_v5 = vld [vmem:[#allocation12 + $0x6a8] sm:$0xf0]  ;;  %v7262_v29 = vor.u32 %v9865_v23, %v7261_v22  ;;  %v7517_v0 = vld [vmem:[#allocation12 + $0x510] sm:$0xf]  ;;  %v7359_v22 = vld [vmem:[#allocation12 + $0x3f0] sm:$0xf0] }
 0x222   :  { %2637 = vmatpush.bf16.msrb.mxu3 %v6874_v31  ;;  %2649 = vmatpush.bf16.msra.mxu0 %v7162_v34  ;;  %v7706_v11 = vor.u32 %v9972_v4, %v7703_v5  ;;  %v9892_v13 = vld [vmem:[#allocation12 + $0x40c] sm:$0xf]  ;;  %v6941_v31 = vld [vmem:[#allocation12 + $0x90] sm:$0xf]  ;;  %v9821_v4 = vld [vmem:[#allocation12 + $0x1d4] sm:$0xf] }
 0x223   :  { %2659 = vmatpush.bf16.msra.mxu1 %v7514_v37  ;;  %2671 = vmatpush.bf16.msra.mxu2 %v7802_v38  ;;  %v7383_v14 = vld [vmem:[#allocation12 + $0x428] sm:$0xf0]  ;;  %v9785_v34 = vld [vmem:[#allocation12 + $0xac] sm:$0xf0]  ;;  %v7103_v5 = vld [vmem:[#allocation12 + $0x1f0] sm:$0xf0] }
 0x224   :  { %v9964_v17 = vld [vmem:[#allocation12 + $0x64c] sm:$0xf]  ;;  %v7386_v12 = vor.u32 %v9892_v13, %v7383_v14  ;;  %v7229_v37 = vld [vmem:[#allocation12 + $0x2d0] sm:$0xf]  ;;  %v6942_v43 = vor.u32 %v9785_v34, %v6941_v31  ;;  %v9805_v31 = vld [vmem:[#allocation12 + $0x154] sm:$0xf] }
 0x225   :  { %2638 = vmatmul.bf16.vlgmr.msrb.gmra.mxu3 %v10886_v33  ;;  %v7671_v18 = vld [vmem:[#allocation12 + $0x668] sm:$0xf0]  ;;  %v9857_v38 = vld [vmem:[#allocation12 + $0x2ec] sm:$0xf0]  ;;  %v7039_v34 = vld [vmem:[#allocation12 + $0x170] sm:$0xf0] }
 0x226   :  { %2682 = vmatpush.bf16.msra.mxu3 %v7102_v41  ;;  %2650 = vmatpush.bf16.msra.mxu0 %v7130_v49  ;;  %v7674_v26 = vor.u32 %v9964_v17, %v7671_v18  ;;  %v9956_v27 = vld [vmem:[#allocation12 + $0x60c] sm:$0xf]  ;;  %v10017_v41 = vld [vmem:[#allocation12 + $0x7ec] sm:$0xf0]  ;;  %v7230_v44 = vor.u32 %v9857_v38, %v7229_v37  ;;  %v9813_v18 = vld [vmem:[#allocation12 + $0x194] sm:$0xf] }
 0x227   :  { %2660 = vmatpush.bf16.msra.mxu1 %v7482_v50  ;;  %2672 = vmatpush.bf16.msra.mxu2 %v7770_v51  ;;  %v7639_v30 = vld [vmem:[#allocation12 + $0x628] sm:$0xf0]  ;;  %v7870_v49 = vor.u32 %v10017_v41, %v7869_v36  ;;  %v7197_v50 = vld [vmem:[#allocation12 + $0x290] sm:$0xf]  ;;  %v7327_v37 = vld [vmem:[#allocation12 + $0x3b0] sm:$0xf0]  ;;  %v7042_v41 = vor.u32 %v9805_v31, %v7039_v34 }
 0x228   :  { %v7642_v42 = vor.u32 %v9956_v27, %v7639_v30  ;;  %v9849_v51 = vld [vmem:[#allocation12 + $0x2ac] sm:$0xf0]  ;;  %v7074_v27 = vor.u32 %v9813_v18, %v7071_v20  ;;  %v9773_v20 = vld [vmem:[#allocation12 + $0x54] sm:$0xf] }
 0x229   :  { %2651 = vmatmul.bf16.vlgmr.msra.gmra.mxu0 %v10889_v45  ;;  %v7198_v57 = vor.u32 %v9849_v51, %v7197_v50  ;;  %v9929_v1 = vld [vmem:[#allocation12 + $0x52c] sm:$0xf0]  ;;  %v9765_v31 = vld [vmem:[#allocation12 + $0x14] sm:$0xf] }
 0x22a   :  { %2683 = vmatpush.bf16.msra.mxu3 %v7070_v54  ;;  %2695 = vmatpush.bf16.msrb.mxu0 %v7358_v55  ;;  %v7837_v54 = vld [vmem:[#allocation12 + $0x790] sm:$0xf]  ;;  %v7518_v9 = vor.u32 %v9929_v1, %v7517_v0  ;;  %v6879_v34 = vld [vmem:[#allocation12 + $0x30] sm:$0xf0] }
 0x22b   :  { %2661 = vmatpush.bf16.msra.mxu1 %v7450_v62  ;;  %2673 = vmatpush.bf16.msra.mxu2 %v7738_v63  ;;  %v10009_v55 = vld [vmem:[#allocation12 + $0x7ac] sm:$0xf0] }
 0x22c   :  { %v7838_v61 = vor.u32 %v10009_v55, %v7837_v54  ;;  %v7165_v62 = vld [vmem:[#allocation12 + $0x250] sm:$0xf]  ;;  %v7010_v54 = vor.u32 %v9797_v46, %v7007_v47  ;;  %v6882_v46 = vor.u32 %v9765_v31, %v6879_v34  ;;  %v9965_v34 = vld [vmem:[#allocation12 + $0x654] sm:$0xf] }
 0x22d   :  { %v9841_v63 = vld [vmem:[#allocation12 + $0x26c] sm:$0xf0] }
 0x22e   :  { %2684 = vmatpush.bf16.msra.mxu3 %v7038_v2  ;;  %2696 = vmatpush.bf16.msrb.mxu0 %v7326_v3  ;;  %v7805_v2 = vld [vmem:[#allocation12 + $0x750] sm:$0xf]  ;;  %v7166_v7 = vor.u32 %v9841_v63, %v7165_v62  ;;  %v9949_v62 = vld [vmem:[#allocation12 + $0x5d4] sm:$0xf] }
 0x22f   :  { %2662 = vmatpush.bf16.msra.mxu1 %v7418_v10  ;;  %2674 = vmatpush.bf16.msra.mxu2 %v7706_v11  ;;  %v10001_v3 = vld [vmem:[#allocation12 + $0x76c] sm:$0xf0]  ;;  %v7615_v63 = vld [vmem:[#allocation12 + $0x5f0] sm:$0xf0] }
 0x230   :  { %v7133_v8 = vld [vmem:[#allocation12 + $0x210] sm:$0xf]  ;;  %v7806_v10 = vor.u32 %v10001_v3, %v7805_v2  ;;  %v6978_v3 = vor.u32 %v9789_v58, %v6975_v59  ;;  %v9818_v58 = vld [vmem:[#allocation12 + $0x1b4] sm:$0xf0] }
 0x231   :  { %v9833_v11 = vld [vmem:[#allocation12 + $0x22c] sm:$0xf0]  ;;  %v7365_v59 = vld [vmem:[#allocation12 + $0x3d8] sm:$0xf] }
 0x232   :  { %2685 = vmatpush.bf16.msra.mxu3 %v7006_v15  ;;  %2697 = vmatpush.bf16.msrb.mxu0 %v7294_v16  ;;  %v7485_v13 = vld [vmem:[#allocation12 + $0x4d0] sm:$0xf]  ;;  %v7106_v15 = vor.u32 %v9821_v4, %v7103_v5  ;;  %v7134_v23 = vor.u32 %v9833_v11, %v7133_v8  ;;  %v7618_v8 = vor.u32 %v9949_v62, %v7615_v63  ;;  %v9941_v11 = vld [vmem:[#allocation12 + $0x594] sm:$0xf] }
 0x233   :  { %2663 = vmatpush.bf16.msra.mxu1 %v7386_v12  ;;  %2675 = vmatpush.bf16.msra.mxu2 %v7674_v26  ;;  %v9921_v14 = vld [vmem:[#allocation12 + $0x4ec] sm:$0xf0] }
 0x234   :  { %v7773_v16 = vld [vmem:[#allocation12 + $0x710] sm:$0xf]  ;;  %v7486_v24 = vor.u32 %v9921_v14, %v7485_v13  ;;  %v7583_v13 = vld [vmem:[#allocation12 + $0x5b0] sm:$0xf0] }
 0x235   :  { %v9993_v17 = vld [vmem:[#allocation12 + $0x72c] sm:$0xf0]  ;;  %v10013_v14 = vld [vmem:[#allocation12 + $0x7d4] sm:$0xf] }
 0x236   :  { %2686 = vmatpush.bf16.msra.mxu3 %v6974_v28  ;;  %2698 = vmatpush.bf16.msrb.mxu0 %v7262_v29  ;;  %v7774_v25 = vor.u32 %v9993_v17, %v7773_v16  ;;  %v7453_v12 = vld [vmem:[#allocation12 + $0x490] sm:$0xf]  ;;  %v7362_v28 = vor.u32 %v9885_v21, %v7359_v22  ;;  %v6911_v21 = vld [vmem:[#allocation12 + $0x70] sm:$0xf0]  ;;  %v7586_v22 = vor.u32 %v9941_v11, %v7583_v13 }
 0x237   :  { %2708 = vmatpush.bf16.msrb.mxu1 %v7614_v35  ;;  %2676 = vmatpush.bf16.msra.mxu2 %v7642_v42  ;;  %v9913_v26 = vld [vmem:[#allocation12 + $0x4ac] sm:$0xf0]  ;;  %v9877_v35 = vld [vmem:[#allocation12 + $0x394] sm:$0xf] }
 0x238   :  { %2664 = vmatmul.bf16.vlgmr.msra.gmra.mxu1 %v10894_v19  ;;  %v7741_v29 = vld [vmem:[#allocation12 + $0x6d0] sm:$0xf]  ;;  %v7454_v38 = vor.u32 %v9913_v26, %v7453_v12  ;;  %v7330_v42 = vor.u32 %v9877_v35, %v7327_v37  ;;  %v9933_v12 = vld [vmem:[#allocation12 + $0x554] sm:$0xf] }
 0x239   :  { %v9985_v30 = vld [vmem:[#allocation12 + $0x6ec] sm:$0xf0]  ;;  %v7551_v26 = vld [vmem:[#allocation12 + $0x570] sm:$0xf0] }
 0x23a   :  { %2687 = vmatpush.bf16.msra.mxu3 %v6942_v43  ;;  %2699 = vmatpush.bf16.msrb.mxu0 %v7230_v44  ;;  %v7742_v39 = vor.u32 %v9985_v30, %v7741_v29  ;;  %v7421_v40 = vld [vmem:[#allocation12 + $0x450] sm:$0xf]  ;;  %v6914_v29 = vor.u32 %v9773_v20, %v6911_v21  ;;  %v7554_v35 = vor.u32 %v9933_v12, %v7551_v26  ;;  %v9901_v13 = vld [vmem:[#allocation12 + $0x454] sm:$0xf]  ;;  %v7013_v20 = vld [vmem:[#allocation12 + $0x118] sm:$0xf] }
 0x23b   :  { %2709 = vmatpush.bf16.msrb.mxu1 %v7582_v48  ;;  %2721 = vmatpush.bf16.msrb.mxu2 %v7870_v49  ;;  %v9905_v36 = vld [vmem:[#allocation12 + $0x46c] sm:$0xf0]  ;;  %v9869_v48 = vld [vmem:[#allocation12 + $0x354] sm:$0xf]  ;;  %v10917_v21 = vld [vmem:[#allocation13] sm:$0xff] }
 0x23c   :  { %2677 = vmatmul.bf16.vlgmr.msra.gmra.mxu2 %v10898_v32  ;;  %v7709_v43 = vld [vmem:[#allocation12 + $0x690] sm:$0xf]  ;;  %v7295_v49 = vld [vmem:[#allocation12 + $0x370] sm:$0xf0]  ;;  %v7422_v50 = vor.u32 %v9905_v36, %v7421_v40  ;;  %v1178_v26 = vperm.slane %v10917_v21, 0 }
 0x23d   :  { %v9977_v44 = vld [vmem:[#allocation12 + $0x6ac] sm:$0xf0]  ;;  %v7298_v55 = vor.u32 %v9869_v48, %v7295_v49  ;;  %v9925_v40 = vld [vmem:[#allocation12 + $0x514] sm:$0xf] }
 0x23e   :  { %2688 = vmatpush.bf16.msra.mxu3 %v6910_v56  ;;  %2700 = vmatpush.bf16.msrb.mxu0 %v7198_v57  ;;  %v7710_v51 = vor.u32 %v9977_v44, %v7709_v43  ;;  %v7389_v52 = vld [vmem:[#allocation12 + $0x410] sm:$0xf]  ;;  %v7519_v36 = vld [vmem:[#allocation12 + $0x530] sm:$0xf0]  ;;  %v7109_v43 = vld [vmem:[#allocation12 + $0x1d8] sm:$0xf] }
 0x23f   :  { %2710 = vmatpush.bf16.msrb.mxu1 %v7550_v60  ;;  %2722 = vmatpush.bf16.msrb.mxu2 %v7838_v61  ;;  %v9897_v53 = vld [vmem:[#allocation12 + $0x42c] sm:$0xf0]  ;;  %v9861_v60 = vld [vmem:[#allocation12 + $0x314] sm:$0xf]  ;;  %v9826_v44 = vld [vmem:[#allocation12 + $0x1f4] sm:$0xf0]  ;;  %v7522_v49 = vor.u32 %v9925_v40, %v7519_v36 }
 0x240   :  { %v7677_v56 = vld [vmem:[#allocation12 + $0x650] sm:$0xf]  ;;  %v7263_v61 = vld [vmem:[#allocation12 + $0x330] sm:$0xf0]  ;;  %v7390_v0 = vor.u32 %v9897_v53, %v7389_v52  ;;  %v9866_v40 = vld [vmem:[#allocation12 + $0x334] sm:$0xf0] }
 0x241   :  { %v9969_v57 = vld [vmem:[#allocation12 + $0x66c] sm:$0xf0]  ;;  %v7266_v4 = vor.u32 %v9861_v60, %v7263_v61  ;;  %v9829_v48 = vld [vmem:[#allocation12 + $0x214] sm:$0xf]  ;;  %v9890_v60 = vld [vmem:[#allocation12 + $0x3f4] sm:$0xf0] }
 0x242   :  { %2689 = vmatpush.bf16.msra.mxu3 %v6878_v6  ;;  %2701 = vmatpush.bf16.msrb.mxu0 %v7166_v7  ;;  %v7678_v1 = vor.u32 %v9969_v57, %v7677_v56  ;;  %v7645_v2 = vld [vmem:[#allocation12 + $0x610] sm:$0xf]  ;;  %v9781_v6 = vld [vmem:[#allocation12 + $0x94] sm:$0xf]  ;;  %v7077_v57 = vld [vmem:[#allocation12 + $0x198] sm:$0xf] }
 0x243   :  { %2711 = vmatpush.bf16.msrb.mxu1 %v7518_v9  ;;  %2723 = vmatpush.bf16.msrb.mxu2 %v7806_v10  ;;  %v9961_v5 = vld [vmem:[#allocation12 + $0x62c] sm:$0xf0]  ;;  %v6943_v7 = vld [vmem:[#allocation12 + $0xb0] sm:$0xf0] }
 0x244   :  { %v9853_v9 = vld [vmem:[#allocation12 + $0x2d4] sm:$0xf]  ;;  %v7646_v16 = vor.u32 %v9961_v5, %v7645_v2  ;;  %v6946_v17 = vor.u32 %v9781_v6, %v6943_v7  ;;  %v7078_v2 = vor.u32 %v9818_v58, %v7077_v57  ;;  %v7045_v6 = vld [vmem:[#allocation12 + $0x158] sm:$0xf] }
 0x245   :  { %2690 = vmatmul.bf16.vlgmr.msra.gmra.mxu3 %v10886_v33  ;;  %v7231_v10 = vld [vmem:[#allocation12 + $0x2f0] sm:$0xf0]  ;;  %v9810_v7 = vld [vmem:[#allocation12 + $0x174] sm:$0xf0] }
 0x246   :  { %2734 = vmatpush.bf16.msrb.mxu3 %v7106_v15  ;;  %2702 = vmatpush.bf16.msrb.mxu0 %v7134_v23  ;;  %v7871_v15 = vld [vmem:[#allocation12 + $0x7f0] sm:$0xf0]  ;;  %v7234_v18 = vor.u32 %v9853_v9, %v7231_v10  ;;  %v9882_v9 = vld [vmem:[#allocation12 + $0x3b4] sm:$0xf0] }
 0x247   :  { %2712 = vmatpush.bf16.msrb.mxu1 %v7486_v24  ;;  %2724 = vmatpush.bf16.msrb.mxu2 %v7774_v25  ;;  %v7874_v23 = vor.u32 %v10013_v14, %v7871_v15  ;;  %v9845_v24 = vld [vmem:[#allocation12 + $0x294] sm:$0xf]  ;;  %v9946_v58 = vld [vmem:[#allocation12 + $0x5b4] sm:$0xf0] }
 0x248   :  { %v7199_v25 = vld [vmem:[#allocation12 + $0x2b0] sm:$0xf0] }
 0x249   :  { %2703 = vmatmul.bf16.vlgmr.msrb.gmra.mxu0 %v10889_v45  ;;  %v7202_v30 = vor.u32 %v9845_v24, %v7199_v25  ;;  %v9917_v52 = vld [vmem:[#allocation12 + $0x4d4] sm:$0xf]  ;;  %v9874_v24 = vld [vmem:[#allocation12 + $0x374] sm:$0xf0] }
 0x24a   :  { %2735 = vmatpush.bf16.msrb.mxu3 %v7074_v27  ;;  %2747 = vmatpush.bf16.msra.mxu0 %v7362_v28  ;;  %v10005_v27 = vld [vmem:[#allocation12 + $0x794] sm:$0xf] }
 0x24b   :  { %2713 = vmatpush.bf16.msrb.mxu1 %v7454_v38  ;;  %2725 = vmatpush.bf16.msrb.mxu2 %v7742_v39  ;;  %v7839_v28 = vld [vmem:[#allocation12 + $0x7b0] sm:$0xf0] }
 0x24c   :  { %v7842_v37 = vor.u32 %v10005_v27, %v7839_v28  ;;  %v9837_v38 = vld [vmem:[#allocation12 + $0x254] sm:$0xf] }
 0x24d   :  { %v7167_v39 = vld [vmem:[#allocation12 + $0x270] sm:$0xf0] }
 0x24e   :  { %2736 = vmatpush.bf16.msrb.mxu3 %v7042_v41  ;;  %2748 = vmatpush.bf16.msra.mxu0 %v7330_v42  ;;  %v9997_v41 = vld [vmem:[#allocation12 + $0x754] sm:$0xf]  ;;  %v7170_v47 = vor.u32 %v9837_v38, %v7167_v39  ;;  %v9794_v38 = vld [vmem:[#allocation12 + $0xf4] sm:$0xf0] }
 0x24f   :  { %2714 = vmatpush.bf16.msrb.mxu1 %v7422_v50  ;;  %2726 = vmatpush.bf16.msrb.mxu2 %v7710_v51  ;;  %v7807_v42 = vld [vmem:[#allocation12 + $0x770] sm:$0xf0]  ;;  %v7269_v39 = vld [vmem:[#allocation12 + $0x318] sm:$0xf] }
 0x250   :  { %v7810_v50 = vor.u32 %v9997_v41, %v7807_v42  ;;  %v7135_v51 = vld [vmem:[#allocation12 + $0x230] sm:$0xf0]  ;;  %v7621_v41 = vld [vmem:[#allocation12 + $0x5d8] sm:$0xf] }
 0x251   :  { %v7487_v53 = vld [vmem:[#allocation12 + $0x4f0] sm:$0xf0]  ;;  %v7138_v61 = vor.u32 %v9829_v48, %v7135_v51  ;;  %v9954_v42 = vld [vmem:[#allocation12 + $0x5f4] sm:$0xf0] }
 0x252   :  { %2737 = vmatpush.bf16.msrb.mxu3 %v7010_v54  ;;  %2749 = vmatpush.bf16.msra.mxu0 %v7298_v55  ;;  %v7110_v54 = vor.u32 %v9826_v44, %v7109_v43  ;;  %v9989_v55 = vld [vmem:[#allocation12 + $0x714] sm:$0xf]  ;;  %v7490_v62 = vor.u32 %v9917_v52, %v7487_v53  ;;  %v6949_v51 = vld [vmem:[#allocation12 + $0x98] sm:$0xf]  ;;  %v7622_v53 = vor.u32 %v9954_v42, %v7621_v41 }
 0x253   :  { %2715 = vmatpush.bf16.msrb.mxu1 %v7390_v0  ;;  %2727 = vmatpush.bf16.msrb.mxu2 %v7678_v1  ;;  %v7775_v56 = vld [vmem:[#allocation12 + $0x730] sm:$0xf0]  ;;  %v9786_v52 = vld [vmem:[#allocation12 + $0xb4] sm:$0xf0] }
 0x254   :  { %v7778_v63 = vor.u32 %v9989_v55, %v7775_v56  ;;  %v9909_v0 = vld [vmem:[#allocation12 + $0x494] sm:$0xf]  ;;  %v9858_v55 = vld [vmem:[#allocation12 + $0x2f4] sm:$0xf0] }
 0x255   :  { %v7455_v1 = vld [vmem:[#allocation12 + $0x4b0] sm:$0xf0]  ;;  %v7589_v56 = vld [vmem:[#allocation12 + $0x598] sm:$0xf] }
 0x256   :  { %2738 = vmatpush.bf16.msrb.mxu3 %v6978_v3  ;;  %2750 = vmatpush.bf16.msra.mxu0 %v7266_v4  ;;  %v7366_v3 = vor.u32 %v9890_v60, %v7365_v59  ;;  %v9981_v4 = vld [vmem:[#allocation12 + $0x6d4] sm:$0xf]  ;;  %v7458_v10 = vor.u32 %v9909_v0, %v7455_v1  ;;  %v7877_v59 = vld [vmem:[#allocation12 + $0x7d8] sm:$0xf] }
 0x257   :  { %2760 = vmatpush.bf16.msra.mxu1 %v7618_v8  ;;  %2728 = vmatpush.bf16.msrb.mxu2 %v7646_v16  ;;  %v7743_v5 = vld [vmem:[#allocation12 + $0x6f0] sm:$0xf0]  ;;  %v7333_v8 = vld [vmem:[#allocation12 + $0x398] sm:$0xf]  ;;  %v7046_v16 = vor.u32 %v9810_v7, %v7045_v6 }
 0x258   :  { %2716 = vmatmul.bf16.vlgmr.msrb.gmra.mxu1 %v10894_v19  ;;  %v7746_v11 = vor.u32 %v9981_v4, %v7743_v5  ;;  %v7423_v14 = vld [vmem:[#allocation12 + $0x470] sm:$0xf0]  ;;  %v10018_v60 = vld [vmem:[#allocation12 + $0x7f4] sm:$0xf0] }
 0x259   :  { %v9973_v15 = vld [vmem:[#allocation12 + $0x694] sm:$0xf]  ;;  %v7426_v25 = vor.u32 %v9901_v13, %v7423_v14  ;;  %v6917_v1 = vld [vmem:[#allocation12 + $0x58] sm:$0xf]  ;;  %v7878_v4 = vor.u32 %v10018_v60, %v7877_v59 }
 0x25a   :  { %2739 = vmatpush.bf16.msrb.mxu3 %v6946_v17  ;;  %2751 = vmatpush.bf16.msra.mxu0 %v7234_v18  ;;  %v7334_v17 = vor.u32 %v9882_v9, %v7333_v8  ;;  %v7711_v18 = vld [vmem:[#allocation12 + $0x6b0] sm:$0xf0]  ;;  %v7205_v5 = vld [vmem:[#allocation12 + $0x298] sm:$0xf] }
 0x25b   :  { %2761 = vmatpush.bf16.msra.mxu1 %v7586_v22  ;;  %2773 = vmatpush.bf16.msra.mxu2 %v7874_v23  ;;  %v9802_v22 = vld [vmem:[#allocation12 + $0x134] sm:$0xf0]  ;;  %v7714_v12 = vor.u32 %v9973_v15, %v7711_v18  ;;  %v9893_v27 = vld [vmem:[#allocation12 + $0x414] sm:$0xf] }
 0x25c   :  { %2729 = vmatmul.bf16.vlgmr.msrb.gmra.mxu2 %v10898_v32  ;;  %v7301_v23 = vld [vmem:[#allocation12 + $0x358] sm:$0xf]  ;;  %v7391_v28 = vld [vmem:[#allocation12 + $0x430] sm:$0xf0] }
 0x25d   :  { %v7394_v44 = vor.u32 %v9893_v27, %v7391_v28  ;;  %v9850_v6 = vld [vmem:[#allocation12 + $0x2b4] sm:$0xf0]  ;;  %v9822_v27 = vld [vmem:[#allocation12 + $0x1dc] sm:$0xf] }
 0x25e   :  { %2740 = vmatpush.bf16.msrb.mxu3 %v6914_v29  ;;  %2752 = vmatpush.bf16.msra.mxu0 %v7202_v30  ;;  %v7014_v29 = vor.u32 %v9802_v22, %v7013_v20  ;;  %v7302_v30 = vor.u32 %v9874_v24, %v7301_v23  ;;  %v7557_v7 = vld [vmem:[#allocation12 + $0x558] sm:$0xf]  ;;  %v7206_v14 = vor.u32 %v9850_v6, %v7205_v5  ;;  %v7111_v28 = vld [vmem:[#allocation12 + $0x1f8] sm:$0xf0] }
 0x25f   :  { %2762 = vmatpush.bf16.msra.mxu1 %v7554_v35  ;;  %2774 = vmatpush.bf16.msra.mxu2 %v7842_v37  ;;  %v7679_v35 = vld [vmem:[#allocation12 + $0x670] sm:$0xf0]  ;;  %v6981_v37 = vld [vmem:[#allocation12 + $0xd8] sm:$0xf] }
 0x260   :  { %v6982_v48 = vor.u32 %v9794_v38, %v6981_v37  ;;  %v9938_v9 = vld [vmem:[#allocation12 + $0x574] sm:$0xf0] }
 0x261   :  { %v7558_v18 = vor.u32 %v9938_v9, %v7557_v7  ;;  %v7173_v22 = vld [vmem:[#allocation12 + $0x258] sm:$0xf] }
 0x262   :  { %2741 = vmatpush.bf16.msrb.mxu3 %v6882_v46  ;;  %2753 = vmatpush.bf16.msra.mxu0 %v7170_v47  ;;  %v7682_v46 = vor.u32 %v9965_v34, %v7679_v35  ;;  %v9957_v47 = vld [vmem:[#allocation12 + $0x614] sm:$0xf]  ;;  %v9842_v23 = vld [vmem:[#allocation12 + $0x274] sm:$0xf0] }
 0x263   :  { %2763 = vmatpush.bf16.msra.mxu1 %v7522_v49  ;;  %2775 = vmatpush.bf16.msra.mxu2 %v7810_v50  ;;  %v7270_v49 = vor.u32 %v9866_v40, %v7269_v39  ;;  %v7647_v50 = vld [vmem:[#allocation12 + $0x630] sm:$0xf0]  ;;  %v7525_v24 = vld [vmem:[#allocation12 + $0x518] sm:$0xf] }
 0x264   :  { %v7141_v34 = vld [vmem:[#allocation12 + $0x218] sm:$0xf] }
 0x265   :  { %2742 = vmatmul.bf16.vlgmr.msrb.gmra.mxu3 %v10886_v33  ;;  %v9834_v38 = vld [vmem:[#allocation12 + $0x234] sm:$0xf0] }
 0x266   :  { %2786 = vmatpush.bf16.msra.mxu3 %v7110_v54  ;;  %2754 = vmatpush.bf16.msra.mxu0 %v7138_v61  ;;  %v2496_v31 = vpop.f32.mrf.mxu0  ;;  %v7237_v54 = vld [vmem:[#allocation12 + $0x2d8] sm:$0xf]  ;;  %v7650_v61 = vor.u32 %v9957_v47, %v7647_v50  ;;  %v9886_v47 = vld [vmem:[#allocation12 + $0x3dc] sm:$0xf] }
 0x267   :  { %2764 = vmatpush.bf16.msra.mxu1 %v7490_v62  ;;  %2776 = vmatpush.bf16.msra.mxu2 %v7778_v63  ;;  %v6950_v62 = vor.u32 %v9786_v52, %v6949_v51  ;;  %v7238_v63 = vor.u32 %v9858_v55, %v7237_v54  ;;  %v7493_v39 = vld [vmem:[#allocation12 + $0x4d8] sm:$0xf] }
 0x268   :  { %v2483_v36 = vpop.f32.mrf.mxu3  ;;  %v9922_v40 = vld [vmem:[#allocation12 + $0x4f4] sm:$0xf0] }
 0x269   :  { %2755 = vmatmul.bf16.vlgmr.msra.gmra.mxu0 %v10889_v45  ;;  %v2484_v43 = vadd.f32 %v2483_v36, %v1178_v26  ;;  %v10002_v26 = vld [vmem:[#allocation12 + $0x774] sm:$0xf0]  ;;  %v7114_v36 = vor.u32 %v9822_v27, %v7111_v28  ;;  %v7494_v51 = vor.u32 %v9922_v40, %v7493_v39  ;;  %v9790_v28 = vld [vmem:[#allocation12 + $0xdc] sm:$0xf] }
 0x26a   :  { %2787 = vmatpush.bf16.msra.mxu3 %v7078_v2  ;;  %2799 = vmatpush.bf16.msrb.mxu0 %v7366_v3  ;;  %v9778_v2 = vld [vmem:[#allocation12 + $0x74] sm:$0xf0]  ;;  %v7590_v3 = vor.u32 %v9946_v58, %v7589_v56 }
 0x26b   :  { %2765 = vmatpush.bf16.msra.mxu1 %v7458_v10  ;;  %2777 = vmatpush.bf16.msra.mxu2 %v7746_v11  ;;  %v10921_v57 = vadd.f32 %v2496_v31, %v2484_v43  ;;  %v7845_v10 = vld [vmem:[#allocation12 + $0x798] sm:$0xf]  ;;  %v6918_v13 = vor.u32 %v9778_v2, %v6917_v1 }
 0x26c   :  { %v10010_v11 = vld [vmem:[#allocation12 + $0x7b4] sm:$0xf0] }
 0x26d   :  { %v7846_v20 = vor.u32 %v10010_v11, %v7845_v10  ;;  %v7781_v42 = vld [vmem:[#allocation12 + $0x718] sm:$0xf]  ;;  %v9798_v11 = vld [vmem:[#allocation12 + $0x11c] sm:$0xf] }
 0x26e   :  { %2788 = vmatpush.bf16.msra.mxu3 %v7046_v16  ;;  %2800 = vmatpush.bf16.msrb.mxu0 %v7334_v17  ;;  %v2498_v0 = vpop.f32.mrf.mxu0  ;;  %v6885_v16 = vld [vmem:[#allocation12 + $0x18] sm:$0xf] }
 0x26f   :  { %2766 = vmatpush.bf16.msra.mxu1 %v7426_v25  ;;  %2778 = vmatpush.bf16.msra.mxu2 %v7714_v12  ;;  %v9770_v17 = vld [vmem:[#allocation12 + $0x34] sm:$0xf0]  ;;  %v7335_v0 = vld [vmem:[#allocation12 + $0x3b8] sm:$0xf0] }
 0x270   :  { %v2485_v8 = vpop.f32.mrf.mxu3  ;;  %v9930_v25 = vld [vmem:[#allocation12 + $0x534] sm:$0xf0] }
 0x271   :  { %v7813_v12 = vld [vmem:[#allocation12 + $0x758] sm:$0xf]  ;;  %v7526_v35 = vor.u32 %v9930_v25, %v7525_v24 }
 0x272   :  { %2789 = vmatpush.bf16.msra.mxu3 %v7014_v29  ;;  %2801 = vmatpush.bf16.msrb.mxu0 %v7302_v30  ;;  %v10924_v15 = vpop.f32.mrf.mxu1  ;;  %v6886_v29 = vor.u32 %v9770_v17, %v6885_v16  ;;  %v7174_v30 = vor.u32 %v9842_v23, %v7173_v22  ;;  %v7814_v37 = vor.u32 %v10002_v26, %v7813_v12  ;;  %v9994_v43 = vld [vmem:[#allocation12 + $0x734] sm:$0xf0]  ;;  %v7303_v16 = vld [vmem:[#allocation12 + $0x378] sm:$0xf0] }
 0x273   :  { %2767 = vmatpush.bf16.msra.mxu1 %v7394_v44  ;;  %2779 = vmatpush.bf16.msra.mxu2 %v7682_v46  ;;  %v9814_v44 = vld [vmem:[#allocation12 + $0x19c] sm:$0xf]  ;;  %v7782_v52 = vor.u32 %v9994_v43, %v7781_v42  ;;  %v9914_v54 = vld [vmem:[#allocation12 + $0x4b4] sm:$0xf0] }
 0x274   :  { %v7079_v46 = vld [vmem:[#allocation12 + $0x1b8] sm:$0xf0]  ;;  %v7749_v59 = vld [vmem:[#allocation12 + $0x6d8] sm:$0xf] }
 0x275   :  { %v7082_v55 = vor.u32 %v9814_v44, %v7079_v46  ;;  %v9986_v60 = vld [vmem:[#allocation12 + $0x6f4] sm:$0xf0] }
 0x276   :  { %2790 = vmatpush.bf16.msra.mxu3 %v6982_v48  ;;  %2802 = vmatpush.bf16.msrb.mxu0 %v7270_v49  ;;  %v10927_v31 = vpop.f32.mrf.mxu0  ;;  %v7367_v48 = vld [vmem:[#allocation12 + $0x3f8] sm:$0xf0]  ;;  %v7142_v49 = vor.u32 %v9834_v38, %v7141_v34  ;;  %v9906_v5 = vld [vmem:[#allocation12 + $0x474] sm:$0xf0] }
 0x277   :  { %2812 = vmatpush.bf16.msrb.mxu1 %v7622_v53  ;;  %2780 = vmatpush.bf16.msra.mxu2 %v7650_v61  ;;  %v7461_v53 = vld [vmem:[#allocation12 + $0x498] sm:$0xf]  ;;  %v7370_v56 = vor.u32 %v9886_v47, %v7367_v48  ;;  %v9806_v61 = vld [vmem:[#allocation12 + $0x15c] sm:$0xf] }
 0x278   :  { %2768 = vmatmul.bf16.vlgmr.msra.gmra.mxu1 %v10894_v19  ;;  %v10929_v41 = vpop.f32.mrf.mxu3  ;;  %v7462_v2 = vor.u32 %v9914_v54, %v7461_v53  ;;  %v7717_v9 = vld [vmem:[#allocation12 + $0x698] sm:$0xf]  ;;  %v7271_v34 = vld [vmem:[#allocation12 + $0x338] sm:$0xf0] }
 0x279   :  { %v9978_v10 = vld [vmem:[#allocation12 + $0x6b4] sm:$0xf0]  ;;  %v7623_v38 = vld [vmem:[#allocation12 + $0x5f8] sm:$0xf0] }
 0x27a   :  { %2791 = vmatpush.bf16.msra.mxu3 %v6950_v62  ;;  %2803 = vmatpush.bf16.msrb.mxu0 %v7238_v63  ;;  %v2511_v50 = vpop.f32.mrf.mxu1  ;;  %v7047_v62 = vld [vmem:[#allocation12 + $0x178] sm:$0xf0]  ;;  %v7397_v22 = vld [vmem:[#allocation12 + $0x418] sm:$0xf] }
 0x27b   :  { %2813 = vmatpush.bf16.msrb.mxu1 %v7590_v3  ;;  %2825 = vmatpush.bf16.msrb.mxu2 %v7878_v4  ;;  %v9878_v63 = vld [vmem:[#allocation12 + $0x39c] sm:$0xf]  ;;  %v7750_v3 = vor.u32 %v9986_v60, %v7749_v59  ;;  %v7429_v4 = vld [vmem:[#allocation12 + $0x458] sm:$0xf]  ;;  %v7050_v6 = vor.u32 %v9806_v61, %v7047_v62 }
 0x27c   :  { %2781 = vmatmul.bf16.vlgmr.msra.gmra.mxu2 %v10898_v32  ;;  %v10931_v58 = vpop.f32.mrf.mxu2  ;;  %v7338_v7 = vor.u32 %v9878_v63, %v7335_v0  ;;  %v9898_v23 = vld [vmem:[#allocation12 + $0x434] sm:$0xf0]  ;;  %v9782_v47 = vld [vmem:[#allocation12 + $0x9c] sm:$0xf] }
 0x27d   :  { %v7685_v26 = vld [vmem:[#allocation12 + $0x658] sm:$0xf]  ;;  %v7398_v39 = vor.u32 %v9898_v23, %v7397_v22  ;;  %v6951_v48 = vld [vmem:[#allocation12 + $0xb8] sm:$0xf0] }
 0x27e   :  { %2792 = vmatpush.bf16.msra.mxu3 %v6918_v13  ;;  %2804 = vmatpush.bf16.msrb.mxu0 %v7206_v14  ;;  %v2550_v1 = vpop.f32.mrf.mxu0  ;;  %v7015_v13 = vld [vmem:[#allocation12 + $0x138] sm:$0xf0]  ;;  %v9970_v27 = vld [vmem:[#allocation12 + $0x674] sm:$0xf0]  ;;  %v6954_v60 = vor.u32 %v9782_v47, %v6951_v48 }
 0x27f   :  { %2814 = vmatpush.bf16.msrb.mxu1 %v7558_v18  ;;  %2826 = vmatpush.bf16.msrb.mxu2 %v7846_v20  ;;  %v9870_v14 = vld [vmem:[#allocation12 + $0x35c] sm:$0xf]  ;;  %v7430_v18 = vor.u32 %v9906_v5, %v7429_v4  ;;  %v7718_v20 = vor.u32 %v9978_v10, %v7717_v9  ;;  %v7018_v24 = vor.u32 %v9798_v11, %v7015_v13  ;;  %v9962_v46 = vld [vmem:[#allocation12 + $0x634] sm:$0xf0] }
 0x280   :  { %v2537_v8 = vpop.f32.mrf.mxu3  ;;  %v7306_v25 = vor.u32 %v9870_v14, %v7303_v16  ;;  %v7686_v40 = vor.u32 %v9970_v27, %v7685_v26  ;;  %v9854_v50 = vld [vmem:[#allocation12 + $0x2dc] sm:$0xf] }
 0x281   :  { %v7591_v54 = vld [vmem:[#allocation12 + $0x5b8] sm:$0xf0] }
 0x282   :  { %2793 = vmatpush.bf16.msra.mxu3 %v6886_v29  ;;  %2805 = vmatpush.bf16.msrb.mxu0 %v7174_v30  ;;  %v10935_v17 = vpop.f32.mrf.mxu1  ;;  %v6983_v29 = vld [vmem:[#allocation12 + $0xf8] sm:$0xf0] }
 0x283   :  { %2815 = vmatpush.bf16.msrb.mxu1 %v7526_v35  ;;  %2827 = vmatpush.bf16.msrb.mxu2 %v7814_v37  ;;  %v9862_v30 = vld [vmem:[#allocation12 + $0x31c] sm:$0xf]  ;;  %v6986_v42 = vor.u32 %v9790_v28, %v6983_v29  ;;  %v8081_v28 = vld [vmem:[#allocation15 + $0x188] sm:$0xf]  ;;  %v10071_v29 = vld [vmem:[#allocation15 + $0x1a0] sm:$0xf0] }
 0x284   :  { %v2524_v12 = vpop.f32.mrf.mxu2  ;;  %v9950_v37 = vld [vmem:[#allocation12 + $0x5dc] sm:$0xf]  ;;  %v7274_v43 = vor.u32 %v9862_v30, %v7271_v34 }
 0x285   :  { %2794 = vmatmul.bf16.vlgmr.msra.gmra.mxu3 %v10886_v33  ;;  %v9774_v63 = vld [vmem:[#allocation12 + $0x5c] sm:$0xf] }
 0x286   :  { %2838 = vmatpush.bf16.msrb.mxu3 %v7114_v36  ;;  %2806 = vmatpush.bf16.msrb.mxu0 %v7142_v49  ;;  %v10937_v35 = vpop.f32.mrf.mxu0  ;;  %v7653_v36 = vld [vmem:[#allocation12 + $0x618] sm:$0xf]  ;;  %v7626_v49 = vor.u32 %v9950_v37, %v7623_v38  ;;  %v6919_v0 = vld [vmem:[#allocation12 + $0x78] sm:$0xf0] }
 0x287   :  { %2816 = vmatpush.bf16.msrb.mxu1 %v7494_v51  ;;  %2828 = vmatpush.bf16.msrb.mxu2 %v7782_v52  ;;  %v7239_v51 = vld [vmem:[#allocation12 + $0x2f8] sm:$0xf0]  ;;  %v7654_v59 = vor.u32 %v9962_v46, %v7653_v36  ;;  %v6922_v10 = vor.u32 %v9774_v63, %v6919_v0  ;;  %v8082_v46 = vor.u32 %v10071_v29, %v8081_v28 }
 0x288   :  { %v10939_v44 = vpop.f32.mrf.mxu3  ;;  %v9942_v52 = vld [vmem:[#allocation12 + $0x59c] sm:$0xf]  ;;  %v7242_v61 = vor.u32 %v9854_v50, %v7239_v51  ;;  %v10064_v50 = vld [vmem:[#allocation15 + $0x168] sm:$0xf0]  ;;  %v8305_v51 = vld [vmem:[#allocation15 + $0x348] sm:$0xf] }
 0x289   :  { %2807 = vmatmul.bf16.vlgmr.msrb.gmra.mxu0 %v10889_v45  ;;  %v7594_v1 = vor.u32 %v9942_v52, %v7591_v54  ;;  %v7207_v4 = vld [vmem:[#allocation12 + $0x2b8] sm:$0xf0]  ;;  %v10127_v52 = vld [vmem:[#allocation15 + $0x360] sm:$0xf0] }
 0x28a   :  { %2839 = vmatpush.bf16.msrb.mxu3 %v7082_v55  ;;  %2851 = vmatpush.bf16.msra.mxu0 %v7370_v56  ;;  %v2563_v53 = vpop.f32.mrf.mxu1  ;;  %v10014_v55 = vld [vmem:[#allocation12 + $0x7dc] sm:$0xf] }
 0x28b   :  { %2817 = vmatpush.bf16.msrb.mxu1 %v7462_v2  ;;  %2829 = vmatpush.bf16.msrb.mxu2 %v7750_v3  ;;  %v7879_v56 = vld [vmem:[#allocation12 + $0x7f8] sm:$0xf0] }
 0x28c   :  { %v10941_v62 = vpop.f32.mrf.mxu2  ;;  %v7882_v2 = vor.u32 %v10014_v55, %v7879_v56  ;;  %v9846_v3 = vld [vmem:[#allocation12 + $0x29c] sm:$0xf] }
 0x28d   :  { %v9934_v5 = vld [vmem:[#allocation12 + $0x55c] sm:$0xf]  ;;  %v7210_v11 = vor.u32 %v9846_v3, %v7207_v4  ;;  %v8277_v4 = vld [vmem:[#allocation15 + $0x310] sm:$0xf] }
 0x28e   :  { %2840 = vmatpush.bf16.msrb.mxu3 %v7050_v6  ;;  %2852 = vmatpush.bf16.msra.mxu0 %v7338_v7  ;;  %v2602_v6 = vpop.f32.mrf.mxu0  ;;  %v7559_v7 = vld [vmem:[#allocation12 + $0x578] sm:$0xf0] }
 0x28f   :  { %2818 = vmatpush.bf16.msrb.mxu1 %v7430_v18  ;;  %2830 = vmatpush.bf16.msrb.mxu2 %v7718_v20  ;;  %v10006_v8 = vld [vmem:[#allocation12 + $0x79c] sm:$0xf]  ;;  %v7562_v18 = vor.u32 %v9934_v5, %v7559_v7  ;;  %v10120_v5 = vld [vmem:[#allocation15 + $0x328] sm:$0xf0] }
 0x290   :  { %v7847_v9 = vld [vmem:[#allocation12 + $0x7b8] sm:$0xf0]  ;;  %v2589_v13 = vpop.f32.mrf.mxu3 }
 0x291   :  { %v9766_v14 = vld [vmem:[#allocation12 + $0x1c] sm:$0xf]  ;;  %v7850_v20 = vor.u32 %v10006_v8, %v7847_v9  ;;  %v8278_v13 = vor.u32 %v10120_v5, %v8277_v4 }
 0x292   :  { %2841 = vmatpush.bf16.msrb.mxu3 %v7018_v24  ;;  %2853 = vmatpush.bf16.msra.mxu0 %v7306_v25  ;;  %v6887_v16 = vld [vmem:[#allocation12 + $0x38] sm:$0xf0] }
 0x293   :  { %2819 = vmatpush.bf16.msrb.mxu1 %v7398_v39  ;;  %2831 = vmatpush.bf16.msrb.mxu2 %v7686_v40  ;;  %v9838_v22 = vld [vmem:[#allocation12 + $0x25c] sm:$0xf]  ;;  %v6890_v30 = vor.u32 %v9766_v14, %v6887_v16 }
 0x294   :  { %v7175_v23 = vld [vmem:[#allocation12 + $0x278] sm:$0xf0]  ;;  %v2576_v37 = vpop.f32.mrf.mxu2 }
 0x295   :  { %v9926_v24 = vld [vmem:[#allocation12 + $0x51c] sm:$0xf]  ;;  %v10945_v27 = vpop.f32.mrf.mxu1  ;;  %v7178_v34 = vor.u32 %v9838_v22, %v7175_v23  ;;  %v1179_v23 = vperm.slane %v10917_v21, 1  ;;  %v7969_v37 = vld [vmem:[#allocation15 + $0xa8] sm:$0xf] }
 0x296   :  { %2842 = vmatpush.bf16.msrb.mxu3 %v6986_v42  ;;  %2854 = vmatpush.bf16.msra.mxu0 %v7274_v43  ;;  %v7527_v25 = vld [vmem:[#allocation12 + $0x538] sm:$0xf0] }
 0x297   :  { %2864 = vmatpush.bf16.msra.mxu1 %v7626_v49  ;;  %2832 = vmatpush.bf16.msrb.mxu2 %v7654_v59  ;;  %v9998_v12 = vld [vmem:[#allocation12 + $0x75c] sm:$0xf]  ;;  %v7530_v39 = vor.u32 %v9926_v24, %v7527_v25  ;;  %v8053_v49 = vld [vmem:[#allocation15 + $0x150] sm:$0xf] }
 0x298   :  { %2820 = vmatmul.bf16.vlgmr.msrb.gmra.mxu1 %v10894_v19  ;;  %v7815_v26 = vld [vmem:[#allocation12 + $0x778] sm:$0xf0] }
 0x299   :  { %v9830_v38 = vld [vmem:[#allocation12 + $0x21c] sm:$0xf]  ;;  %v7818_v40 = vor.u32 %v9998_v12, %v7815_v26 }
 0x29a   :  { %2843 = vmatpush.bf16.msrb.mxu3 %v6954_v60  ;;  %2855 = vmatpush.bf16.msra.mxu0 %v7242_v61  ;;  %v7143_v36 = vld [vmem:[#allocation12 + $0x238] sm:$0xf0]  ;;  %v8054_v60 = vor.u32 %v10064_v50, %v8053_v49  ;;  %v8306_v61 = vor.u32 %v10127_v52, %v8305_v51  ;;  %v2536_v49 = vadd.f32 %v10929_v41, %v1179_v23 }
 0x29b   :  { %2865 = vmatpush.bf16.msra.mxu1 %v7594_v1  ;;  %2877 = vmatpush.bf16.msra.mxu2 %v7882_v2  ;;  %v9918_v42 = vld [vmem:[#allocation12 + $0x4dc] sm:$0xf]  ;;  %v7146_v53 = vor.u32 %v9830_v38, %v7143_v36  ;;  %v8025_v1 = vld [vmem:[#allocation15 + $0x118] sm:$0xf]  ;;  %v10043_v38 = vld [vmem:[#allocation15 + $0xc0] sm:$0xf0] }
 0x29c   :  { %2833 = vmatmul.bf16.vlgmr.msrb.gmra.mxu2 %v10898_v32  ;;  %v7495_v43 = vld [vmem:[#allocation12 + $0x4f8] sm:$0xf0]  ;;  %v8529_v36 = vld [vmem:[#allocation15 + $0x508] sm:$0xf]  ;;  %v7970_v50 = vor.u32 %v10043_v38, %v7969_v37  ;;  %v2549_v4 = vadd.f32 %v10927_v31, %v2536_v49  ;;  %v10232_v31 = vld [vmem:[#allocation15 + $0x6a8] sm:$0xf0] }
 0x29d   :  { %v9990_v47 = vld [vmem:[#allocation12 + $0x71c] sm:$0xf]  ;;  %v7498_v54 = vor.u32 %v9918_v42, %v7495_v43  ;;  %v2615_v2 = vpop.f32.mrf.mxu1  ;;  %v10183_v42 = vld [vmem:[#allocation15 + $0x520] sm:$0xf0]  ;;  %v8697_v37 = vld [vmem:[#allocation15 + $0x658] sm:$0xf] }
 0x29e   :  { %2844 = vmatpush.bf16.msrb.mxu3 %v6922_v10  ;;  %2856 = vmatpush.bf16.msra.mxu0 %v7210_v11  ;;  %v7783_v48 = vld [vmem:[#allocation12 + $0x738] sm:$0xf0]  ;;  %v10239_v2 = vld [vmem:[#allocation15 + $0x6e0] sm:$0xf0] }
 0x29f   :  { %2866 = vmatpush.bf16.msra.mxu1 %v7562_v18  ;;  %2878 = vmatpush.bf16.msra.mxu2 %v7850_v20  ;;  %v7786_v55 = vor.u32 %v9990_v47, %v7783_v48  ;;  %v9910_v56 = vld [vmem:[#allocation12 + $0x49c] sm:$0xf]  ;;  %v10948_v8 = vpop.f32.mrf.mxu2  ;;  %v10050_v18 = vld [vmem:[#allocation15 + $0xf8] sm:$0xf0]  ;;  %v8249_v20 = vld [vmem:[#allocation15 + $0x2d8] sm:$0xf] }
 0x2a0   :  { %v7463_v59 = vld [vmem:[#allocation12 + $0x4b8] sm:$0xf0] }
 0x2a1   :  { %v9982_v63 = vld [vmem:[#allocation12 + $0x6dc] sm:$0xf]  ;;  %v7466_v6 = vor.u32 %v9910_v56, %v7463_v59  ;;  %v2510_v56 = vadd.f32 %v10924_v15, %v10921_v57  ;;  %v8530_v59 = vor.u32 %v10183_v42, %v8529_v36  ;;  %v8977_v36 = vld [vmem:[#allocation15 + $0x888] sm:$0xf]  ;;  %v10295_v42 = vld [vmem:[#allocation15 + $0x8a0] sm:$0xf0] }
 0x2a2   :  { %2845 = vmatpush.bf16.msrb.mxu3 %v6890_v30  ;;  %2857 = vmatpush.bf16.msra.mxu0 %v7178_v34  ;;  %v7751_v0 = vld [vmem:[#allocation12 + $0x6f8] sm:$0xf0] }
 0x2a3   :  { %2867 = vmatpush.bf16.msra.mxu1 %v7530_v39  ;;  %2879 = vmatpush.bf16.msra.mxu2 %v7818_v40  ;;  %v10057_v3 = vld [vmem:[#allocation15 + $0x130] sm:$0xf0]  ;;  %v7754_v7 = vor.u32 %v9982_v63, %v7751_v0  ;;  %v10106_v39 = vld [vmem:[#allocation15 + $0x2b8] sm:$0xf0]  ;;  %v8501_v63 = vld [vmem:[#allocation15 + $0x4d0] sm:$0xf]  ;;  %v2523_v41 = vadd.f32 %v10931_v58, %v2510_v56 }
 0x2a4   :  { %v9902_v9 = vld [vmem:[#allocation12 + $0x45c] sm:$0xf]  ;;  %v8026_v11 = vor.u32 %v10057_v3, %v8025_v1  ;;  %v10176_v0 = vld [vmem:[#allocation15 + $0x4e8] sm:$0xf0]  ;;  %v8753_v1 = vld [vmem:[#allocation15 + $0x6c8] sm:$0xf] }
 0x2a5   :  { %2846 = vmatmul.bf16.vlgmr.msrb.gmra.mxu3 %v10886_v33  ;;  %v7431_v10 = vld [vmem:[#allocation12 + $0x478] sm:$0xf0]  ;;  %v7997_v33 = vld [vmem:[#allocation15 + $0xe0] sm:$0xf]  ;;  %v8502_v15 = vor.u32 %v10176_v0, %v8501_v63  ;;  %vm2890_vm7 = vcmp.ge.f32.partialorder %v2523_v41, 0.0 }
 0x2a6   :  { %5754 = vmatpush.bf16.msra.mxu3 %v8082_v46  ;;  %2858 = vmatpush.bf16.msra.mxu0 %v7146_v53  ;;  %v9974_v14 = vld [vmem:[#allocation12 + $0x69c] sm:$0xf]  ;;  %v7434_v24 = vor.u32 %v9902_v9, %v7431_v10  ;;  %v7998_v28 = vor.u32 %v10050_v18, %v7997_v33  ;;  %v10952_v40 = vpop.f32.mrf.mxu0  ;;  %v8754_v9 = vor.u32 %v10239_v2, %v8753_v1  ;;  %v8165_v10 = vld [vmem:[#allocation15 + $0x230] sm:$0xf]  ;;  %v1180_v18 = vperm.slane %v10917_v21, 2 }
 0x2a7   :  { %2868 = vmatpush.bf16.msra.mxu1 %v7498_v54  ;;  %2880 = vmatpush.bf16.msra.mxu2 %v7786_v55  ;;  %v7719_v16 = vld [vmem:[#allocation12 + $0x6b8] sm:$0xf0]  ;;  %v2628_v47 = vpop.f32.mrf.mxu2  ;;  %v7941_v54 = vld [vmem:[#allocation15 + $0x70] sm:$0xf]  ;;  %v10036_v55 = vld [vmem:[#allocation15 + $0x88] sm:$0xf0] }
 0x2a8   :  { %v10113_v22 = vld [vmem:[#allocation15 + $0x2f0] sm:$0xf0]  ;;  %v7722_v25 = vor.u32 %v9974_v14, %v7719_v16  ;;  %v10955_v52 = vpop.f32.mrf.mxu3  ;;  %v7942_v5 = vor.u32 %v10036_v55, %v7941_v54  ;;  %v2562_v14 = vadd.f32 %v10935_v17, %v2549_v4  ;;  %v8725_v33 = vld [vmem:[#allocation15 + $0x690] sm:$0xf]  ;;  %v10022_v17 = vld [vmem:[#allocation15 + $0x18] sm:$0xf0] }
 0x2a9   :  { %2859 = vmatmul.bf16.vlgmr.msra.gmra.mxu0 %v10889_v45  ;;  %v9894_v12 = vld [vmem:[#allocation12 + $0x41c] sm:$0xf]  ;;  %v8250_v29 = vor.u32 %v10113_v22, %v8249_v20  ;;  %v8221_v45 = vld [vmem:[#allocation15 + $0x2a0] sm:$0xf]  ;;  %v2898_v20 = vmul.f32 0.2, %v2523_v41 }
 0x2aa   :  { %5755 = vmatpush.bf16.msra.mxu3 %v8054_v60  ;;  %5767 = vmatpush.bf16.msrb.mxu0 %v8306_v61  ;;  %v7399_v26 = vld [vmem:[#allocation12 + $0x438] sm:$0xf0]  ;;  %v8222_v51 = vor.u32 %v10106_v39, %v8221_v45  ;;  %v8193_v60 = vld [vmem:[#allocation15 + $0x268] sm:$0xf]  ;;  %v10099_v61 = vld [vmem:[#allocation15 + $0x280] sm:$0xf0]  ;;  %v2575_v22 = vadd.f32 %v10941_v62, %v2562_v14  ;;  %v2588_v62 = vadd.f32 %v10939_v44, %v1180_v18 }
 0x2ab   :  { %2869 = vmatpush.bf16.msra.mxu1 %v7466_v6  ;;  %2881 = vmatpush.bf16.msra.mxu2 %v7754_v7  ;;  %v9966_v30 = vld [vmem:[#allocation12 + $0x65c] sm:$0xf]  ;;  %v7402_v43 = vor.u32 %v9894_v12, %v7399_v26  ;;  %v8194_v6 = vor.u32 %v10099_v61, %v8193_v60  ;;  %v7913_v7 = vld [vmem:[#allocation15 + $0x38] sm:$0xf]  ;;  %v7885_v12 = vld [vmem:[#allocation15] sm:$0xf]  ;;  %v8726_v26 = vor.u32 %v10232_v31, %v8725_v33 }
 0x2ac   :  { %v7687_v34 = vld [vmem:[#allocation12 + $0x678] sm:$0xf0]  ;;  %v1181_v45 = vperm.slane %v10917_v21, 3  ;;  %vm2891_vm8 = vcmp.ge.f32.partialorder %v2575_v22, 0.0  ;;  %v10078_v44 = vld [vmem:[#allocation15 + $0x1d8] sm:$0xf0]  ;;  %v2601_v0 = vadd.f32 %v10937_v35, %v2588_v62 }
 0x2ad   :  { %v7690_v46 = vor.u32 %v9966_v30, %v7687_v34  ;;  %v9958_v48 = vld [vmem:[#allocation12 + $0x61c] sm:$0xf]  ;;  %v8445_v30 = vld [vmem:[#allocation15 + $0x460] sm:$0xf]  ;;  %v10162_v34 = vld [vmem:[#allocation15 + $0x478] sm:$0xf0] }
 0x2ae   :  { %5756 = vmatpush.bf16.msra.mxu3 %v8026_v11  ;;  %5768 = vmatpush.bf16.msrb.mxu0 %v8278_v13  ;;  %v7655_v53 = vld [vmem:[#allocation12 + $0x638] sm:$0xf0]  ;;  %v10092_v11 = vld [vmem:[#allocation15 + $0x248] sm:$0xf0]  ;;  %v8473_v13 = vld [vmem:[#allocation15 + $0x498] sm:$0xf]  ;;  %v2654_v58 = vpop.f32.mrf.mxu0  ;;  %v8446_v49 = vor.u32 %v10162_v34, %v8445_v30  ;;  %v2640_v35 = vadd.f32 %v10955_v52, %v1181_v45 }
 0x2af   :  { %2870 = vmatpush.bf16.msra.mxu1 %v7434_v24  ;;  %2882 = vmatpush.bf16.msra.mxu2 %v7722_v25  ;;  %v7658_v3 = vor.u32 %v9958_v48, %v7655_v53  ;;  %v10029_v57 = vld [vmem:[#allocation15 + $0x50] sm:$0xf0]  ;;  %v8166_v24 = vor.u32 %v10092_v11, %v8165_v10  ;;  %v8109_v48 = vld [vmem:[#allocation15 + $0x1c0] sm:$0xf]  ;;  %v10155_v21 = vld [vmem:[#allocation15 + $0x440] sm:$0xf0]  ;;  %v8978_v53 = vor.u32 %v10295_v42, %v8977_v36 }
 0x2b0   :  { %v10169_v16 = vld [vmem:[#allocation15 + $0x4b0] sm:$0xf0]  ;;  %v7914_v23 = vor.u32 %v10029_v57, %v7913_v7  ;;  %v2641_v25 = vpop.f32.mrf.mxu3  ;;  %v8669_v54 = vld [vmem:[#allocation15 + $0x620] sm:$0xf]  ;;  %v10218_v55 = vld [vmem:[#allocation15 + $0x638] sm:$0xf0]  ;;  %v8110_v1 = vor.u32 %v10078_v44, %v8109_v48  ;;  %v2614_v10 = vadd.f32 %v10945_v27, %v2601_v0 }
 0x2b1   :  { %v10225_v38 = vld [vmem:[#allocation15 + $0x670] sm:$0xf0]  ;;  %v8949_v56 = vld [vmem:[#allocation15 + $0x850] sm:$0xf]  ;;  %v9201_v60 = vld [vmem:[#allocation15 + $0xa48] sm:$0xf] }
 0x2b2   :  { %5757 = vmatpush.bf16.msra.mxu3 %v7998_v28  ;;  %5769 = vmatpush.bf16.msrb.mxu0 %v8250_v29  ;;  %v8137_v28 = vld [vmem:[#allocation15 + $0x1f8] sm:$0xf]  ;;  %v10085_v29 = vld [vmem:[#allocation15 + $0x210] sm:$0xf0]  ;;  %v10351_v61 = vld [vmem:[#allocation15 + $0xa60] sm:$0xf0]  ;;  %v2627_v33 = vadd.f32 %v10948_v8, %v2614_v10 }
 0x2b3   :  { %2871 = vmatpush.bf16.msra.mxu1 %v7402_v43  ;;  %2883 = vmatpush.bf16.msra.mxu2 %v7690_v46  ;;  %v2899_v43 = vmul.f32 0.2, %v2575_v22  ;;  %v7886_v46 = vor.u32 %v10022_v17, %v7885_v12  ;;  %v8138_v47 = vor.u32 %v10085_v29, %v8137_v28  ;;  %v8389_v4 = vld [vmem:[#allocation15 + $0x3f0] sm:$0xf]  ;;  %v8641_v7 = vld [vmem:[#allocation15 + $0x5e8] sm:$0xf]  ;;  %v2653_v17 = vadd.f32 %v10952_v40, %v2640_v35 }
 0x2b4   :  { %v10211_v57 = vld [vmem:[#allocation15 + $0x600] sm:$0xf0]  ;;  %v9173_v14 = vld [vmem:[#allocation15 + $0xa10] sm:$0xf]  ;;  %v10344_v58 = vld [vmem:[#allocation15 + $0xa28] sm:$0xf0] }
 0x2b5   :  { %v10968_v39 = vpop.f32.mrf.mxu1  ;;  %v2907_v2 = vsel %vm2891_vm8, %v2575_v22, %v2899_v43  ;;  %v8642_v18 = vor.u32 %v10211_v57, %v8641_v7  ;;  %v8361_v22 = vld [vmem:[#allocation15 + $0x3b8] sm:$0xf]  ;;  %v10141_v27 = vld [vmem:[#allocation15 + $0x3d0] sm:$0xf0]  ;;  %v8893_v25 = vld [vmem:[#allocation15 + $0x7e0] sm:$0xf]  ;;  %v9174_v12 = vor.u32 %v10344_v58, %v9173_v14 }
 0x2b6   :  { %5758 = vmatpush.bf16.msra.mxu3 %v7970_v50  ;;  %5770 = vmatpush.bf16.msrb.mxu0 %v8222_v51  ;;  %v8698_v50 = vor.u32 %v10225_v38, %v8697_v37  ;;  %v8417_v51 = vld [vmem:[#allocation15 + $0x428] sm:$0xf]  ;;  %v9145_v8 = vld [vmem:[#allocation15 + $0x9d8] sm:$0xf]  ;;  %v2900_v28 = vmul.f32 0.2, %v2627_v33  ;;  %v2666_v29 = vadd.f32 %v10968_v39, %v2653_v17  ;;  %v8362_v30 = vor.u32 %v10141_v27, %v8361_v22 }
 0x2b7   :  { %5780 = vmatpush.bf16.msrb.mxu1 %v8530_v59  ;;  %2884 = vmatpush.bf16.msra.mxu2 %v7658_v3  ;;  %v10288_v59 = vld [vmem:[#allocation15 + $0x868] sm:$0xf0]  ;;  %v8670_v3 = vor.u32 %v10218_v55, %v8669_v54  ;;  %v8333_v37 = vld [vmem:[#allocation15 + $0x380] sm:$0xf]  ;;  %v10134_v38 = vld [vmem:[#allocation15 + $0x398] sm:$0xf0] }
 0x2b8   :  { %2872 = vmatmul.bf16.vlgmr.msra.gmra.mxu1 %v10894_v19  ;;  %v8474_v19 = vor.u32 %v10169_v16, %v8473_v13  ;;  %v10281_v13 = vld [vmem:[#allocation15 + $0x830] sm:$0xf0]  ;;  %v10978_v16 = vpack.c.bf16 %v2907_v2, %v2907_v2  ;;  %v8585_v45 = vld [vmem:[#allocation15 + $0x578] sm:$0xf]  ;;  %v8865_v42 = vld [vmem:[#allocation15 + $0x7a8] sm:$0xf] }
 0x2b9   :  { %v10197_v36 = vld [vmem:[#allocation15 + $0x590] sm:$0xf0]  ;;  %v10330_v48 = vld [vmem:[#allocation15 + $0x9b8] sm:$0xf0]  ;;  %vm2892_vm9 = vcmp.ge.f32.partialorder %v2627_v33, 0.0 }
 0x2ba   :  { %5759 = vmatpush.bf16.msra.mxu3 %v7942_v5  ;;  %5771 = vmatpush.bf16.msrb.mxu0 %v8194_v6  ;;  %v10148_v5 = vld [vmem:[#allocation15 + $0x408] sm:$0xf0]  ;;  %v8950_v6 = vor.u32 %v10288_v59, %v8949_v56  ;;  %v9425_v39 = vld [vmem:[#allocation15 + $0xc08] sm:$0xf]  ;;  %v8586_v44 = vor.u32 %v10197_v36, %v8585_v45  ;;  %v10190_v55 = vld [vmem:[#allocation15 + $0x558] sm:$0xf0] }
 0x2bb   :  { %5781 = vmatpush.bf16.msrb.mxu1 %v8502_v15  ;;  %5793 = vmatpush.bf16.msrb.mxu2 %v8754_v9  ;;  %v8921_v15 = vld [vmem:[#allocation15 + $0x818] sm:$0xf]  ;;  %v9202_v9 = vor.u32 %v10351_v61, %v9201_v60  ;;  %v8390_v31 = vor.u32 %v10148_v5, %v8389_v4  ;;  %v8837_v56 = vld [vmem:[#allocation15 + $0x770] sm:$0xf]  ;;  %v10260_v59 = vld [vmem:[#allocation15 + $0x788] sm:$0xf0]  ;;  %v2908_v61 = vsel %vm2892_vm9, %v2627_v33, %v2900_v28 }
 0x2bc   :  { %2885 = vmatmul.bf16.vlgmr.msra.gmra.mxu2 %v10898_v32  ;;  %v2906_v32 = vsel %vm2890_vm7, %v2523_v41, %v2898_v20  ;;  %v8418_v41 = vor.u32 %v10155_v21, %v8417_v51  ;;  %v8922_v52 = vor.u32 %v10281_v13, %v8921_v15  ;;  %v8557_v21 = vld [vmem:[#allocation15 + $0x540] sm:$0xf]  ;;  %v10323_v2 = vld [vmem:[#allocation15 + $0x980] sm:$0xf0]  ;;  %v10400_v4 = vld [vmem:[#allocation15 + $0xbe8] sm:$0xf0]  ;;  %v8838_v7 = vor.u32 %v10260_v59, %v8837_v56 }
 0x2bd   :  { %v10971_v63 = vpack.c.bf16 %v2906_v32, %v2906_v32  ;;  %v2667_v11 = vpop.f32.mrf.mxu1  ;;  %v8558_v5 = vor.u32 %v10190_v55, %v8557_v21  ;;  %v8809_v57 = vld [vmem:[#allocation15 + $0x738] sm:$0xf]  ;;  %v10253_v10 = vld [vmem:[#allocation15 + $0x750] sm:$0xf0]  ;;  %v9061_v35 = vld [vmem:[#allocation15 + $0x930] sm:$0xf] }
 0x2be   :  { %5760 = vmatpush.bf16.msra.mxu3 %v7914_v23  ;;  %5772 = vmatpush.bf16.msrb.mxu0 %v8166_v24  ;;  %v8613_v23 = vld [vmem:[#allocation15 + $0x5b0] sm:$0xf]  ;;  %v10204_v24 = vld [vmem:[#allocation15 + $0x5c8] sm:$0xf0]  ;;  %v9369_v58 = vld [vmem:[#allocation15 + $0xb98] sm:$0xf]  ;;  %v8810_v22 = vor.u32 %v10253_v10, %v8809_v57 }
 0x2bf   :  { %5782 = vmatpush.bf16.msrb.mxu1 %v8474_v19  ;;  %5794 = vmatpush.bf16.msrb.mxu2 %v8726_v26  ;;  %v2678_v20 = vpop.f32.mrf.mxu2  ;;  %v10274_v19 = vld [vmem:[#allocation15 + $0x7f8] sm:$0xf0]  ;;  %v10337_v26 = vld [vmem:[#allocation15 + $0x9f0] sm:$0xf0]  ;;  %v8614_v34 = vor.u32 %v10204_v24, %v8613_v23  ;;  %v10316_v11 = vld [vmem:[#allocation15 + $0x948] sm:$0xf0] }
 0x2c0   :  { %v8894_v62 = vor.u32 %v10274_v19, %v8893_v25  ;;  %v9146_v40 = vor.u32 %v10337_v26, %v9145_v8  ;;  %v2679_v43 = vadd.f32 %v2678_v20, %v2666_v29  ;;  %v10393_v33 = vld [vmem:[#allocation15 + $0xbb0] sm:$0xf0]  ;;  %v10246_v23 = vld [vmem:[#allocation15 + $0x718] sm:$0xf0]  ;;  %v9062_v24 = vor.u32 %v10316_v11, %v9061_v35  ;;  %v10068_v25 = vld [vmem:[#allocation15 + $0x18c] sm:$0xf] }
 0x2c1   :  { %v10309_v17 = vld [vmem:[#allocation15 + $0x910] sm:$0xf0]  ;;  %v9370_v19 = vor.u32 %v10393_v33, %v9369_v58  ;;  %v8083_v8 = vld [vmem:[#allocation15 + $0x1a4] sm:$0xf0]  ;;  %v9341_v26 = vld [vmem:[#allocation15 + $0xb60] sm:$0xf] }
 0x2c2   :  { %5761 = vmatpush.bf16.msra.mxu3 %v7886_v46  ;;  %5773 = vmatpush.bf16.msrb.mxu0 %v8138_v47  ;;  %v10267_v46 = vld [vmem:[#allocation15 + $0x7c0] sm:$0xf0]  ;;  %v9117_v47 = vld [vmem:[#allocation15 + $0x9a0] sm:$0xf]  ;;  %v2901_v0 = vmul.f32 0.2, %v2679_v43 }
 0x2c3   :  { %5783 = vmatpush.bf16.msrb.mxu1 %v8446_v49  ;;  %5795 = vmatpush.bf16.msrb.mxu2 %v8698_v50  ;;  %v10407_v49 = vld [vmem:[#allocation15 + $0xc20] sm:$0xf0]  ;;  %v8334_v50 = vor.u32 %v10134_v38, %v8333_v37  ;;  %v9118_v60 = vor.u32 %v10330_v48, %v9117_v47  ;;  %vm2893_vm10 = vcmp.ge.f32.partialorder %v2679_v43, 0.0  ;;  %v10386_v28 = vld [vmem:[#allocation15 + $0xb78] sm:$0xf0]  ;;  %v8086_v37 = vor.u32 %v10068_v25, %v8083_v8 }
 0x2c4   :  { %v10061_v38 = vld [vmem:[#allocation15 + $0x154] sm:$0xf]  ;;  %v10302_v45 = vld [vmem:[#allocation15 + $0x8d8] sm:$0xf0]  ;;  %v9342_v36 = vor.u32 %v10386_v28, %v9341_v26  ;;  %v9313_v47 = vld [vmem:[#allocation15 + $0xb28] sm:$0xf] }
 0x2c5   :  { %5762 = vmatmul.bf16.vlgmr.msra.gmra.mxu3 %v10971_v63  ;;  %v10379_v48 = vld [vmem:[#allocation15 + $0xb40] sm:$0xf0]  ;;  %v8027_v21 = vld [vmem:[#allocation15 + $0x134] sm:$0xf0]  ;;  %v8279_v55 = vld [vmem:[#allocation15 + $0x32c] sm:$0xf0] }
 0x2c6   :  { %5806 = vmatpush.bf16.msrb.mxu3 %v8978_v53  ;;  %5774 = vmatpush.bf16.msrb.mxu0 %v8110_v1  ;;  %v10984_v32 = vpop.f32.mrf.mxu0  ;;  %v8866_v53 = vor.u32 %v10267_v46, %v8865_v42  ;;  %v9089_v1 = vld [vmem:[#allocation15 + $0x968] sm:$0xf]  ;;  %v9314_v56 = vor.u32 %v10379_v48, %v9313_v47  ;;  %v9285_v59 = vld [vmem:[#allocation15 + $0xaf0] sm:$0xf]  ;;  %v9257_v57 = vld [vmem:[#allocation15 + $0xab8] sm:$0xf] }
 0x2c7   :  { %5784 = vmatpush.bf16.msrb.mxu1 %v8418_v41  ;;  %5796 = vmatpush.bf16.msrb.mxu2 %v8670_v3  ;;  %v2680_v51 = vpop.f32.mrf.mxu2  ;;  %v9426_v41 = vor.u32 %v10407_v49, %v9425_v39  ;;  %v9397_v3 = vld [vmem:[#allocation15 + $0xbd0] sm:$0xf]  ;;  %v9090_v15 = vor.u32 %v10323_v2, %v9089_v1  ;;  %v8307_v46 = vld [vmem:[#allocation15 + $0x364] sm:$0xf0]  ;;  %v10047_v2 = vld [vmem:[#allocation15 + $0xe4] sm:$0xf] }
 0x2c8   :  { %v10986_v54 = vpop.f32.mrf.mxu3  ;;  %v9398_v13 = vor.u32 %v10400_v4, %v9397_v3  ;;  %v7999_v4 = vld [vmem:[#allocation15 + $0xfc] sm:$0xf0]  ;;  %v10040_v35 = vld [vmem:[#allocation15 + $0xac] sm:$0xf]  ;;  %v7971_v11 = vld [vmem:[#allocation15 + $0xc4] sm:$0xf0] }
 0x2c9   :  { %5775 = vmatmul.bf16.vlgmr.msrb.gmra.mxu0 %v10978_v16  ;;  %v8002_v10 = vor.u32 %v10047_v2, %v7999_v4  ;;  %v10103_v58 = vld [vmem:[#allocation15 + $0x2a4] sm:$0xf]  ;;  %v8223_v33 = vld [vmem:[#allocation15 + $0x2bc] sm:$0xf0]  ;;  %v7974_v26 = vor.u32 %v10040_v35, %v7971_v11  ;;  %v10033_v28 = vld [vmem:[#allocation15 + $0x74] sm:$0xf] }
 0x2ca   :  { %5807 = vmatpush.bf16.msrb.mxu3 %v8950_v6  ;;  %5819 = vmatpush.bf16.msra.mxu0 %v9202_v9  ;;  %v10989_v6 = vpack.c.bf16 %v2908_v61, %v2908_v61  ;;  %v2909_v9 = vsel %vm2893_vm10, %v2679_v43, %v2901_v0  ;;  %v10124_v43 = vld [vmem:[#allocation15 + $0x34c] sm:$0xf]  ;;  %v10026_v48 = vld [vmem:[#allocation15 + $0x3c] sm:$0xf]  ;;  %v8139_v4 = vld [vmem:[#allocation15 + $0x214] sm:$0xf0] }
 0x2cb   :  { %5785 = vmatpush.bf16.msrb.mxu1 %v8390_v31  ;;  %5797 = vmatpush.bf16.msrb.mxu2 %v8642_v18  ;;  %v10992_v31 = vpack.c.bf16 %v2909_v9, %v2909_v9  ;;  %v10994_v18 = vld [vmem:[#allocation13] sm:$0xff]  ;;  %v8447_v35 = vld [vmem:[#allocation15 + $0x47c] sm:$0xf0] }
 0x2cc   :  { %v1182_v20 = vperm.slane %v10994_v18, 4 }
 0x2ce   :  { %5808 = vmatpush.bf16.msrb.mxu3 %v8922_v52  ;;  %5820 = vmatpush.bf16.msra.mxu0 %v9174_v12  ;;  %v2706_v14 = vpop.f32.mrf.mxu0  ;;  %v8781_v52 = vld [vmem:[#allocation15 + $0x700] sm:$0xf]  ;;  %v9033_v12 = vld [vmem:[#allocation15 + $0x8f8] sm:$0xf]  ;;  %v2692_v42 = vadd.f32 %v10986_v54, %v1182_v20 }
 0x2cf   :  { %5786 = vmatpush.bf16.msrb.mxu1 %v8362_v30  ;;  %5798 = vmatpush.bf16.msrb.mxu2 %v8614_v34  ;;  %v8782_v30 = vor.u32 %v10246_v23, %v8781_v52  ;;  %v9034_v34 = vor.u32 %v10309_v17, %v9033_v12  ;;  %v10358_v52 = vld [vmem:[#allocation15 + $0xa98] sm:$0xf0]  ;;  %v9649_v23 = vld [vmem:[#allocation15 + $0xdc8] sm:$0xf]  ;;  %v10180_v17 = vld [vmem:[#allocation15 + $0x50c] sm:$0xf] }
 0x2d0   :  { %v2693_v27 = vpop.f32.mrf.mxu3  ;;  %v2705_v51 = vadd.f32 %v10984_v32, %v2692_v42 }
 0x2d2   :  { %5809 = vmatpush.bf16.msrb.mxu3 %v8894_v62  ;;  %5821 = vmatpush.bf16.msra.mxu0 %v9146_v40  ;;  %v9005_v62 = vld [vmem:[#allocation15 + $0x8c0] sm:$0xf]  ;;  %v8055_v40 = vld [vmem:[#allocation15 + $0x16c] sm:$0xf0] }
 0x2d3   :  { %5787 = vmatpush.bf16.msrb.mxu1 %v8334_v50  ;;  %5799 = vmatpush.bf16.msrb.mxu2 %v8586_v44  ;;  %v9006_v39 = vor.u32 %v10302_v45, %v9005_v62  ;;  %v8058_v49 = vor.u32 %v10061_v38, %v8055_v40  ;;  %v10054_v50 = vld [vmem:[#allocation15 + $0x11c] sm:$0xf]  ;;  %v8310_v44 = vor.u32 %v10124_v43, %v8307_v46  ;;  %v8195_v38 = vld [vmem:[#allocation15 + $0x284] sm:$0xf0]  ;;  %v9621_v45 = vld [vmem:[#allocation15 + $0xd90] sm:$0xf] }
 0x2d4   :  { %v8030_v1 = vor.u32 %v10054_v50, %v8027_v21  ;;  %v10173_v43 = vld [vmem:[#allocation15 + $0x4d4] sm:$0xf]  ;;  %v8503_v46 = vld [vmem:[#allocation15 + $0x4ec] sm:$0xf0] }
 0x2d5   :  { %v2717_v29 = vpop.f32.mrf.mxu1  ;;  %v10089_v50 = vld [vmem:[#allocation15 + $0x234] sm:$0xf] }
 0x2d6   :  { %5810 = vmatpush.bf16.msrb.mxu3 %v8866_v53  ;;  %5822 = vmatpush.bf16.msra.mxu0 %v9118_v60  ;;  %v10117_v53 = vld [vmem:[#allocation15 + $0x314] sm:$0xf]  ;;  %v10372_v60 = vld [vmem:[#allocation15 + $0xb08] sm:$0xf0]  ;;  %v2718_v61 = vadd.f32 %v2717_v29, %v2705_v51  ;;  %v7943_v29 = vld [vmem:[#allocation15 + $0x8c] sm:$0xf0] }
 0x2d7   :  { %5832 = vmatpush.bf16.msra.mxu1 %v9426_v41  ;;  %5800 = vmatpush.bf16.msrb.mxu2 %v8558_v5  ;;  %v8282_v41 = vor.u32 %v10117_v53, %v8279_v55  ;;  %v10110_v5 = vld [vmem:[#allocation15 + $0x2dc] sm:$0xf]  ;;  %v9286_v32 = vor.u32 %v10372_v60, %v9285_v59  ;;  %v7946_v47 = vor.u32 %v10033_v28, %v7943_v29  ;;  %v9593_v51 = vld [vmem:[#allocation15 + $0xd58] sm:$0xf]  ;;  %v10449_v21 = vld [vmem:[#allocation15 + $0xd70] sm:$0xf0] }
 0x2d8   :  { %5788 = vmatmul.bf16.vlgmr.msrb.gmra.mxu1 %v10989_v6  ;;  %v8506_v53 = vor.u32 %v10173_v43, %v8503_v46  ;;  %v9594_v55 = vor.u32 %v10449_v21, %v9593_v51  ;;  %v8475_v59 = vld [vmem:[#allocation15 + $0x4b4] sm:$0xf0]  ;;  %v10421_v51 = vld [vmem:[#allocation15 + $0xc90] sm:$0xf0] }
 0x2da   :  { %5811 = vmatpush.bf16.msrb.mxu3 %v8838_v7  ;;  %5823 = vmatpush.bf16.msra.mxu0 %v9090_v15  ;;  %v8251_v7 = vld [vmem:[#allocation15 + $0x2f4] sm:$0xf0]  ;;  %v10365_v15 = vld [vmem:[#allocation15 + $0xad0] sm:$0xf0] }
 0x2db   :  { %5833 = vmatpush.bf16.msra.mxu1 %v9398_v13  ;;  %5801 = vmatmul.bf16.vlgmr.msrb.gmra.mxu2 %v10992_v31  ;;  %v8254_v13 = vor.u32 %v10110_v5, %v8251_v7  ;;  %v9258_v20 = vor.u32 %v10365_v15, %v9257_v57  ;;  %v8979_v5 = vld [vmem:[#allocation15 + $0x8a4] sm:$0xf0]  ;;  %v10442_v57 = vld [vmem:[#allocation15 + $0xd38] sm:$0xf0]  ;;  %v1183_v15 = vperm.slane %v10994_v18, 5 }
 0x2dd   :  { %v2719_v54 = vpop.f32.mrf.mxu1 }
 0x2de   :  { %5812 = vmatpush.bf16.msrb.mxu3 %v8810_v22  ;;  %5824 = vmatpush.bf16.msra.mxu0 %v9062_v24  ;;  %v9229_v22 = vld [vmem:[#allocation15 + $0xa80] sm:$0xf]  ;;  %v10463_v24 = vld [vmem:[#allocation15 + $0xde0] sm:$0xf0]  ;;  %v10166_v54 = vld [vmem:[#allocation15 + $0x49c] sm:$0xf] }
 0x2df   :  { %5834 = vmatpush.bf16.msra.mxu1 %v9370_v19  ;;  %v2730_v0 = vpop.f32.mrf.mxu2  ;;  %v9650_v12 = vor.u32 %v10463_v24, %v9649_v23  ;;  %v8531_v19 = vld [vmem:[#allocation15 + $0x524] sm:$0xf0]  ;;  %v9230_v62 = vor.u32 %v10358_v52, %v9229_v22  ;;  %v8478_v7 = vor.u32 %v10166_v54, %v8475_v59  ;;  %v8111_v22 = vld [vmem:[#allocation15 + $0x1dc] sm:$0xf0]  ;;  %v8951_v52 = vld [vmem:[#allocation15 + $0x86c] sm:$0xf0] }
 0x2e0   :  { %v2731_v3 = vadd.f32 %v2730_v0, %v2718_v61  ;;  %v8534_v42 = vor.u32 %v10180_v17, %v8531_v19  ;;  %v10019_v61 = vld [vmem:[#allocation15 + $0x4] sm:$0xf]  ;;  %v7887_v0 = vld [vmem:[#allocation15 + $0x1c] sm:$0xf0]  ;;  %v9537_v24 = vld [vmem:[#allocation15 + $0xce8] sm:$0xf] }
 0x2e1   :  { %5845 = vmatpush.bf16.msra.mxu2 %v9650_v12  ;;  %v10435_v12 = vld [vmem:[#allocation15 + $0xd00] sm:$0xf0]  ;;  %v9203_v54 = vld [vmem:[#allocation15 + $0xa64] sm:$0xf0] }
 0x2e2   :  { %5813 = vmatpush.bf16.msrb.mxu3 %v8782_v30  ;;  %5825 = vmatpush.bf16.msra.mxu0 %v9034_v34  ;;  %vm2894_vm11 = vcmp.ge.f32.partialorder %v2731_v3, 0.0  ;;  %v2902_v9 = vmul.f32 0.2, %v2731_v3  ;;  %v8226_v30 = vor.u32 %v10103_v58, %v8223_v33  ;;  %v10096_v34 = vld [vmem:[#allocation15 + $0x26c] sm:$0xf]  ;;  %v9538_v19 = vor.u32 %v10435_v12, %v9537_v24 }
 0x2e3   :  { %5835 = vmatpush.bf16.msra.mxu1 %v9342_v36  ;;  %v10456_v36 = vld [vmem:[#allocation15 + $0xda8] sm:$0xf0]  ;;  %v10285_v33 = vld [vmem:[#allocation15 + $0x854] sm:$0xf]  ;;  %v8727_v12 = vld [vmem:[#allocation15 + $0x6ac] sm:$0xf0] }
 0x2e4   :  { %v2910_v14 = vsel %vm2894_vm11, %v2731_v3, %v2902_v9  ;;  %v9622_v40 = vor.u32 %v10456_v36, %v9621_v45  ;;  %v10082_v3 = vld [vmem:[#allocation15 + $0x1fc] sm:$0xf]  ;;  %v8954_v29 = vor.u32 %v10285_v33, %v8951_v52  ;;  %v10428_v45 = vld [vmem:[#allocation15 + $0xcc8] sm:$0xf0]  ;;  %v10257_v33 = vld [vmem:[#allocation15 + $0x774] sm:$0xf] }
 0x2e5   :  { %v11000_v27 = vpack.c.bf16 %v2910_v14, %v2910_v14  ;;  %v8142_v14 = vor.u32 %v10082_v3, %v8139_v4  ;;  %v10229_v24 = vld [vmem:[#allocation15 + $0x694] sm:$0xf] }
 0x2e6   :  { %5858 = vmatpush.bf16.msra.mxu3 %v8086_v37  ;;  %5826 = vmatpush.bf16.msra.mxu0 %v9006_v39  ;;  %v11002_v25 = vpop.f32.mrf.mxu0  ;;  %v7915_v39 = vld [vmem:[#allocation15 + $0x54] sm:$0xf0] }
 0x2e7   :  { %5836 = vmatpush.bf16.msra.mxu1 %v9314_v56  ;;  %v2732_v8 = vpop.f32.mrf.mxu2  ;;  %5814 = vmatmul.bf16.vlgmr.msrb.gmra.mxu3 %v11000_v27  ;;  %v7918_v60 = vor.u32 %v10026_v48, %v7915_v39  ;;  %v10271_v48 = vld [vmem:[#allocation15 + $0x7e4] sm:$0xf] }
 0x2e8   :  { %v11005_v37 = vpop.f32.mrf.mxu3  ;;  %5846 = vmatpush.bf16.msra.mxu2 %v9622_v40  ;;  %v10152_v8 = vld [vmem:[#allocation15 + $0x42c] sm:$0xf]  ;;  %v8391_v40 = vld [vmem:[#allocation15 + $0x40c] sm:$0xf0] }
 0x2e9   :  { %v2744_v17 = vadd.f32 %v11005_v37, %v1183_v15 }
 0x2ea   :  { %5859 = vmatpush.bf16.msra.mxu3 %v8058_v49  ;;  %5871 = vmatpush.bf16.msrb.mxu0 %v8310_v44  ;;  %v8198_v49 = vor.u32 %v10096_v34, %v8195_v38  ;;  %v8167_v44 = vld [vmem:[#allocation15 + $0x24c] sm:$0xf0]  ;;  %v8923_v34 = vld [vmem:[#allocation15 + $0x834] sm:$0xf0] }
 0x2eb   :  { %5837 = vmatpush.bf16.msra.mxu1 %v9286_v32  ;;  %v9565_v32 = vld [vmem:[#allocation15 + $0xd20] sm:$0xf]  ;;  %v2757_v36 = vadd.f32 %v11002_v25, %v2744_v17  ;;  %v10334_v17 = vld [vmem:[#allocation15 + $0x9dc] sm:$0xf] }
 0x2ec   :  { %5847 = vmatpush.bf16.msra.mxu2 %v9594_v55  ;;  %v9566_v9 = vor.u32 %v10442_v57, %v9565_v32  ;;  %v8363_v55 = vld [vmem:[#allocation15 + $0x3d4] sm:$0xf0]  ;;  %v10131_v32 = vld [vmem:[#allocation15 + $0x384] sm:$0xf]  ;;  %v8335_v57 = vld [vmem:[#allocation15 + $0x39c] sm:$0xf0] }
 0x2ee   :  { %5860 = vmatpush.bf16.msra.mxu3 %v8030_v1  ;;  %5872 = vmatpush.bf16.msrb.mxu0 %v8282_v41  ;;  %v2758_v56 = vpop.f32.mrf.mxu0  ;;  %v8170_v1 = vor.u32 %v10089_v50, %v8167_v44  ;;  %v10292_v41 = vld [vmem:[#allocation15 + $0x88c] sm:$0xf]  ;;  %v9481_v44 = vld [vmem:[#allocation15 + $0xc78] sm:$0xf] }
 0x2ef   :  { %5838 = vmatpush.bf16.msra.mxu1 %v9258_v20  ;;  %v8982_v58 = vor.u32 %v10292_v41, %v8979_v5  ;;  %v10075_v20 = vld [vmem:[#allocation15 + $0x1c4] sm:$0xf]  ;;  %v9482_v25 = vor.u32 %v10421_v51, %v9481_v44  ;;  %v10348_v56 = vld [vmem:[#allocation15 + $0xa4c] sm:$0xf]  ;;  %v10414_v41 = vld [vmem:[#allocation15 + $0xc58] sm:$0xf0] }
 0x2f0   :  { %v2745_v2 = vpop.f32.mrf.mxu3  ;;  %5848 = vmatpush.bf16.msra.mxu2 %v9566_v9  ;;  %v8114_v28 = vor.u32 %v10075_v20, %v8111_v22  ;;  %v9206_v4 = vor.u32 %v10348_v56, %v9203_v54  ;;  %v10341_v5 = vld [vmem:[#allocation15 + $0xa14] sm:$0xf]  ;;  %v9175_v9 = vld [vmem:[#allocation15 + $0xa2c] sm:$0xf0]  ;;  %v8338_v22 = vor.u32 %v10131_v32, %v8335_v57  ;;  %v10320_v44 = vld [vmem:[#allocation15 + $0x96c] sm:$0xf] }
 0x2f1   :  { %v9453_v2 = vld [vmem:[#allocation15 + $0xc40] sm:$0xf]  ;;  %v8839_v20 = vld [vmem:[#allocation15 + $0x78c] sm:$0xf0]  ;;  %v9091_v51 = vld [vmem:[#allocation15 + $0x984] sm:$0xf0] }
 0x2f2   :  { %5861 = vmatpush.bf16.msra.mxu3 %v8002_v10  ;;  %5873 = vmatpush.bf16.msrb.mxu0 %v8254_v13  ;;  %v10159_v10 = vld [vmem:[#allocation15 + $0x464] sm:$0xf]  ;;  %v7890_v13 = vor.u32 %v10019_v61, %v7887_v0  ;;  %v10264_v61 = vld [vmem:[#allocation15 + $0x7ac] sm:$0xf]  ;;  %v8867_v0 = vld [vmem:[#allocation15 + $0x7c4] sm:$0xf0] }
 0x2f3   :  { %5839 = vmatpush.bf16.msra.mxu1 %v9230_v62  ;;  %v8450_v23 = vor.u32 %v10159_v10, %v8447_v35  ;;  %v9509_v62 = vld [vmem:[#allocation15 + $0xcb0] sm:$0xf]  ;;  %v10236_v10 = vld [vmem:[#allocation15 + $0x6cc] sm:$0xf]  ;;  %v8755_v35 = vld [vmem:[#allocation15 + $0x6e4] sm:$0xf0] }
 0x2f4   :  { %5849 = vmatpush.bf16.msra.mxu2 %v9538_v19  ;;  %v9510_v37 = vor.u32 %v10428_v45, %v9509_v62  ;;  %v9147_v19 = vld [vmem:[#allocation15 + $0x9f4] sm:$0xf0]  ;;  %v10327_v62 = vld [vmem:[#allocation15 + $0x9a4] sm:$0xf]  ;;  %v9119_v45 = vld [vmem:[#allocation15 + $0x9bc] sm:$0xf0] }
 0x2f5   :  { %v2769_v11 = vpop.f32.mrf.mxu1  ;;  %v8061_v54 = vld [vmem:[#allocation15 + $0x158] sm:$0xf]  ;;  %v10058_v32 = vld [vmem:[#allocation15 + $0x138] sm:$0xf0]  ;;  %v10201_v57 = vld [vmem:[#allocation15 + $0x5b4] sm:$0xf] }
 0x2f6   :  { %5862 = vmatpush.bf16.msra.mxu3 %v7974_v26  ;;  %5874 = vmatpush.bf16.msrb.mxu0 %v8226_v30  ;;  %v8419_v26 = vld [vmem:[#allocation15 + $0x444] sm:$0xf0]  ;;  %v10278_v30 = vld [vmem:[#allocation15 + $0x81c] sm:$0xf]  ;;  %v2770_v46 = vadd.f32 %v2769_v11, %v2757_v36 }
 0x2f7   :  { %5884 = vmatpush.bf16.msrb.mxu1 %v8534_v42  ;;  %v8422_v38 = vor.u32 %v10152_v8, %v8419_v26  ;;  %v10145_v42 = vld [vmem:[#allocation15 + $0x3f4] sm:$0xf]  ;;  %v8730_v8 = vor.u32 %v10229_v24, %v8727_v12  ;;  %v8842_v26 = vor.u32 %v10257_v33, %v8839_v20  ;;  %v8005_v20 = vld [vmem:[#allocation15 + $0xe8] sm:$0xf]  ;;  %v10194_v24 = vld [vmem:[#allocation15 + $0x57c] sm:$0xf] }
 0x2f8   :  { %5850 = vmatpush.bf16.msra.mxu2 %v9510_v37  ;;  %v8394_v50 = vor.u32 %v10145_v42, %v8391_v40  ;;  %v10243_v40 = vld [vmem:[#allocation15 + $0x704] sm:$0xf]  ;;  %v8587_v12 = vld [vmem:[#allocation15 + $0x594] sm:$0xf0] }
 0x2fa   :  { %5863 = vmatpush.bf16.msra.mxu3 %v7946_v47  ;;  %5875 = vmatpush.bf16.msrb.mxu0 %v8198_v49  ;;  %v8926_v47 = vor.u32 %v10278_v30, %v8923_v34  ;;  %v8895_v49 = vld [vmem:[#allocation15 + $0x7fc] sm:$0xf0]  ;;  %v9150_v30 = vor.u32 %v10334_v17, %v9147_v19  ;;  %v10222_v34 = vld [vmem:[#allocation15 + $0x65c] sm:$0xf]  ;;  %v10299_v19 = vld [vmem:[#allocation15 + $0x8c4] sm:$0xf] }
 0x2fb   :  { %5885 = vmatpush.bf16.msrb.mxu1 %v8506_v53  ;;  %v10138_v53 = vld [vmem:[#allocation15 + $0x3bc] sm:$0xf] }
 0x2fc   :  { %5851 = vmatpush.bf16.msra.mxu2 %v9482_v25  ;;  %v1184_v25 = vperm.slane %v10994_v18, 6 }
 0x2fd   :  { %v2771_v43 = vpop.f32.mrf.mxu1 }
 0x2fe   :  { %5864 = vmatpush.bf16.msra.mxu3 %v7918_v60  ;;  %5876 = vmatpush.bf16.msrb.mxu0 %v8170_v1  ;;  %v8898_v60 = vor.u32 %v10271_v48, %v8895_v49  ;;  %v8366_v1 = vor.u32 %v10138_v53, %v8363_v55  ;;  %v8783_v43 = vld [vmem:[#allocation15 + $0x71c] sm:$0xf0]  ;;  %v9122_v48 = vor.u32 %v10327_v62, %v9119_v45  ;;  %v10215_v49 = vld [vmem:[#allocation15 + $0x624] sm:$0xf]  ;;  %v7977_v62 = vld [vmem:[#allocation15 + $0xb0] sm:$0xf] }
 0x2ff   :  { %5886 = vmatpush.bf16.msrb.mxu1 %v8478_v7  ;;  %v2782_v39 = vpop.f32.mrf.mxu2  ;;  %v9454_v7 = vor.u32 %v10414_v41, %v9453_v2  ;;  %v8786_v53 = vor.u32 %v10243_v40, %v8783_v43  ;;  %v9063_v2 = vld [vmem:[#allocation15 + $0x94c] sm:$0xf0]  ;;  %v10044_v45 = vld [vmem:[#allocation15 + $0xc8] sm:$0xf0]  ;;  %v8559_v43 = vld [vmem:[#allocation15 + $0x55c] sm:$0xf0] }
 0x300   :  { %v2783_v21 = vadd.f32 %v2782_v39, %v2770_v46  ;;  %v8089_v46 = vld [vmem:[#allocation15 + $0x190] sm:$0xf]  ;;  %v10072_v39 = vld [vmem:[#allocation15 + $0x1a8] sm:$0xf0] }
 0x301   :  { %5852 = vmatpush.bf16.msra.mxu2 %v9454_v7  ;;  %v8090_v56 = vor.u32 %v10072_v39, %v8089_v46  ;;  %v10121_v39 = vld [vmem:[#allocation15 + $0x330] sm:$0xf0] }
 0x302   :  { %5865 = vmatpush.bf16.msra.mxu3 %v7890_v13  ;;  %5877 = vmatpush.bf16.msrb.mxu0 %v8142_v14  ;;  %vm2895_vm12 = vcmp.ge.f32.partialorder %v2783_v21, 0.0  ;;  %v2903_v59 = vmul.f32 0.2, %v2783_v21  ;;  %v8870_v13 = vor.u32 %v10264_v61, %v8867_v0  ;;  %v8758_v14 = vor.u32 %v10236_v10, %v8755_v35  ;;  %v10208_v61 = vld [vmem:[#allocation15 + $0x5ec] sm:$0xf] }
 0x303   :  { %5887 = vmatpush.bf16.msrb.mxu1 %v8450_v23  ;;  %v9178_v23 = vor.u32 %v10341_v5, %v9175_v9  ;;  %v8643_v0 = vld [vmem:[#allocation15 + $0x604] sm:$0xf0]  ;;  %v8033_v5 = vld [vmem:[#allocation15 + $0x120] sm:$0xf]  ;;  %v8615_v9 = vld [vmem:[#allocation15 + $0x5cc] sm:$0xf0] }
 0x304   :  { %v2911_v3 = vsel %vm2895_vm12, %v2783_v21, %v2903_v59  ;;  %v9094_v59 = vor.u32 %v10320_v44, %v9091_v51  ;;  %v8646_v41 = vor.u32 %v10208_v61, %v8643_v0  ;;  %v10306_v10 = vld [vmem:[#allocation15 + $0x8fc] sm:$0xf]  ;;  %v9035_v35 = vld [vmem:[#allocation15 + $0x914] sm:$0xf0]  ;;  %v8034_v33 = vor.u32 %v10058_v32, %v8033_v5  ;;  %v10397_v51 = vld [vmem:[#allocation15 + $0xbd4] sm:$0xf] }
 0x305   :  { %5866 = vmatmul.bf16.vlgmr.msra.gmra.mxu3 %v10971_v63  ;;  %v11011_v15 = vpack.c.bf16 %v2911_v3, %v2911_v3  ;;  %5897 = vmatpush.bf16.msrb.mxu2 %v8758_v14  ;;  %v7978_v44 = vor.u32 %v10044_v45, %v7977_v62  ;;  %v8257_v61 = vld [vmem:[#allocation15 + $0x2e0] sm:$0xf]  ;;  %v10114_v0 = vld [vmem:[#allocation15 + $0x2f8] sm:$0xf0]  ;;  %v8229_v32 = vld [vmem:[#allocation15 + $0x2a8] sm:$0xf] }
 0x306   :  { %5910 = vmatpush.bf16.msrb.mxu3 %v8982_v58  ;;  %5878 = vmatpush.bf16.msrb.mxu0 %v8114_v28  ;;  %v11013_v11 = vpop.f32.mrf.mxu0  ;;  %v10250_v28 = vld [vmem:[#allocation15 + $0x73c] sm:$0xf]  ;;  %v8258_v5 = vor.u32 %v10114_v0, %v8257_v61  ;;  %v8173_v62 = vld [vmem:[#allocation15 + $0x238] sm:$0xf]  ;;  %v10093_v45 = vld [vmem:[#allocation15 + $0x250] sm:$0xf0] }
 0x307   :  { %5888 = vmatpush.bf16.msrb.mxu1 %v8422_v38  ;;  %v2784_v58 = vpop.f32.mrf.mxu2  ;;  %5827 = vmatmul.bf16.vlgmr.msra.gmra.mxu0 %v11011_v15  ;;  %v8699_v38 = vld [vmem:[#allocation15 + $0x674] sm:$0xf0]  ;;  %v9231_v0 = vld [vmem:[#allocation15 + $0xa9c] sm:$0xf0] }
 0x308   :  { %v2795_v52 = vpop.f32.mrf.mxu3  ;;  %v8702_v36 = vor.u32 %v10222_v34, %v8699_v38  ;;  %v10128_v34 = vld [vmem:[#allocation15 + $0x368] sm:$0xf0]  ;;  %v9427_v38 = vld [vmem:[#allocation15 + $0xc24] sm:$0xf0] }
 0x309   :  { %5898 = vmatpush.bf16.msrb.mxu2 %v8730_v8  ;;  %v2796_v3 = vadd.f32 %v2795_v52, %v1184_v25  ;;  %v9038_v52 = vor.u32 %v10306_v10, %v9035_v35  ;;  %v9007_v8 = vld [vmem:[#allocation15 + $0x8dc] sm:$0xf0]  ;;  %v10383_v10 = vld [vmem:[#allocation15 + $0xb64] sm:$0xf] }
 0x30a   :  { %5911 = vmatpush.bf16.msrb.mxu3 %v8954_v29  ;;  %5923 = vmatpush.bf16.msra.mxu0 %v9206_v4  ;;  %v8811_v29 = vld [vmem:[#allocation15 + $0x754] sm:$0xf0]  ;;  %v9343_v35 = vld [vmem:[#allocation15 + $0xb7c] sm:$0xf0] }
 0x30b   :  { %5889 = vmatpush.bf16.msrb.mxu1 %v8394_v50  ;;  %v8814_v42 = vor.u32 %v10250_v28, %v8811_v29  ;;  %v8671_v50 = vld [vmem:[#allocation15 + $0x63c] sm:$0xf0]  ;;  %v2809_v14 = vadd.f32 %v11013_v11, %v2796_v3  ;;  %v10404_v29 = vld [vmem:[#allocation15 + $0xc0c] sm:$0xf] }
 0x30c   :  { %v8674_v21 = vor.u32 %v10215_v49, %v8671_v50  ;;  %v7921_v3 = vld [vmem:[#allocation15 + $0x40] sm:$0xf] }
 0x30d   :  { %5899 = vmatpush.bf16.msrb.mxu2 %v8702_v36 }
 0x30e   :  { %5912 = vmatpush.bf16.msrb.mxu3 %v8926_v47  ;;  %5924 = vmatpush.bf16.msra.mxu0 %v9178_v23  ;;  %v2810_v37 = vpop.f32.mrf.mxu0  ;;  %v10051_v23 = vld [vmem:[#allocation15 + $0x100] sm:$0xf0] }
 0x30f   :  { %5890 = vmatpush.bf16.msrb.mxu1 %v8366_v1  ;;  %v10313_v1 = vld [vmem:[#allocation15 + $0x934] sm:$0xf]  ;;  %v8006_v11 = vor.u32 %v10051_v23, %v8005_v20  ;;  %v9010_v37 = vor.u32 %v10299_v19, %v9007_v8  ;;  %v8985_v20 = vld [vmem:[#allocation15 + $0x890] sm:$0xf]  ;;  %v9346_v23 = vor.u32 %v10383_v10, %v9343_v35  ;;  %v10376_v19 = vld [vmem:[#allocation15 + $0xb2c] sm:$0xf] }
 0x310   :  { %v2797_v47 = vpop.f32.mrf.mxu3  ;;  %v9066_v7 = vor.u32 %v10313_v1, %v9063_v2  ;;  %v10390_v2 = vld [vmem:[#allocation15 + $0xb9c] sm:$0xf]  ;;  %v9315_v8 = vld [vmem:[#allocation15 + $0xb44] sm:$0xf0]  ;;  %v8873_v35 = vld [vmem:[#allocation15 + $0x7b0] sm:$0xf] }
 0x311   :  { %5900 = vmatpush.bf16.msrb.mxu2 %v8674_v21  ;;  %v9430_v47 = vor.u32 %v10404_v29, %v9427_v38  ;;  %v9399_v21 = vld [vmem:[#allocation15 + $0xbec] sm:$0xf0]  ;;  %v9318_v38 = vor.u32 %v10376_v19, %v9315_v8 }
 0x312   :  { %5913 = vmatpush.bf16.msrb.mxu3 %v8898_v60  ;;  %5925 = vmatpush.bf16.msra.mxu0 %v9150_v30  ;;  %v10065_v60 = vld [vmem:[#allocation15 + $0x170] sm:$0xf0]  ;;  %v8313_v30 = vld [vmem:[#allocation15 + $0x350] sm:$0xf] }
 0x313   :  { %5891 = vmatpush.bf16.msrb.mxu1 %v8338_v22  ;;  %v8062_v4 = vor.u32 %v10065_v60, %v8061_v54  ;;  %v8314_v40 = vor.u32 %v10128_v34, %v8313_v30  ;;  %v9402_v60 = vor.u32 %v10397_v51, %v9399_v21  ;;  %v8957_v34 = vld [vmem:[#allocation15 + $0x858] sm:$0xf] }
 0x315   :  { %v2821_v55 = vpop.f32.mrf.mxu1  ;;  %5901 = vmatpush.bf16.msrb.mxu2 %v8646_v41  ;;  %v9371_v41 = vld [vmem:[#allocation15 + $0xbb4] sm:$0xf0] }
 0x316   :  { %5914 = vmatpush.bf16.msrb.mxu3 %v8870_v13  ;;  %5926 = vmatpush.bf16.msra.mxu0 %v9122_v48  ;;  %v8618_v13 = vor.u32 %v10201_v57, %v8615_v9  ;;  %v2822_v22 = vadd.f32 %v2821_v55, %v2809_v14  ;;  %v8285_v48 = vld [vmem:[#allocation15 + $0x318] sm:$0xf]  ;;  %v10037_v55 = vld [vmem:[#allocation15 + $0x90] sm:$0xf0]  ;;  %v10107_v57 = vld [vmem:[#allocation15 + $0x2c0] sm:$0xf0] }
 0x317   :  { %5879 = vmatmul.bf16.vlgmr.msrb.gmra.mxu0 %v10978_v16  ;;  %v8286_v54 = vor.u32 %v10121_v39, %v8285_v48  ;;  %v7893_v14 = vld [vmem:[#allocation15 + $0x8] sm:$0xf]  ;;  %v8145_v48 = vld [vmem:[#allocation15 + $0x200] sm:$0xf]  ;;  %v10086_v39 = vld [vmem:[#allocation15 + $0x218] sm:$0xf0] }
 0x319   :  { %5902 = vmatpush.bf16.msrb.mxu2 %v8618_v13 }
 0x31a   :  { %5915 = vmatpush.bf16.msrb.mxu3 %v8842_v26  ;;  %5927 = vmatpush.bf16.msra.mxu0 %v9094_v59  ;;  %v8590_v26 = vor.u32 %v10194_v24, %v8587_v12  ;;  %v8201_v24 = vld [vmem:[#allocation15 + $0x270] sm:$0xf]  ;;  %v10100_v12 = vld [vmem:[#allocation15 + $0x288] sm:$0xf0] }
 0x31b   :  { %v8202_v30 = vor.u32 %v10100_v12, %v8201_v24  ;;  %v10345_v24 = vld [vmem:[#allocation15 + $0xa30] sm:$0xf0] }
 0x31d   :  { %v2823_v58 = vpop.f32.mrf.mxu1  ;;  %5903 = vmatpush.bf16.msrb.mxu2 %v8590_v26  ;;  %v1185_v26 = vperm.slane %v10994_v18, 7  ;;  %v8174_v18 = vor.u32 %v10093_v45, %v8173_v62 }
 0x31e   :  { %5916 = vmatpush.bf16.msrb.mxu3 %v8814_v42  ;;  %5928 = vmatpush.bf16.msra.mxu0 %v9066_v7  ;;  %v10187_v42 = vld [vmem:[#allocation15 + $0x544] sm:$0xf]  ;;  %v9374_v7 = vor.u32 %v10390_v2, %v9371_v41 }
 0x31f   :  { %v2834_v17 = vpop.f32.mrf.mxu2  ;;  %v8562_v49 = vor.u32 %v10187_v42, %v8559_v43  ;;  %v10023_v58 = vld [vmem:[#allocation15 + $0x20] sm:$0xf0]  ;;  %v8929_v43 = vld [vmem:[#allocation15 + $0x820] sm:$0xf] }
 0x320   :  { %v2835_v28 = vadd.f32 %v2834_v17, %v2822_v22  ;;  %v10296_v22 = vld [vmem:[#allocation15 + $0x8a8] sm:$0xf0]  ;;  %v7894_v17 = vor.u32 %v10023_v58, %v7893_v14  ;;  %v10079_v2 = vld [vmem:[#allocation15 + $0x1e0] sm:$0xf0] }
 0x321   :  { %5904 = vmatpush.bf16.msrb.mxu2 %v8562_v49  ;;  %v10362_v49 = vld [vmem:[#allocation15 + $0xabc] sm:$0xf]  ;;  %v11030_v14 = vld [vmem:[#allocation16] sm:$0xff] }
 0x322   :  { %5917 = vmatpush.bf16.msrb.mxu3 %v8786_v53  ;;  %vm2896_vm13 = vcmp.ge.f32.partialorder %v2835_v28, 0.0  ;;  %v2904_v36 = vmul.f32 0.2, %v2835_v28  ;;  %5929 = vmatpush.bf16.msra.mxu0 %v9038_v52  ;;  %v7949_v53 = vld [vmem:[#allocation15 + $0x78] sm:$0xf]  ;;  %v3436_v8 = vperm.slane %v11030_v14, 0 }
 0x323   :  { %v7950_v1 = vor.u32 %v10037_v55, %v7949_v53  ;;  %v8146_v55 = vor.u32 %v10086_v39, %v8145_v48  ;;  %v10170_v48 = vld [vmem:[#allocation15 + $0x4b8] sm:$0xf0] }
 0x324   :  { %v2912_v46 = vsel %vm2896_vm13, %v2835_v28, %v2904_v36  ;;  %v8986_v28 = vor.u32 %v10296_v22, %v8985_v20  ;;  %v10369_v36 = vld [vmem:[#allocation15 + $0xaf4] sm:$0xf] }
 0x325   :  { %5918 = vmatmul.bf16.vlgmr.msrb.gmra.mxu3 %v11000_v27  ;;  %v11020_v50 = vpack.c.bf16 %v2912_v46, %v2912_v46  ;;  %v10282_v46 = vld [vmem:[#allocation15 + $0x838] sm:$0xf0] }
 0x326   :  { %5962 = vmatpush.bf16.msra.mxu3 %v8090_v56  ;;  %v11022_v25 = vpop.f32.mrf.mxu0  ;;  %5930 = vmatpush.bf16.msra.mxu0 %v9010_v37  ;;  %v9287_v37 = vld [vmem:[#allocation15 + $0xb0c] sm:$0xf0]  ;;  %v8930_v21 = vor.u32 %v10282_v46, %v8929_v43  ;;  %v10446_v46 = vld [vmem:[#allocation15 + $0xd5c] sm:$0xf] }
 0x327   :  { %v2836_v56 = vpop.f32.mrf.mxu2  ;;  %5840 = vmatmul.bf16.vlgmr.msra.gmra.mxu1 %v11020_v50 }
 0x328   :  { %5936 = vmatpush.bf16.msra.mxu1 %v9430_v47  ;;  %v2847_v59 = vpop.f32.mrf.mxu3  ;;  %v9290_v47 = vor.u32 %v10369_v36, %v9287_v37  ;;  %v8901_v56 = vld [vmem:[#allocation15 + $0x7e8] sm:$0xf]  ;;  %v9153_v37 = vld [vmem:[#allocation15 + $0x9e0] sm:$0xf] }
 0x329   :  { %5931 = vmatmul.bf16.vlgmr.msra.gmra.mxu0 %v11011_v15  ;;  %v2848_v42 = vadd.f32 %v2847_v59, %v1185_v26  ;;  %v10355_v59 = vld [vmem:[#allocation15 + $0xa84] sm:$0xf]  ;;  %v8509_v26 = vld [vmem:[#allocation15 + $0x4d8] sm:$0xf] }
 0x32a   :  { %5963 = vmatpush.bf16.msra.mxu3 %v8062_v4  ;;  %5975 = vmatpush.bf16.msrb.mxu0 %v8314_v40  ;;  %v10030_v4 = vld [vmem:[#allocation15 + $0x58] sm:$0xf0] }
 0x32b   :  { %v7922_v9 = vor.u32 %v10030_v4, %v7921_v3  ;;  %v2861_v51 = vadd.f32 %v11022_v25, %v2848_v42  ;;  %v10460_v3 = vld [vmem:[#allocation15 + $0xdcc] sm:$0xf]  ;;  %v9209_v4 = vld [vmem:[#allocation15 + $0xa50] sm:$0xf]  ;;  %v10338_v42 = vld [vmem:[#allocation15 + $0x9f8] sm:$0xf0] }
 0x32c   :  { %5937 = vmatpush.bf16.msra.mxu1 %v9402_v60 }
 0x32e   :  { %5964 = vmatpush.bf16.msra.mxu3 %v8034_v33  ;;  %5976 = vmatpush.bf16.msrb.mxu0 %v8286_v54  ;;  %v2862_v13 = vpop.f32.mrf.mxu0  ;;  %v8230_v33 = vor.u32 %v10107_v57, %v8229_v32  ;;  %v10275_v54 = vld [vmem:[#allocation15 + $0x800] sm:$0xf0]  ;;  %v9651_v32 = vld [vmem:[#allocation15 + $0xde4] sm:$0xf0]  ;;  %v8537_v57 = vld [vmem:[#allocation15 + $0x510] sm:$0xf] }
 0x32f   :  { %v8902_v25 = vor.u32 %v10275_v54, %v8901_v56  ;;  %v10268_v13 = vld [vmem:[#allocation15 + $0x7c8] sm:$0xf0]  ;;  %v9125_v56 = vld [vmem:[#allocation15 + $0x9a8] sm:$0xf]  ;;  %v10331_v54 = vld [vmem:[#allocation15 + $0x9c0] sm:$0xf0] }
 0x330   :  { %5938 = vmatpush.bf16.msra.mxu1 %v9374_v7  ;;  %v2849_v52 = vpop.f32.mrf.mxu3  ;;  %v8874_v19 = vor.u32 %v10268_v13, %v8873_v35 }
 0x331   :  { %v10453_v52 = vld [vmem:[#allocation15 + $0xd94] sm:$0xf] }
 0x332   :  { %5965 = vmatpush.bf16.msra.mxu3 %v8006_v11  ;;  %5977 = vmatpush.bf16.msrb.mxu0 %v8258_v5  ;;  %v10289_v11 = vld [vmem:[#allocation15 + $0x870] sm:$0xf0]  ;;  %v10352_v5 = vld [vmem:[#allocation15 + $0xa68] sm:$0xf0] }
 0x333   :  { %v8958_v40 = vor.u32 %v10289_v11, %v8957_v34  ;;  %v9210_v20 = vor.u32 %v10352_v5, %v9209_v4  ;;  %v8845_v34 = vld [vmem:[#allocation15 + $0x778] sm:$0xf]  ;;  %v10261_v11 = vld [vmem:[#allocation15 + $0x790] sm:$0xf0]  ;;  %v9126_v5 = vor.u32 %v10331_v54, %v9125_v56  ;;  %v10411_v56 = vld [vmem:[#allocation15 + $0xc44] sm:$0xf] }
 0x334   :  { %5939 = vmatpush.bf16.msra.mxu1 %v9346_v23  ;;  %v9181_v23 = vld [vmem:[#allocation15 + $0xa18] sm:$0xf]  ;;  %v8846_v43 = vor.u32 %v10261_v11, %v8845_v34  ;;  %v10425_v34 = vld [vmem:[#allocation15 + $0xcb4] sm:$0xf]  ;;  %v9013_v54 = vld [vmem:[#allocation15 + $0x8c8] sm:$0xf] }
 0x335   :  { %v2873_v29 = vpop.f32.mrf.mxu1  ;;  %v9182_v62 = vor.u32 %v10345_v24, %v9181_v23  ;;  %v10062_v24 = vld [vmem:[#allocation15 + $0x15c] sm:$0xf] }
 0x336   :  { %5966 = vmatpush.bf16.msra.mxu3 %v7978_v44  ;;  %5978 = vmatpush.bf16.msrb.mxu0 %v8230_v33  ;;  %v9259_v44 = vld [vmem:[#allocation15 + $0xad4] sm:$0xf0]  ;;  %v2874_v60 = vadd.f32 %v2873_v29, %v2861_v51  ;;  %v9234_v33 = vor.u32 %v10355_v59, %v9231_v0  ;;  %v10254_v51 = vld [vmem:[#allocation15 + $0x758] sm:$0xf0]  ;;  %v8453_v0 = vld [vmem:[#allocation15 + $0x468] sm:$0xf] }
 0x337   :  { %5892 = vmatmul.bf16.vlgmr.msrb.gmra.mxu1 %v10989_v6  ;;  %v9262_v61 = vor.u32 %v10362_v49, %v9259_v44  ;;  %v9595_v49 = vld [vmem:[#allocation15 + $0xd74] sm:$0xf0]  ;;  %v8817_v44 = vld [vmem:[#allocation15 + $0x740] sm:$0xf] }
 0x338   :  { %5940 = vmatpush.bf16.msra.mxu1 %v9318_v38  ;;  %v9598_v59 = vor.u32 %v10446_v46, %v9595_v49  ;;  %v8369_v49 = vld [vmem:[#allocation15 + $0x3c0] sm:$0xf] }
 0x33a   :  { %5967 = vmatpush.bf16.msra.mxu3 %v7950_v1  ;;  %5979 = vmatpush.bf16.msrb.mxu0 %v8202_v30  ;;  %v8117_v1 = vld [vmem:[#allocation15 + $0x1c8] sm:$0xf]  ;;  %v9623_v30 = vld [vmem:[#allocation15 + $0xdac] sm:$0xf0] }
 0x33b   :  { %v8118_v10 = vor.u32 %v10079_v2, %v8117_v1  ;;  %v10163_v1 = vld [vmem:[#allocation15 + $0x480] sm:$0xf0]  ;;  %v9567_v2 = vld [vmem:[#allocation15 + $0xd3c] sm:$0xf0] }
 0x33c   :  { %5941 = vmatpush.bf16.msra.mxu1 %v9290_v47  ;;  %v8481_v47 = vld [vmem:[#allocation15 + $0x4a0] sm:$0xf] }
 0x33d   :  { %v2875_v53 = vpop.f32.mrf.mxu1 }
 0x33e   :  { %5968 = vmatpush.bf16.msra.mxu3 %v7922_v9  ;;  %5980 = vmatpush.bf16.msrb.mxu0 %v8174_v18  ;;  %v10184_v9 = vld [vmem:[#allocation15 + $0x528] sm:$0xf0]  ;;  %v9626_v18 = vor.u32 %v10453_v52, %v9623_v30  ;;  %v8482_v53 = vor.u32 %v10170_v48, %v8481_v47  ;;  %v10418_v47 = vld [vmem:[#allocation15 + $0xc7c] sm:$0xf] }
 0x33f   :  { %v2886_v41 = vpop.f32.mrf.mxu2  ;;  %v8538_v22 = vor.u32 %v10184_v9, %v8537_v57  ;;  %v9097_v57 = vld [vmem:[#allocation15 + $0x970] sm:$0xf]  ;;  %v10324_v9 = vld [vmem:[#allocation15 + $0x988] sm:$0xf0] }
 0x340   :  { %v2887_v7 = vadd.f32 %v2886_v41, %v2874_v60  ;;  %5942 = vmatpush.bf16.msra.mxu1 %v9262_v61  ;;  %v8818_v60 = vor.u32 %v10254_v51, %v8817_v44  ;;  %v10439_v61 = vld [vmem:[#allocation15 + $0xd24] sm:$0xf]  ;;  %v8789_v41 = vld [vmem:[#allocation15 + $0x708] sm:$0xf]  ;;  %v10156_v52 = vld [vmem:[#allocation15 + $0x448] sm:$0xf0]  ;;  %v9098_v23 = vor.u32 %v10324_v9, %v9097_v57 }
 0x341   :  { %v9570_v35 = vor.u32 %v10439_v61, %v9567_v2  ;;  %v10142_v44 = vld [vmem:[#allocation15 + $0x3d8] sm:$0xf0]  ;;  %v8315_v2 = vld [vmem:[#allocation15 + $0x36c] sm:$0xf0]  ;;  %v10240_v57 = vld [vmem:[#allocation15 + $0x6e8] sm:$0xf0] }
 0x342   :  { %5969 = vmatpush.bf16.msra.mxu3 %v7894_v17  ;;  %5981 = vmatpush.bf16.msrb.mxu0 %v8146_v55  ;;  %vm2897_vm14 = vcmp.ge.f32.partialorder %v2887_v7, 0.0  ;;  %v2905_v58 = vmul.f32 0.2, %v2887_v7  ;;  %v9654_v17 = vor.u32 %v10460_v3, %v9651_v32  ;;  %v10247_v3 = vld [vmem:[#allocation15 + $0x720] sm:$0xf0]  ;;  %v8454_v32 = vor.u32 %v10163_v1, %v8453_v0 }
 0x343   :  { %v8790_v13 = vor.u32 %v10247_v3, %v8789_v41  ;;  %v8370_v61 = vor.u32 %v10142_v44, %v8369_v49  ;;  %v9455_v0 = vld [vmem:[#allocation15 + $0xc5c] sm:$0xf0]  ;;  %v10125_v1 = vld [vmem:[#allocation15 + $0x354] sm:$0xf]  ;;  %v9433_v9 = vld [vmem:[#allocation15 + $0xc10] sm:$0xf] }
 0x344   :  { %v2913_v12 = vsel %vm2897_vm14, %v2887_v7, %v2905_v58  ;;  %5943 = vmatpush.bf16.msra.mxu1 %v9234_v33  ;;  %v10069_v7 = vld [vmem:[#allocation15 + $0x194] sm:$0xf]  ;;  %v10432_v58 = vld [vmem:[#allocation15 + $0xcec] sm:$0xf]  ;;  %v8677_v44 = vld [vmem:[#allocation15 + $0x628] sm:$0xf] }
 0x345   :  { %5970 = vmatmul.bf16.vlgmr.msra.gmra.mxu3 %v10971_v63  ;;  %v11033_v29 = vpack.c.bf16 %v2913_v12, %v2913_v12  ;;  %v8063_v12 = vld [vmem:[#allocation15 + $0x174] sm:$0xf0] }
 0x346   :  { %6014 = vmatpush.bf16.msrb.mxu3 %v8986_v28  ;;  %v10177_v28 = vld [vmem:[#allocation15 + $0x4f0] sm:$0xf0]  ;;  %5982 = vmatpush.bf16.msrb.mxu0 %v8118_v10  ;;  %v5776_v38 = vpop.f32.mrf.mxu0  ;;  %v8066_v11 = vor.u32 %v10062_v24, %v8063_v12  ;;  %v10118_v24 = vld [vmem:[#allocation15 + $0x31c] sm:$0xf]  ;;  %v8287_v12 = vld [vmem:[#allocation15 + $0x334] sm:$0xf0] }
 0x347   :  { %v2888_v45 = vpop.f32.mrf.mxu2  ;;  %5853 = vmatmul.bf16.vlgmr.msra.gmra.mxu2 %v11033_v29  ;;  %v8510_v36 = vor.u32 %v10177_v28, %v8509_v26  ;;  %5944 = vmatmul.bf16.vlgmr.msra.gmra.mxu1 %v11020_v50 }
 0x348   :  { %5988 = vmatpush.bf16.msrb.mxu1 %v8538_v22  ;;  %5949 = vmatpush.bf16.msra.mxu2 %v9654_v17  ;;  %v8425_v22 = vld [vmem:[#allocation15 + $0x430] sm:$0xf]  ;;  %v10149_v45 = vld [vmem:[#allocation15 + $0x410] sm:$0xf0] }
 0x349   :  { %5983 = vmatmul.bf16.vlgmr.msrb.gmra.mxu0 %v10978_v16  ;;  %v8426_v30 = vor.u32 %v10156_v52, %v8425_v22 }
 0x34a   :  { %6015 = vmatpush.bf16.msrb.mxu3 %v8958_v40  ;;  %6027 = vmatpush.bf16.msra.mxu0 %v9210_v20  ;;  %v5763_v40 = vpop.f32.mrf.mxu3  ;;  %v9539_v20 = vld [vmem:[#allocation15 + $0xd04] sm:$0xf0] }
 0x34b   :  { %v5764_v39 = vadd.f32 %v5763_v40, %v3436_v8  ;;  %v10317_v8 = vld [vmem:[#allocation15 + $0x950] sm:$0xf0]  ;;  %v9542_v28 = vor.u32 %v10432_v58, %v9539_v20  ;;  %v9041_v40 = vld [vmem:[#allocation15 + $0x900] sm:$0xf]  ;;  %v8318_v58 = vor.u32 %v10125_v1, %v8315_v2  ;;  %v8987_v1 = vld [vmem:[#allocation15 + $0x8ac] sm:$0xf0] }
 0x34c   :  { %5989 = vmatpush.bf16.msrb.mxu1 %v8510_v36  ;;  %5950 = vmatpush.bf16.msra.mxu2 %v9626_v18  ;;  %v10310_v18 = vld [vmem:[#allocation15 + $0x918] sm:$0xf0] }
 0x34d   :  { %v5777_v55 = vadd.f32 %v5776_v38, %v5764_v39  ;;  %v9511_v38 = vld [vmem:[#allocation15 + $0xccc] sm:$0xf0]  ;;  %v9483_v39 = vld [vmem:[#allocation15 + $0xc94] sm:$0xf0]  ;;  %v9042_v51 = vor.u32 %v10310_v18, %v9041_v40  ;;  %v10226_v40 = vld [vmem:[#allocation15 + $0x678] sm:$0xf0] }
 0x34e   :  { %6016 = vmatpush.bf16.msrb.mxu3 %v8930_v21  ;;  %6028 = vmatpush.bf16.msra.mxu0 %v9182_v62  ;;  %v9154_v21 = vor.u32 %v10338_v42, %v9153_v37  ;;  %v5778_v4 = vpop.f32.mrf.mxu0  ;;  %v8397_v62 = vld [vmem:[#allocation15 + $0x3f8] sm:$0xf]  ;;  %v10055_v37 = vld [vmem:[#allocation15 + $0x124] sm:$0xf]  ;;  %v8035_v42 = vld [vmem:[#allocation15 + $0x13c] sm:$0xf0] }
 0x34f   :  { %v8398_v46 = vor.u32 %v10149_v45, %v8397_v62  ;;  %v8038_v48 = vor.u32 %v10055_v37, %v8035_v42  ;;  %v8341_v4 = vld [vmem:[#allocation15 + $0x388] sm:$0xf]  ;;  %v8705_v45 = vld [vmem:[#allocation15 + $0x660] sm:$0xf] }
 0x350   :  { %5990 = vmatpush.bf16.msrb.mxu1 %v8482_v53  ;;  %5951 = vmatpush.bf16.msra.mxu2 %v9598_v59  ;;  %v8007_v53 = vld [vmem:[#allocation15 + $0x104] sm:$0xf0]  ;;  %v10303_v59 = vld [vmem:[#allocation15 + $0x8e0] sm:$0xf0]  ;;  %v8259_v37 = vld [vmem:[#allocation15 + $0x2fc] sm:$0xf0] }
 0x351   :  { %v9377_v18 = vld [vmem:[#allocation15 + $0xba0] sm:$0xf] }
 0x352   :  { %6017 = vmatpush.bf16.msrb.mxu3 %v8902_v25  ;;  %6029 = vmatpush.bf16.msra.mxu0 %v9154_v21  ;;  %v8091_v25 = vld [vmem:[#allocation15 + $0x1ac] sm:$0xf0]  ;;  %v5765_v10 = vpop.f32.mrf.mxu3  ;;  %v10048_v21 = vld [vmem:[#allocation15 + $0xec] sm:$0xf] }
 0x353   :  { %v8094_v33 = vor.u32 %v10069_v7, %v8091_v25  ;;  %v8010_v3 = vor.u32 %v10048_v21, %v8007_v53  ;;  %v8761_v7 = vld [vmem:[#allocation15 + $0x6d0] sm:$0xf]  ;;  %v10408_v10 = vld [vmem:[#allocation15 + $0xc28] sm:$0xf0]  ;;  %v8231_v21 = vld [vmem:[#allocation15 + $0x2c4] sm:$0xf0] }
 0x354   :  { %5991 = vmatpush.bf16.msrb.mxu1 %v8454_v32  ;;  %5952 = vmatpush.bf16.msra.mxu2 %v9570_v35  ;;  %v9014_v32 = vor.u32 %v10303_v59, %v9013_v54  ;;  %v10041_v35 = vld [vmem:[#allocation15 + $0xb4] sm:$0xf]  ;;  %v8762_v22 = vor.u32 %v10240_v57, %v8761_v7  ;;  %v9434_v52 = vor.u32 %v10408_v10, %v9433_v9  ;;  %v10387_v54 = vld [vmem:[#allocation15 + $0xb80] sm:$0xf0]  ;;  %v10020_v59 = vld [vmem:[#allocation15 + $0xc] sm:$0xf] }
 0x355   :  { %v5789_v17 = vpop.f32.mrf.mxu1  ;;  %v8649_v7 = vld [vmem:[#allocation15 + $0x5f0] sm:$0xf]  ;;  %v10380_v10 = vld [vmem:[#allocation15 + $0xb48] sm:$0xf0] }
 0x356   :  { %6018 = vmatpush.bf16.msrb.mxu3 %v8874_v19  ;;  %6030 = vmatpush.bf16.msra.mxu0 %v9126_v5  ;;  %v9069_v19 = vld [vmem:[#allocation15 + $0x938] sm:$0xf]  ;;  %v5790_v26 = vadd.f32 %v5789_v17, %v5777_v55  ;;  %v10135_v5 = vld [vmem:[#allocation15 + $0x3a0] sm:$0xf0]  ;;  %v9321_v9 = vld [vmem:[#allocation15 + $0xb30] sm:$0xf] }
 0x357   :  { %v9070_v36 = vor.u32 %v10317_v8, %v9069_v19  ;;  %5905 = vmatmul.bf16.vlgmr.msrb.gmra.mxu2 %v10992_v31  ;;  %v8342_v20 = vor.u32 %v10135_v5, %v8341_v4  ;;  %v10233_v19 = vld [vmem:[#allocation15 + $0x6b0] sm:$0xf0]  ;;  %v9405_v8 = vld [vmem:[#allocation15 + $0xbd8] sm:$0xf]  ;;  %v8203_v4 = vld [vmem:[#allocation15 + $0x28c] sm:$0xf0] }
 0x358   :  { %5953 = vmatpush.bf16.msra.mxu2 %v9542_v28  ;;  %5992 = vmatpush.bf16.msrb.mxu1 %v8426_v30  ;;  %v10034_v28 = vld [vmem:[#allocation15 + $0x7c] sm:$0xf]  ;;  %v7951_v30 = vld [vmem:[#allocation15 + $0x94] sm:$0xf0] }
 0x359   :  { %v7954_v42 = vor.u32 %v10034_v28, %v7951_v30  ;;  %v10279_v30 = vld [vmem:[#allocation15 + $0x824] sm:$0xf] }
 0x35a   :  { %6019 = vmatpush.bf16.msrb.mxu3 %v8846_v43  ;;  %6031 = vmatpush.bf16.msra.mxu0 %v9098_v23  ;;  %v9514_v43 = vor.u32 %v10425_v34, %v9511_v38  ;;  %v8733_v23 = vld [vmem:[#allocation15 + $0x698] sm:$0xf]  ;;  %v8290_v34 = vor.u32 %v10118_v24, %v8287_v12  ;;  %v9322_v24 = vor.u32 %v10380_v10, %v9321_v9 }
 0x35b   :  { %v8734_v38 = vor.u32 %v10233_v19, %v8733_v23  ;;  %v8621_v12 = vld [vmem:[#allocation15 + $0x5b8] sm:$0xf] }
 0x35c   :  { %5954 = vmatpush.bf16.msra.mxu2 %v9514_v43  ;;  %5993 = vmatpush.bf16.msrb.mxu1 %v8398_v46  ;;  %v10394_v43 = vld [vmem:[#allocation15 + $0xbb8] sm:$0xf0]  ;;  %v10027_v46 = vld [vmem:[#allocation15 + $0x44] sm:$0xf]  ;;  %v9183_v9 = vld [vmem:[#allocation15 + $0xa34] sm:$0xf0] }
 0x35d   :  { %v5791_v55 = vpop.f32.mrf.mxu1  ;;  %v9378_v49 = vor.u32 %v10394_v43, %v9377_v18  ;;  %v10272_v18 = vld [vmem:[#allocation15 + $0x7ec] sm:$0xf] }
 0x35e   :  { %6020 = vmatpush.bf16.msrb.mxu3 %v8818_v60  ;;  %6032 = vmatpush.bf16.msra.mxu0 %v9070_v36  ;;  %v9486_v60 = vor.u32 %v10418_v47, %v9483_v39  ;;  %v5802_v41 = vpop.f32.mrf.mxu2  ;;  %v10111_v36 = vld [vmem:[#allocation15 + $0x2e4] sm:$0xf]  ;;  %v7923_v47 = vld [vmem:[#allocation15 + $0x5c] sm:$0xf0]  ;;  %v8706_v39 = vor.u32 %v10226_v40, %v8705_v45  ;;  %v10366_v40 = vld [vmem:[#allocation15 + $0xad8] sm:$0xf0] }
 0x35f   :  { %v11040_v25 = vadd.f32 %v5802_v41, %v5790_v26  ;;  %v10401_v26 = vld [vmem:[#allocation15 + $0xbf0] sm:$0xf0]  ;;  %v7926_v53 = vor.u32 %v10027_v46, %v7923_v47  ;;  %v10219_v55 = vld [vmem:[#allocation15 + $0x640] sm:$0xf0]  ;;  %v8593_v45 = vld [vmem:[#allocation15 + $0x580] sm:$0xf] }
 0x360   :  { %5955 = vmatpush.bf16.msra.mxu2 %v9486_v60  ;;  %5994 = vmatpush.bf16.msrb.mxu1 %v8370_v61  ;;  %v9406_v62 = vor.u32 %v10401_v26, %v9405_v8  ;;  %v7895_v60 = vld [vmem:[#allocation15 + $0x24] sm:$0xf0]  ;;  %v8678_v2 = vor.u32 %v10219_v55, %v8677_v44  ;;  %v9293_v8 = vld [vmem:[#allocation15 + $0xaf8] sm:$0xf]  ;;  %v10373_v26 = vld [vmem:[#allocation15 + $0xb10] sm:$0xf0] }
 0x361   :  { %v7898_v5 = vor.u32 %v10020_v59, %v7895_v60  ;;  %v8903_v46 = vld [vmem:[#allocation15 + $0x804] sm:$0xf0]  ;;  %v10359_v55 = vld [vmem:[#allocation15 + $0xaa0] sm:$0xf0]  ;;  %v9657_v60 = vld [vmem:[#allocation15 + $0xdd0] sm:$0xf] }
 0x362   :  { %6021 = vmatpush.bf16.msrb.mxu3 %v8790_v13  ;;  %6033 = vmatpush.bf16.msra.mxu0 %v9042_v51  ;;  %v7979_v13 = vld [vmem:[#allocation15 + $0xcc] sm:$0xf0]  ;;  %v10104_v51 = vld [vmem:[#allocation15 + $0x2ac] sm:$0xf]  ;;  %v8565_v47 = vld [vmem:[#allocation15 + $0x548] sm:$0xf]  ;;  %v8906_v59 = vor.u32 %v10272_v18, %v8903_v46 }
 0x363   :  { %v7982_v17 = vor.u32 %v10041_v35, %v7979_v13  ;;  %v8234_v61 = vor.u32 %v10104_v51, %v8231_v21  ;;  %v10286_v13 = vld [vmem:[#allocation15 + $0x85c] sm:$0xf]  ;;  %v9237_v44 = vld [vmem:[#allocation15 + $0xa88] sm:$0xf]  ;;  %v10076_v51 = vld [vmem:[#allocation15 + $0x1cc] sm:$0xf] }
 0x364   :  { %5995 = vmatpush.bf16.msrb.mxu1 %v8342_v20  ;;  %v8119_v21 = vld [vmem:[#allocation15 + $0x1e4] sm:$0xf0]  ;;  %v10443_v46 = vld [vmem:[#allocation15 + $0xd40] sm:$0xf0] }
 0x365   :  { %6022 = vmatmul.bf16.vlgmr.msrb.gmra.mxu3 %v11000_v27 }
 0x366   :  { %6066 = vmatpush.bf16.msra.mxu3 %v8094_v33  ;;  %v9458_v33 = vor.u32 %v10411_v56, %v9455_v0  ;;  %6034 = vmatpush.bf16.msra.mxu0 %v9014_v32  ;;  %v9349_v56 = vld [vmem:[#allocation15 + $0xb68] sm:$0xf]  ;;  %v10293_v0 = vld [vmem:[#allocation15 + $0x894] sm:$0xf]  ;;  %v10212_v32 = vld [vmem:[#allocation15 + $0x608] sm:$0xf0] }
 0x367   :  { %5996 = vmatmul.bf16.vlgmr.msrb.gmra.mxu1 %v10989_v6  ;;  %v9350_v41 = vor.u32 %v10387_v54, %v9349_v56  ;;  %v8990_v57 = vor.u32 %v10293_v0, %v8987_v1  ;;  %v8650_v20 = vor.u32 %v10212_v32, %v8649_v7  ;;  %v10349_v56 = vld [vmem:[#allocation15 + $0xa54] sm:$0xf]  ;;  %v9211_v54 = vld [vmem:[#allocation15 + $0xa6c] sm:$0xf0]  ;;  %v8122_v1 = vor.u32 %v10076_v51, %v8119_v21 }
 0x368   :  { %5956 = vmatpush.bf16.msra.mxu2 %v9458_v33  ;;  %6040 = vmatpush.bf16.msra.mxu1 %v9434_v52  ;;  %v8175_v52 = vld [vmem:[#allocation15 + $0x254] sm:$0xf0]  ;;  %v10181_v0 = vld [vmem:[#allocation15 + $0x514] sm:$0xf]  ;;  %v9238_v7 = vor.u32 %v10359_v55, %v9237_v44  ;;  %v8791_v44 = vld [vmem:[#allocation15 + $0x724] sm:$0xf0] }
 0x369   :  { %6035 = vmatmul.bf16.vlgmr.msra.gmra.mxu0 %v11011_v15  ;;  %v10073_v55 = vld [vmem:[#allocation15 + $0x1b0] sm:$0xf0] }
 0x36a   :  { %6067 = vmatpush.bf16.msra.mxu3 %v8066_v11  ;;  %6079 = vmatpush.bf16.msrb.mxu0 %v8318_v58  ;;  %v5804_v11 = vpop.f32.mrf.mxu2  ;;  %v8959_v58 = vld [vmem:[#allocation15 + $0x874] sm:$0xf0]  ;;  %v5815_v33 = vpop.f32.mrf.mxu3 }
 0x36b   :  { %5957 = vmatmul.bf16.vlgmr.msra.gmra.mxu2 %v11033_v29  ;;  %v11046_v23 = vadd.f32 %v5815_v33, %v11040_v25  ;;  %v8962_v19 = vor.u32 %v10286_v13, %v8959_v58  ;;  %v9294_v25 = vor.u32 %v10373_v26, %v9293_v8  ;;  %v9629_v13 = vld [vmem:[#allocation15 + $0xd98] sm:$0xf]  ;;  %v10457_v58 = vld [vmem:[#allocation15 + $0xdb0] sm:$0xf0]  ;;  %v10174_v33 = vld [vmem:[#allocation15 + $0x4dc] sm:$0xf] }
 0x36c   :  { %6001 = vmatpush.bf16.msrb.mxu2 %v8762_v22  ;;  %6041 = vmatpush.bf16.msra.mxu1 %v9406_v62  ;;  %v10090_v22 = vld [vmem:[#allocation15 + $0x23c] sm:$0xf]  ;;  %v8147_v62 = vld [vmem:[#allocation15 + $0x21c] sm:$0xf0] }
 0x36d   :  { %v8178_v28 = vor.u32 %v10090_v22, %v8175_v52  ;;  %v10258_v22 = vld [vmem:[#allocation15 + $0x77c] sm:$0xf]  ;;  %v8847_v52 = vld [vmem:[#allocation15 + $0x794] sm:$0xf0] }
 0x36e   :  { %6068 = vmatpush.bf16.msra.mxu3 %v8038_v48  ;;  %6080 = vmatpush.bf16.msrb.mxu0 %v8290_v34  ;;  %v8262_v48 = vor.u32 %v10111_v36, %v8259_v37  ;;  %v8931_v34 = vld [vmem:[#allocation15 + $0x83c] sm:$0xf0]  ;;  %v10198_v36 = vld [vmem:[#allocation15 + $0x598] sm:$0xf0] }
 0x36f   :  { %v8934_v37 = vor.u32 %v10279_v30, %v8931_v34  ;;  %v9601_v30 = vld [vmem:[#allocation15 + $0xd60] sm:$0xf]  ;;  %v10450_v34 = vld [vmem:[#allocation15 + $0xd78] sm:$0xf0] }
 0x370   :  { %6002 = vmatpush.bf16.msrb.mxu2 %v8734_v38  ;;  %6042 = vmatpush.bf16.msra.mxu1 %v9378_v49  ;;  %v10083_v38 = vld [vmem:[#allocation15 + $0x204] sm:$0xf]  ;;  %v8594_v49 = vor.u32 %v10198_v36, %v8593_v45  ;;  %v9602_v36 = vor.u32 %v10450_v34, %v9601_v30  ;;  %v9489_v34 = vld [vmem:[#allocation15 + $0xc80] sm:$0xf] }
 0x371   :  { %v8150_v43 = vor.u32 %v10083_v38, %v8147_v62  ;;  %v8483_v38 = vld [vmem:[#allocation15 + $0x4bc] sm:$0xf0]  ;;  %v10251_v62 = vld [vmem:[#allocation15 + $0x744] sm:$0xf] }
 0x372   :  { %6069 = vmatpush.bf16.msra.mxu3 %v8010_v3  ;;  %6081 = vmatpush.bf16.msrb.mxu0 %v8262_v48  ;;  %v10097_v3 = vld [vmem:[#allocation15 + $0x274] sm:$0xf]  ;;  %v10191_v48 = vld [vmem:[#allocation15 + $0x560] sm:$0xf0] }
 0x373   :  { %v8206_v35 = vor.u32 %v10097_v3, %v8203_v4  ;;  %v8875_v3 = vld [vmem:[#allocation15 + $0x7cc] sm:$0xf0]  ;;  %v8566_v4 = vor.u32 %v10191_v48, %v8565_v47  ;;  %v10160_v47 = vld [vmem:[#allocation15 + $0x46c] sm:$0xf] }
 0x374   :  { %6003 = vmatpush.bf16.msrb.mxu2 %v8706_v39  ;;  %6043 = vmatpush.bf16.msra.mxu1 %v9350_v41  ;;  %v5817_v39 = vpop.f32.mrf.mxu3  ;;  %v10265_v41 = vld [vmem:[#allocation15 + $0x7b4] sm:$0xf] }
 0x375   :  { %v8455_v39 = vld [vmem:[#allocation15 + $0x484] sm:$0xf0] }
 0x376   :  { %6070 = vmatpush.bf16.msra.mxu3 %v7982_v17  ;;  %6082 = vmatpush.bf16.msrb.mxu0 %v8234_v61  ;;  %v10205_v17 = vld [vmem:[#allocation15 + $0x5d0] sm:$0xf0]  ;;  %v10464_v61 = vld [vmem:[#allocation15 + $0xde8] sm:$0xf0] }
 0x377   :  { %v8622_v11 = vor.u32 %v10205_v17, %v8621_v12  ;;  %v9658_v32 = vor.u32 %v10464_v61, %v9657_v60  ;;  %v9630_v12 = vor.u32 %v10457_v58, %v9629_v13  ;;  %v10335_v17 = vld [vmem:[#allocation15 + $0x9e4] sm:$0xf]  ;;  %v8458_v61 = vor.u32 %v10160_v47, %v8455_v39  ;;  %v10429_v13 = vld [vmem:[#allocation15 + $0xcd0] sm:$0xf0]  ;;  %v9015_v47 = vld [vmem:[#allocation15 + $0x8e4] sm:$0xf0] }
 0x378   :  { %6004 = vmatpush.bf16.msrb.mxu2 %v8678_v2  ;;  %6044 = vmatpush.bf16.msra.mxu1 %v9322_v24  ;;  %v8539_v2 = vld [vmem:[#allocation15 + $0x52c] sm:$0xf0]  ;;  %v8343_v39 = vld [vmem:[#allocation15 + $0x3a4] sm:$0xf0] }
 0x379   :  { %v8542_v10 = vor.u32 %v10181_v0, %v8539_v2  ;;  %v10436_v2 = vld [vmem:[#allocation15 + $0xd08] sm:$0xf0] }
 0x37a   :  { %6071 = vmatpush.bf16.msra.mxu3 %v7954_v42  ;;  %6083 = vmatpush.bf16.msrb.mxu0 %v8206_v35  ;;  %v9265_v42 = vld [vmem:[#allocation15 + $0xac0] sm:$0xf]  ;;  %v8878_v35 = vor.u32 %v10265_v41, %v8875_v3  ;;  %v10153_v3 = vld [vmem:[#allocation15 + $0x434] sm:$0xf] }
 0x37c   :  { %6005 = vmatpush.bf16.msrb.mxu2 %v8650_v20  ;;  %6045 = vmatpush.bf16.msra.mxu1 %v9294_v25  ;;  %v8511_v20 = vld [vmem:[#allocation15 + $0x4f4] sm:$0xf0]  ;;  %v8819_v25 = vld [vmem:[#allocation15 + $0x75c] sm:$0xf0] }
 0x37d   :  { %v8514_v26 = vor.u32 %v10174_v33, %v8511_v20  ;;  %v8822_v18 = vor.u32 %v10251_v62, %v8819_v25  ;;  %v10146_v20 = vld [vmem:[#allocation15 + $0x3fc] sm:$0xf]  ;;  %v10139_v62 = vld [vmem:[#allocation15 + $0x3c4] sm:$0xf]  ;;  %v8371_v25 = vld [vmem:[#allocation15 + $0x3dc] sm:$0xf0] }
 0x37e   :  { %6072 = vmatpush.bf16.msra.mxu3 %v7926_v53  ;;  %6084 = vmatpush.bf16.msrb.mxu0 %v8178_v28  ;;  %v9266_v53 = vor.u32 %v10366_v40, %v9265_v42  ;;  %v8850_v28 = vor.u32 %v10258_v22, %v8847_v52  ;;  %v9127_v42 = vld [vmem:[#allocation15 + $0x9c4] sm:$0xf0]  ;;  %v8399_v22 = vld [vmem:[#allocation15 + $0x414] sm:$0xf0] }
 0x37f   :  { %v8402_v30 = vor.u32 %v10146_v20, %v8399_v22  ;;  %v8265_v20 = vld [vmem:[#allocation15 + $0x2e8] sm:$0xf]  ;;  %v10115_v22 = vld [vmem:[#allocation15 + $0x300] sm:$0xf0] }
 0x380   :  { %6006 = vmatpush.bf16.msrb.mxu2 %v8622_v11  ;;  %6046 = vmatpush.bf16.msra.mxu1 %v9266_v53  ;;  %v10167_v11 = vld [vmem:[#allocation15 + $0x4a4] sm:$0xf]  ;;  %v8097_v53 = vld [vmem:[#allocation15 + $0x198] sm:$0xf] }
 0x381   :  { %v8486_v40 = vor.u32 %v10167_v11, %v8483_v38  ;;  %v8098_v41 = vor.u32 %v10073_v55, %v8097_v53  ;;  %v10422_v11 = vld [vmem:[#allocation15 + $0xc98] sm:$0xf0]  ;;  %v10237_v55 = vld [vmem:[#allocation15 + $0x6d4] sm:$0xf] }
 0x382   :  { %6073 = vmatpush.bf16.msra.mxu3 %v7898_v5  ;;  %6085 = vmatpush.bf16.msrb.mxu0 %v8150_v43  ;;  %v9214_v5 = vor.u32 %v10349_v56, %v9211_v54  ;;  %v9573_v43 = vld [vmem:[#allocation15 + $0xd28] sm:$0xf]  ;;  %v10321_v54 = vld [vmem:[#allocation15 + $0x974] sm:$0xf] }
 0x383   :  { %v9574_v56 = vor.u32 %v10443_v46, %v9573_v43  ;;  %v10132_v43 = vld [vmem:[#allocation15 + $0x38c] sm:$0xf] }
 0x384   :  { %6007 = vmatpush.bf16.msrb.mxu2 %v8594_v49  ;;  %6047 = vmatpush.bf16.msra.mxu1 %v9238_v7  ;;  %v5828_v48 = vpop.f32.mrf.mxu0  ;;  %v10244_v49 = vld [vmem:[#allocation15 + $0x70c] sm:$0xf]  ;;  %v10066_v7 = vld [vmem:[#allocation15 + $0x178] sm:$0xf0] }
 0x385   :  { %6074 = vmatmul.bf16.vlgmr.msra.gmra.mxu3 %v10971_v63  ;;  %v11055_v51 = vadd.f32 %v5828_v48, %v11046_v23  ;;  %v8794_v0 = vor.u32 %v10244_v49, %v8791_v44  ;;  %v10300_v46 = vld [vmem:[#allocation15 + $0x8cc] sm:$0xf]  ;;  %v8374_v48 = vor.u32 %v10139_v62, %v8371_v25  ;;  %v8321_v49 = vld [vmem:[#allocation15 + $0x358] sm:$0xf]  ;;  %v10129_v44 = vld [vmem:[#allocation15 + $0x370] sm:$0xf0] }
 0x386   :  { %6118 = vmatpush.bf16.msrb.mxu3 %v8990_v57  ;;  %v10342_v57 = vld [vmem:[#allocation15 + $0xa1c] sm:$0xf]  ;;  %6086 = vmatpush.bf16.msrb.mxu0 %v8122_v1  ;;  %v9545_v1 = vld [vmem:[#allocation15 + $0xcf0] sm:$0xf] }
 0x387   :  { %v9186_v24 = vor.u32 %v10342_v57, %v9183_v9  ;;  %6048 = vmatmul.bf16.vlgmr.msra.gmra.mxu1 %v11020_v50  ;;  %v10314_v57 = vld [vmem:[#allocation15 + $0x93c] sm:$0xf]  ;;  %v9071_v9 = vld [vmem:[#allocation15 + $0x954] sm:$0xf0]  ;;  %v8237_v25 = vld [vmem:[#allocation15 + $0x2b0] sm:$0xf] }
 0x388   :  { %6008 = vmatpush.bf16.msrb.mxu2 %v8566_v4  ;;  %6092 = vmatpush.bf16.msrb.mxu1 %v8542_v10  ;;  %v11049_v8 = vpop.f32.mrf.mxu3  ;;  %v8427_v4 = vld [vmem:[#allocation15 + $0x44c] sm:$0xf0]  ;;  %v9074_v52 = vor.u32 %v10314_v57, %v9071_v9  ;;  %v8735_v57 = vld [vmem:[#allocation15 + $0x6b4] sm:$0xf0]  ;;  %v10398_v9 = vld [vmem:[#allocation15 + $0xbdc] sm:$0xf] }
 0x389   :  { %6087 = vmatmul.bf16.vlgmr.msrb.gmra.mxu0 %v10978_v16  ;;  %v8430_v10 = vor.u32 %v10153_v3, %v8427_v4  ;;  %v8293_v4 = vld [vmem:[#allocation15 + $0x320] sm:$0xf] }
 0x38a   :  { %6119 = vmatpush.bf16.msrb.mxu3 %v8962_v19  ;;  %6131 = vmatpush.bf16.msra.mxu0 %v9214_v5  ;;  %v9155_v19 = vld [vmem:[#allocation15 + $0x9fc] sm:$0xf0] }
 0x38b   :  { %6009 = vmatmul.bf16.vlgmr.msrb.gmra.mxu2 %v10992_v31  ;;  %v9158_v45 = vor.u32 %v10335_v17, %v9155_v19  ;;  %v8069_v5 = vld [vmem:[#allocation15 + $0x160] sm:$0xf]  ;;  %v10307_v19 = vld [vmem:[#allocation15 + $0x904] sm:$0xf] }
 0x38c   :  { %6053 = vmatpush.bf16.msra.mxu2 %v9658_v32  ;;  %6093 = vmatpush.bf16.msrb.mxu1 %v8514_v26  ;;  %v9546_v32 = vor.u32 %v10436_v2, %v9545_v1  ;;  %v5830_v58 = vpop.f32.mrf.mxu0  ;;  %v8070_v33 = vor.u32 %v10066_v7, %v8069_v5  ;;  %v9043_v26 = vld [vmem:[#allocation15 + $0x91c] sm:$0xf0]  ;;  %v10045_v1 = vld [vmem:[#allocation15 + $0xd0] sm:$0xf0]  ;;  %v8322_v2 = vor.u32 %v10129_v44, %v8321_v49 }
 0x38d   :  { %v10297_v49 = vld [vmem:[#allocation15 + $0x8b0] sm:$0xf0] }
 0x38e   :  { %6120 = vmatpush.bf16.msrb.mxu3 %v8934_v37  ;;  %6132 = vmatpush.bf16.msra.mxu0 %v9186_v24  ;;  %v10328_v37 = vld [vmem:[#allocation15 + $0x9ac] sm:$0xf]  ;;  %v8041_v24 = vld [vmem:[#allocation15 + $0x128] sm:$0xf] }
 0x38f   :  { %v9130_v21 = vor.u32 %v10328_v37, %v9127_v42  ;;  %v10052_v37 = vld [vmem:[#allocation15 + $0x108] sm:$0xf0]  ;;  %v9461_v42 = vld [vmem:[#allocation15 + $0xc48] sm:$0xf] }
 0x390   :  { %6054 = vmatpush.bf16.msra.mxu2 %v9630_v12  ;;  %6094 = vmatpush.bf16.msrb.mxu1 %v8486_v40  ;;  %v5869_v60 = vpop.f32.mrf.mxu3  ;;  %v10059_v12 = vld [vmem:[#allocation15 + $0x140] sm:$0xf0] }
 0x391   :  { %v8042_v38 = vor.u32 %v10059_v12, %v8041_v24  ;;  %v10415_v40 = vld [vmem:[#allocation15 + $0xc60] sm:$0xf0]  ;;  %v9018_v60 = vor.u32 %v10300_v46, %v9015_v47  ;;  %v7901_v46 = vld [vmem:[#allocation15 + $0x10] sm:$0xf]  ;;  %v10024_v47 = vld [vmem:[#allocation15 + $0x28] sm:$0xf0] }
 0x392   :  { %6121 = vmatpush.bf16.msrb.mxu3 %v8906_v59  ;;  %6133 = vmatpush.bf16.msra.mxu0 %v9158_v45  ;;  %v9099_v59 = vld [vmem:[#allocation15 + $0x98c] sm:$0xf0] }
 0x393   :  { %v9102_v23 = vor.u32 %v10321_v54, %v9099_v59  ;;  %v8013_v45 = vld [vmem:[#allocation15 + $0xf0] sm:$0xf]  ;;  %v10405_v54 = vld [vmem:[#allocation15 + $0xc14] sm:$0xf] }
 0x394   :  { %6055 = vmatpush.bf16.msra.mxu2 %v9602_v36  ;;  %6095 = vmatpush.bf16.msrb.mxu1 %v8458_v61  ;;  %v9046_v36 = vor.u32 %v10307_v19, %v9043_v26  ;;  %v8014_v53 = vor.u32 %v10052_v37, %v8013_v45  ;;  %v9435_v61 = vld [vmem:[#allocation15 + $0xc2c] sm:$0xf0]  ;;  %v10223_v19 = vld [vmem:[#allocation15 + $0x664] sm:$0xf]  ;;  %v8707_v26 = vld [vmem:[#allocation15 + $0x67c] sm:$0xf0] }
 0x395   :  { %v9438_v5 = vor.u32 %v10405_v54, %v9435_v61  ;;  %v8710_v62 = vor.u32 %v10223_v19, %v8707_v26  ;;  %v10108_v45 = vld [vmem:[#allocation15 + $0x2c8] sm:$0xf0]  ;;  %v7902_v61 = vor.u32 %v10024_v47, %v7901_v46  ;;  %v9239_v47 = vld [vmem:[#allocation15 + $0xaa4] sm:$0xf0] }
 0x396   :  { %6122 = vmatpush.bf16.msrb.mxu3 %v8878_v35  ;;  %6134 = vmatpush.bf16.msra.mxu0 %v9130_v21  ;;  %v9517_v35 = vld [vmem:[#allocation15 + $0xcb8] sm:$0xf]  ;;  %v5880_v21 = vpop.f32.mrf.mxu0 }
 0x397   :  { %v9518_v17 = vor.u32 %v10429_v13, %v9517_v35  ;;  %v7957_v35 = vld [vmem:[#allocation15 + $0x80] sm:$0xf]  ;;  %v10038_v13 = vld [vmem:[#allocation15 + $0x98] sm:$0xf0] }
 0x398   :  { %6056 = vmatpush.bf16.msra.mxu2 %v9574_v56  ;;  %6096 = vmatpush.bf16.msrb.mxu1 %v8430_v10  ;;  %v8763_v56 = vld [vmem:[#allocation15 + $0x6ec] sm:$0xf0]  ;;  %v9407_v10 = vld [vmem:[#allocation15 + $0xbf4] sm:$0xf0] }
 0x399   :  { %v8766_v3 = vor.u32 %v10237_v55, %v8763_v56  ;;  %v9410_v12 = vor.u32 %v10398_v9, %v9407_v10  ;;  %v10101_v55 = vld [vmem:[#allocation15 + $0x290] sm:$0xf0]  ;;  %v8623_v9 = vld [vmem:[#allocation15 + $0x5d4] sm:$0xf0] }
 0x39a   :  { %6123 = vmatpush.bf16.msrb.mxu3 %v8850_v28  ;;  %6135 = vmatpush.bf16.msra.mxu0 %v9102_v23  ;;  %v3437_v28 = vperm.slane %v11030_v14, 1  ;;  %v10122_v23 = vld [vmem:[#allocation15 + $0x338] sm:$0xf0] }
 0x39b   :  { %v8294_v58 = vor.u32 %v10122_v23, %v8293_v4  ;;  %v8965_v4 = vld [vmem:[#allocation15 + $0x860] sm:$0xf] }
 0x39c   :  { %6057 = vmatpush.bf16.msra.mxu2 %v9546_v32  ;;  %v5868_v14 = vadd.f32 %v11049_v8, %v3437_v28  ;;  %6097 = vmatpush.bf16.msrb.mxu1 %v8402_v30  ;;  %v9462_v8 = vor.u32 %v10415_v40, %v9461_v42  ;;  %v10230_v32 = vld [vmem:[#allocation15 + $0x69c] sm:$0xf]  ;;  %v10391_v28 = vld [vmem:[#allocation15 + $0xba4] sm:$0xf]  ;;  %v9379_v30 = vld [vmem:[#allocation15 + $0xbbc] sm:$0xf0] }
 0x39d   :  { %v10216_v42 = vld [vmem:[#allocation15 + $0x62c] sm:$0xf]  ;;  %v8679_v40 = vld [vmem:[#allocation15 + $0x644] sm:$0xf0] }
 0x39e   :  { %6124 = vmatpush.bf16.msrb.mxu3 %v8822_v18  ;;  %6136 = vmatpush.bf16.msra.mxu0 %v9074_v52  ;;  %v9490_v18 = vor.u32 %v10422_v11, %v9489_v34  ;;  %v11060_v59 = vadd.f32 %v5880_v21, %v5868_v14  ;;  %v5882_v24 = vpop.f32.mrf.mxu0  ;;  %v7929_v34 = vld [vmem:[#allocation15 + $0x48] sm:$0xf]  ;;  %v10031_v11 = vld [vmem:[#allocation15 + $0x60] sm:$0xf0]  ;;  %v8682_v21 = vor.u32 %v10216_v42, %v8679_v40  ;;  %v10356_v40 = vld [vmem:[#allocation15 + $0xa8c] sm:$0xf] }
 0x39f   :  { %v7930_v37 = vor.u32 %v10031_v11, %v7929_v34  ;;  %v10363_v11 = vld [vmem:[#allocation15 + $0xac4] sm:$0xf] }
 0x3a0   :  { %6058 = vmatpush.bf16.msra.mxu2 %v9518_v17  ;;  %6098 = vmatpush.bf16.msrb.mxu1 %v8374_v48  ;;  %v7958_v17 = vor.u32 %v10038_v13, %v7957_v35  ;;  %v8238_v48 = vor.u32 %v10108_v45, %v8237_v25  ;;  %v10370_v35 = vld [vmem:[#allocation15 + $0xafc] sm:$0xf]  ;;  %v9295_v13 = vld [vmem:[#allocation15 + $0xb14] sm:$0xf0]  ;;  %v10276_v45 = vld [vmem:[#allocation15 + $0x808] sm:$0xf0] }
 0x3a1   :  { %v9298_v26 = vor.u32 %v10370_v35, %v9295_v13 }
 0x3a2   :  { %6125 = vmatpush.bf16.msrb.mxu3 %v8794_v0  ;;  %6137 = vmatpush.bf16.msra.mxu0 %v9046_v36  ;;  %v7985_v0 = vld [vmem:[#allocation15 + $0xb8] sm:$0xf]  ;;  %v9382_v36 = vor.u32 %v10391_v28, %v9379_v30  ;;  %v10195_v28 = vld [vmem:[#allocation15 + $0x584] sm:$0xf]  ;;  %v8595_v30 = vld [vmem:[#allocation15 + $0x59c] sm:$0xf0] }
 0x3a3   :  { %v7986_v7 = vor.u32 %v10045_v1, %v7985_v0  ;;  %v10209_v0 = vld [vmem:[#allocation15 + $0x5f4] sm:$0xf]  ;;  %v8651_v1 = vld [vmem:[#allocation15 + $0x60c] sm:$0xf0]  ;;  %v8598_v42 = vor.u32 %v10195_v28, %v8595_v30  ;;  %v10171_v28 = vld [vmem:[#allocation15 + $0x4c0] sm:$0xf0] }
 0x3a4   :  { %6059 = vmatpush.bf16.msra.mxu2 %v9490_v18  ;;  %v10384_v18 = vld [vmem:[#allocation15 + $0xb6c] sm:$0xf]  ;;  %v5841_v14 = vpop.f32.mrf.mxu1  ;;  %v8654_v23 = vor.u32 %v10209_v0, %v8651_v1  ;;  %v10269_v0 = vld [vmem:[#allocation15 + $0x7d0] sm:$0xf0]  ;;  %v8825_v30 = vld [vmem:[#allocation15 + $0x748] sm:$0xf] }
 0x3a5   :  { %6126 = vmatmul.bf16.vlgmr.msrb.gmra.mxu3 %v11000_v27  ;;  %v11068_v44 = vadd.f32 %v5841_v14, %v11055_v51  ;;  %v10290_v51 = vld [vmem:[#allocation15 + $0x878] sm:$0xf0]  ;;  %v9217_v14 = vld [vmem:[#allocation15 + $0xa58] sm:$0xf] }
 0x3a6   :  { %6170 = vmatpush.bf16.msra.mxu3 %v8098_v41  ;;  %v8346_v41 = vor.u32 %v10132_v43, %v8343_v39  ;;  %6138 = vmatpush.bf16.msra.mxu0 %v9018_v60  ;;  %v9351_v43 = vld [vmem:[#allocation15 + $0xb84] sm:$0xf0]  ;;  %v8993_v39 = vld [vmem:[#allocation15 + $0x898] sm:$0xf]  ;;  %v11070_v54 = vpop.f32.mrf.mxu0  ;;  %v8966_v10 = vor.u32 %v10290_v51, %v8965_v4  ;;  %v10346_v4 = vld [vmem:[#allocation15 + $0xa38] sm:$0xf0] }
 0x3a7   :  { %v9354_v60 = vor.u32 %v10384_v18, %v9351_v43  ;;  %v8125_v18 = vld [vmem:[#allocation15 + $0x1d0] sm:$0xf]  ;;  %v10080_v43 = vld [vmem:[#allocation15 + $0x1e8] sm:$0xf0] }
 0x3a8   :  { %6060 = vmatpush.bf16.msra.mxu2 %v9462_v8  ;;  %6099 = vmatpush.bf16.msrb.mxu1 %v8346_v41  ;;  %v11062_v52 = vpop.f32.mrf.mxu3  ;;  %v8994_v8 = vor.u32 %v10297_v49, %v8993_v39  ;;  %v9323_v41 = vld [vmem:[#allocation15 + $0xb4c] sm:$0xf0]  ;;  %v10461_v49 = vld [vmem:[#allocation15 + $0xdd4] sm:$0xf] }
 0x3a9   :  { %6139 = vmatmul.bf16.vlgmr.msra.gmra.mxu0 %v11011_v15 }
 0x3aa   :  { %6171 = vmatpush.bf16.msra.mxu3 %v8070_v33  ;;  %6183 = vmatpush.bf16.msrb.mxu0 %v8322_v2  ;;  %v8738_v33 = vor.u32 %v10230_v32, %v8735_v57  ;;  %v10377_v2 = vld [vmem:[#allocation15 + $0xb34] sm:$0xf]  ;;  %v10202_v57 = vld [vmem:[#allocation15 + $0x5bc] sm:$0xf] }
 0x3ab   :  { %6061 = vmatmul.bf16.vlgmr.msra.gmra.mxu2 %v11033_v29  ;;  %6100 = vmatmul.bf16.vlgmr.msrb.gmra.mxu1 %v10989_v6  ;;  %v9326_v32 = vor.u32 %v10377_v2, %v9323_v41  ;;  %v8626_v24 = vor.u32 %v10202_v57, %v8623_v9  ;;  %v9242_v2 = vor.u32 %v10356_v40, %v9239_v47  ;;  %v10178_v57 = vld [vmem:[#allocation15 + $0x4f8] sm:$0xf0]  ;;  %v8853_v9 = vld [vmem:[#allocation15 + $0x780] sm:$0xf]  ;;  %v10440_v40 = vld [vmem:[#allocation15 + $0xd2c] sm:$0xf] }
 0x3ac   :  { %6105 = vmatpush.bf16.msrb.mxu2 %v8766_v3  ;;  %6144 = vmatpush.bf16.msra.mxu1 %v9438_v5  ;;  %v8181_v5 = vld [vmem:[#allocation15 + $0x240] sm:$0xf]  ;;  %v8797_v47 = vld [vmem:[#allocation15 + $0x710] sm:$0xf] }
 0x3ae   :  { %6172 = vmatpush.bf16.msra.mxu3 %v8042_v38  ;;  %6184 = vmatpush.bf16.msrb.mxu0 %v8294_v58  ;;  %v8266_v38 = vor.u32 %v10115_v22, %v8265_v20  ;;  %v5843_v58 = vpop.f32.mrf.mxu1  ;;  %v8937_v20 = vld [vmem:[#allocation15 + $0x828] sm:$0xf]  ;;  %v10283_v22 = vld [vmem:[#allocation15 + $0x840] sm:$0xf0]  ;;  %v5934_v19 = vpop.f32.mrf.mxu0 }
 0x3af   :  { %v8938_v34 = vor.u32 %v10283_v22, %v8937_v20  ;;  %v9161_v58 = vld [vmem:[#allocation15 + $0x9e8] sm:$0xf] }
 0x3b0   :  { %6106 = vmatpush.bf16.msrb.mxu2 %v8738_v33  ;;  %6145 = vmatpush.bf16.msra.mxu1 %v9410_v12  ;;  %v5921_v56 = vpop.f32.mrf.mxu3  ;;  %v8153_v12 = vld [vmem:[#allocation15 + $0x208] sm:$0xf] }
 0x3b1   :  { %v8126_v56 = vor.u32 %v10080_v43, %v8125_v18  ;;  %v8489_v19 = vld [vmem:[#allocation15 + $0x4a8] sm:$0xf]  ;;  %v8461_v43 = vld [vmem:[#allocation15 + $0x470] sm:$0xf] }
 0x3b2   :  { %6173 = vmatpush.bf16.msra.mxu3 %v8014_v53  ;;  %6185 = vmatpush.bf16.msrb.mxu0 %v8266_v38  ;;  %v8209_v53 = vld [vmem:[#allocation15 + $0x278] sm:$0xf]  ;;  %v9267_v38 = vld [vmem:[#allocation15 + $0xadc] sm:$0xf0]  ;;  %v9575_v18 = vld [vmem:[#allocation15 + $0xd44] sm:$0xf0] }
 0x3b3   :  { %v8210_v3 = vor.u32 %v10101_v55, %v8209_v53  ;;  %v9270_v46 = vor.u32 %v10363_v11, %v9267_v38  ;;  %v8545_v53 = vld [vmem:[#allocation15 + $0x518] sm:$0xf]  ;;  %v11078_v38 = vld [vmem:[#allocation16] sm:$0xff] }
 0x3b4   :  { %6107 = vmatpush.bf16.msrb.mxu2 %v8710_v62  ;;  %6146 = vmatpush.bf16.msra.mxu1 %v9382_v36  ;;  %v8909_v62 = vld [vmem:[#allocation15 + $0x7f0] sm:$0xf]  ;;  %v10188_v36 = vld [vmem:[#allocation15 + $0x54c] sm:$0xf] }
 0x3b5   :  { %v8910_v39 = vor.u32 %v10276_v45, %v8909_v62  ;;  %v3438_v62 = vperm.slane %v11078_v38, 2  ;;  %v9133_v45 = vld [vmem:[#allocation15 + $0x9b0] sm:$0xf] }
 0x3b6   :  { %6174 = vmatpush.bf16.msra.mxu3 %v7986_v7  ;;  %6186 = vmatpush.bf16.msrb.mxu0 %v8238_v48  ;;  %v10094_v7 = vld [vmem:[#allocation15 + $0x258] sm:$0xf0]  ;;  %v10353_v48 = vld [vmem:[#allocation15 + $0xa70] sm:$0xf0]  ;;  %v11073_v55 = vpop.f32.mrf.mxu1 }
 0x3b7   :  { %v8182_v33 = vor.u32 %v10094_v7, %v8181_v5  ;;  %v10454_v5 = vld [vmem:[#allocation15 + $0xd9c] sm:$0xf]  ;;  %v9631_v7 = vld [vmem:[#allocation15 + $0xdb4] sm:$0xf0] }
 0x3b8   :  { %6108 = vmatpush.bf16.msrb.mxu2 %v8682_v21  ;;  %6147 = vmatpush.bf16.msra.mxu1 %v9354_v60  ;;  %v9659_v21 = vld [vmem:[#allocation15 + $0xdec] sm:$0xf0]  ;;  %v10185_v60 = vld [vmem:[#allocation15 + $0x530] sm:$0xf0]  ;;  %v9634_v13 = vor.u32 %v10454_v5, %v9631_v7 }
 0x3b9   :  { %v9662_v41 = vor.u32 %v10461_v49, %v9659_v21  ;;  %v8546_v51 = vor.u32 %v10185_v60, %v8545_v53  ;;  %v8099_v49 = vld [vmem:[#allocation15 + $0x1b4] sm:$0xf0]  ;;  %v9578_v21 = vor.u32 %v10440_v40, %v9575_v18  ;;  %v10143_v40 = vld [vmem:[#allocation15 + $0x3e0] sm:$0xf0]  ;;  %v10049_v18 = vld [vmem:[#allocation15 + $0xf4] sm:$0xf] }
 0x3ba   :  { %6175 = vmatpush.bf16.msra.mxu3 %v7958_v17  ;;  %6187 = vmatpush.bf16.msrb.mxu0 %v8210_v3  ;;  %v10087_v17 = vld [vmem:[#allocation15 + $0x220] sm:$0xf0]  ;;  %v9189_v3 = vld [vmem:[#allocation15 + $0xa20] sm:$0xf]  ;;  %v9105_v53 = vld [vmem:[#allocation15 + $0x978] sm:$0xf] }
 0x3bb   :  { %v8154_v25 = vor.u32 %v10087_v17, %v8153_v12  ;;  %v9190_v35 = vor.u32 %v10346_v4, %v9189_v3  ;;  %v10447_v12 = vld [vmem:[#allocation15 + $0xd64] sm:$0xf]  ;;  %v9603_v17 = vld [vmem:[#allocation15 + $0xd7c] sm:$0xf0] }
 0x3bc   :  { %6109 = vmatpush.bf16.msrb.mxu2 %v8654_v23  ;;  %6148 = vmatpush.bf16.msra.mxu1 %v9326_v32  ;;  %v8517_v32 = vld [vmem:[#allocation15 + $0x4e0] sm:$0xf] }
 0x3bd   :  { %v8518_v22 = vor.u32 %v10178_v57, %v8517_v32  ;;  %v10063_v32 = vld [vmem:[#allocation15 + $0x164] sm:$0xf]  ;;  %v8071_v57 = vld [vmem:[#allocation15 + $0x17c] sm:$0xf0] }
 0x3be   :  { %6176 = vmatpush.bf16.msra.mxu3 %v7930_v37  ;;  %6188 = vmatpush.bf16.msrb.mxu0 %v8182_v33  ;;  %v8567_v37 = vld [vmem:[#allocation15 + $0x564] sm:$0xf0]  ;;  %v10339_v33 = vld [vmem:[#allocation15 + $0xa00] sm:$0xf0] }
 0x3bf   :  { %v8570_v1 = vor.u32 %v10188_v36, %v8567_v37  ;;  %v9162_v11 = vor.u32 %v10339_v33, %v9161_v58  ;;  %v10332_v36 = vld [vmem:[#allocation15 + $0x9c8] sm:$0xf0]  ;;  %v8490_v37 = vor.u32 %v10171_v28, %v8489_v19  ;;  %v10426_v58 = vld [vmem:[#allocation15 + $0xcbc] sm:$0xf]  ;;  %v9519_v33 = vld [vmem:[#allocation15 + $0xcd4] sm:$0xf0] }
 0x3c0   :  { %6110 = vmatpush.bf16.msrb.mxu2 %v8626_v24  ;;  %6149 = vmatpush.bf16.msra.mxu1 %v9298_v26  ;;  %v5895_v26 = vpop.f32.mrf.mxu1  ;;  %v10056_v19 = vld [vmem:[#allocation15 + $0x12c] sm:$0xf]  ;;  %v9522_v28 = vor.u32 %v10426_v58, %v9519_v33 }
 0x3c1   :  { %v8043_v26 = vld [vmem:[#allocation15 + $0x144] sm:$0xf0] }
 0x3c2   :  { %6177 = vmatpush.bf16.msra.mxu3 %v7902_v61  ;;  %6189 = vmatpush.bf16.msrb.mxu0 %v8154_v25  ;;  %v8881_v61 = vld [vmem:[#allocation15 + $0x7b8] sm:$0xf]  ;;  %v9606_v25 = vor.u32 %v10447_v12, %v9603_v17  ;;  %v10150_v12 = vld [vmem:[#allocation15 + $0x418] sm:$0xf0] }
 0x3c3   :  { %v8882_v23 = vor.u32 %v10269_v0, %v8881_v61 }
 0x3c4   :  { %6111 = vmatpush.bf16.msrb.mxu2 %v8598_v42  ;;  %6150 = vmatpush.bf16.msra.mxu1 %v9270_v46  ;;  %v10164_v46 = vld [vmem:[#allocation15 + $0x488] sm:$0xf0] }
 0x3c5   :  { %6178 = vmatmul.bf16.vlgmr.msra.gmra.mxu3 %v10971_v63  ;;  %v8462_v0 = vor.u32 %v10164_v46, %v8461_v43  ;;  %v8015_v46 = vld [vmem:[#allocation15 + $0x10c] sm:$0xf0] }
 0x3c6   :  { %6222 = vmatpush.bf16.msrb.mxu3 %v8994_v8  ;;  %v9218_v8 = vor.u32 %v10353_v48, %v9217_v14  ;;  %6190 = vmatpush.bf16.msrb.mxu0 %v8126_v56  ;;  %v10248_v14 = vld [vmem:[#allocation15 + $0x728] sm:$0xf0]  ;;  %v9134_v48 = vor.u32 %v10332_v36, %v9133_v45  ;;  %v10325_v56 = vld [vmem:[#allocation15 + $0x990] sm:$0xf0] }
 0x3c7   :  { %v9106_v7 = vor.u32 %v10325_v56, %v9105_v53  ;;  %v10136_v56 = vld [vmem:[#allocation15 + $0x3a8] sm:$0xf0] }
 0x3c8   :  { %6112 = vmatpush.bf16.msrb.mxu2 %v8570_v1  ;;  %6151 = vmatpush.bf16.msra.mxu1 %v9242_v2  ;;  %v5971_v20 = vpop.f32.mrf.mxu3  ;;  %v8798_v1 = vor.u32 %v10248_v14, %v8797_v47  ;;  %v9547_v2 = vld [vmem:[#allocation15 + $0xd0c] sm:$0xf0]  ;;  %v11081_v3 = vpop.f32.mrf.mxu1  ;;  %v10412_v47 = vld [vmem:[#allocation15 + $0xc4c] sm:$0xf]  ;;  %v9463_v14 = vld [vmem:[#allocation15 + $0xc64] sm:$0xf0] }
 0x3c9   :  { %6191 = vmatmul.bf16.vlgmr.msrb.gmra.mxu0 %v10978_v16  ;;  %v5972_v60 = vadd.f32 %v5971_v20, %v3438_v62  ;;  %v10419_v62 = vld [vmem:[#allocation15 + $0xc84] sm:$0xf] }
 0x3ca   :  { %6223 = vmatpush.bf16.msrb.mxu3 %v8966_v10  ;;  %v10262_v10 = vld [vmem:[#allocation15 + $0x798] sm:$0xf0]  ;;  %6235 = vmatpush.bf16.msra.mxu0 %v9218_v8  ;;  %v10433_v8 = vld [vmem:[#allocation15 + $0xcf4] sm:$0xf]  ;;  %v11085_v20 = vpop.f32.mrf.mxu2 }
 0x3cb   :  { %v8854_v24 = vor.u32 %v10262_v10, %v8853_v9  ;;  %6113 = vmatmul.bf16.vlgmr.msrb.gmra.mxu2 %v10992_v31  ;;  %6152 = vmatmul.bf16.vlgmr.msra.gmra.mxu1 %v11020_v50  ;;  %v9550_v9 = vor.u32 %v10433_v8, %v9547_v2  ;;  %v9077_v10 = vld [vmem:[#allocation15 + $0x940] sm:$0xf]  ;;  %v8769_v8 = vld [vmem:[#allocation15 + $0x6d8] sm:$0xf]  ;;  %v10241_v2 = vld [vmem:[#allocation15 + $0x6f0] sm:$0xf0] }
 0x3cc   :  { %6157 = vmatpush.bf16.msra.mxu2 %v9662_v41  ;;  %6196 = vmatpush.bf16.msrb.mxu1 %v8546_v51  ;;  %v5984_v41 = vpop.f32.mrf.mxu0  ;;  %v8433_v51 = vld [vmem:[#allocation15 + $0x438] sm:$0xf] }
 0x3cd   :  { %v11083_v5 = vadd.f32 %v5984_v41, %v5972_v60  ;;  %v10126_v60 = vld [vmem:[#allocation15 + $0x35c] sm:$0xf]  ;;  %v9441_v41 = vld [vmem:[#allocation15 + $0xc18] sm:$0xf] }
 0x3ce   :  { %6224 = vmatpush.bf16.msrb.mxu3 %v8938_v34  ;;  %v10255_v34 = vld [vmem:[#allocation15 + $0x760] sm:$0xf0]  ;;  %6236 = vmatpush.bf16.msra.mxu0 %v9190_v35  ;;  %v10318_v35 = vld [vmem:[#allocation15 + $0x958] sm:$0xf0] }
 0x3cf   :  { %v8826_v42 = vor.u32 %v10255_v34, %v8825_v30  ;;  %v9078_v17 = vor.u32 %v10318_v35, %v9077_v10  ;;  %v9049_v30 = vld [vmem:[#allocation15 + $0x908] sm:$0xf]  ;;  %v10311_v34 = vld [vmem:[#allocation15 + $0x920] sm:$0xf0]  ;;  %v8770_v10 = vor.u32 %v10241_v2, %v8769_v8  ;;  %v7903_v8 = vld [vmem:[#allocation15 + $0x2c] sm:$0xf0] }
 0x3d0   :  { %6158 = vmatpush.bf16.msra.mxu2 %v9634_v13  ;;  %6197 = vmatpush.bf16.msrb.mxu1 %v8518_v22  ;;  %v5973_v61 = vpop.f32.mrf.mxu3  ;;  %v8074_v22 = vor.u32 %v10063_v32, %v8071_v57  ;;  %v5947_v36 = vpop.f32.mrf.mxu1  ;;  %v9050_v43 = vor.u32 %v10311_v34, %v9049_v30  ;;  %v9466_v32 = vor.u32 %v10412_v47, %v9463_v14  ;;  %v10119_v35 = vld [vmem:[#allocation15 + $0x324] sm:$0xf] }
 0x3d1   :  { %v8323_v61 = vld [vmem:[#allocation15 + $0x374] sm:$0xf0]  ;;  %v5894_v30 = vadd.f32 %v11073_v55, %v11060_v59  ;;  %v10395_v59 = vld [vmem:[#allocation15 + $0xbc0] sm:$0xf0]  ;;  %v10028_v55 = vld [vmem:[#allocation15 + $0x4c] sm:$0xf] }
 0x3d2   :  { %6225 = vmatpush.bf16.msrb.mxu3 %v8910_v39  ;;  %6237 = vmatpush.bf16.msra.mxu0 %v9162_v11  ;;  %v10070_v39 = vld [vmem:[#allocation15 + $0x19c] sm:$0xf]  ;;  %v8326_v57 = vor.u32 %v10126_v60, %v8323_v61  ;;  %v10220_v60 = vld [vmem:[#allocation15 + $0x648] sm:$0xf0]  ;;  %v9357_v61 = vld [vmem:[#allocation15 + $0xb70] sm:$0xf] }
 0x3d3   :  { %v8102_v4 = vor.u32 %v10070_v39, %v8099_v49  ;;  %v8349_v39 = vld [vmem:[#allocation15 + $0x390] sm:$0xf] }
 0x3d4   :  { %6159 = vmatpush.bf16.msra.mxu2 %v9606_v25  ;;  %6198 = vmatpush.bf16.msrb.mxu1 %v8490_v37  ;;  %v9491_v25 = vld [vmem:[#allocation15 + $0xc9c] sm:$0xf0]  ;;  %v5986_v45 = vpop.f32.mrf.mxu0  ;;  %v8046_v37 = vor.u32 %v10056_v19, %v8043_v26  ;;  %v9021_v49 = vld [vmem:[#allocation15 + $0x8d0] sm:$0xf]  ;;  %v10035_v19 = vld [vmem:[#allocation15 + $0x84] sm:$0xf] }
 0x3d5   :  { %v7959_v26 = vld [vmem:[#allocation15 + $0x9c] sm:$0xf0] }
 0x3d6   :  { %6226 = vmatpush.bf16.msrb.mxu3 %v8882_v23  ;;  %v10157_v23 = vld [vmem:[#allocation15 + $0x450] sm:$0xf0]  ;;  %6238 = vmatpush.bf16.msra.mxu0 %v9134_v48  ;;  %v9494_v48 = vor.u32 %v10419_v62, %v9491_v25  ;;  %v8267_v62 = vld [vmem:[#allocation15 + $0x304] sm:$0xf0] }
 0x3d7   :  { %v8434_v13 = vor.u32 %v10157_v23, %v8433_v51  ;;  %v10409_v51 = vld [vmem:[#allocation15 + $0xc30] sm:$0xf0]  ;;  %v10042_v23 = vld [vmem:[#allocation15 + $0xbc] sm:$0xf] }
 0x3d8   :  { %6160 = vmatpush.bf16.msra.mxu2 %v9578_v21  ;;  %6199 = vmatpush.bf16.msrb.mxu1 %v8462_v0  ;;  %v10304_v21 = vld [vmem:[#allocation15 + $0x8e8] sm:$0xf0]  ;;  %v5856_v0 = vpop.f32.mrf.mxu2  ;;  %v9442_v58 = vor.u32 %v10409_v51, %v9441_v41  ;;  %v10294_v41 = vld [vmem:[#allocation15 + $0x89c] sm:$0xf] }
 0x3d9   :  { %v10388_v0 = vld [vmem:[#allocation15 + $0xb88] sm:$0xf0]  ;;  %v10098_v51 = vld [vmem:[#allocation15 + $0x27c] sm:$0xf] }
 0x3da   :  { %6227 = vmatpush.bf16.msrb.mxu3 %v8854_v24  ;;  %v8405_v24 = vld [vmem:[#allocation15 + $0x400] sm:$0xf]  ;;  %6239 = vmatpush.bf16.msra.mxu0 %v9106_v7  ;;  %v7987_v7 = vld [vmem:[#allocation15 + $0xd4] sm:$0xf0] }
 0x3db   :  { %v8406_v11 = vor.u32 %v10150_v12, %v8405_v24  ;;  %v7990_v33 = vor.u32 %v10042_v23, %v7987_v7  ;;  %v10234_v24 = vld [vmem:[#allocation15 + $0x6b8] sm:$0xf0]  ;;  %v9413_v12 = vld [vmem:[#allocation15 + $0xbe0] sm:$0xf]  ;;  %v8211_v23 = vld [vmem:[#allocation15 + $0x294] sm:$0xf0] }
 0x3dc   :  { %6161 = vmatpush.bf16.msra.mxu2 %v9550_v9  ;;  %6200 = vmatpush.bf16.msrb.mxu1 %v8434_v13  ;;  %v8350_v9 = vor.u32 %v10136_v56, %v8349_v39  ;;  %v8295_v13 = vld [vmem:[#allocation15 + $0x33c] sm:$0xf0]  ;;  %v10105_v39 = vld [vmem:[#allocation15 + $0x2b4] sm:$0xf]  ;;  %v8685_v56 = vld [vmem:[#allocation15 + $0x630] sm:$0xf] }
 0x3de   :  { %6228 = vmatpush.bf16.msrb.mxu3 %v8826_v42  ;;  %v8377_v42 = vld [vmem:[#allocation15 + $0x3c8] sm:$0xf]  ;;  %6240 = vmatpush.bf16.msra.mxu0 %v9078_v17  ;;  %v10402_v17 = vld [vmem:[#allocation15 + $0xbf8] sm:$0xf0] }
 0x3df   :  { %v8378_v53 = vor.u32 %v10143_v40, %v8377_v42  ;;  %v9414_v36 = vor.u32 %v10402_v17, %v9413_v12  ;;  %v8713_v42 = vld [vmem:[#allocation15 + $0x668] sm:$0xf]  ;;  %v10227_v40 = vld [vmem:[#allocation15 + $0x680] sm:$0xf0]  ;;  %v8214_v12 = vor.u32 %v10098_v51, %v8211_v23  ;;  %v10360_v23 = vld [vmem:[#allocation15 + $0xaa8] sm:$0xf0] }
 0x3e0   :  { %6162 = vmatpush.bf16.msra.mxu2 %v9522_v28  ;;  %6201 = vmatpush.bf16.msrb.mxu1 %v8406_v11  ;;  %v8298_v28 = vor.u32 %v10119_v35, %v8295_v13  ;;  %v10112_v11 = vld [vmem:[#allocation15 + $0x2ec] sm:$0xf]  ;;  %v5906_v45 = vpop.f32.mrf.mxu2  ;;  %v10213_v35 = vld [vmem:[#allocation15 + $0x610] sm:$0xf0]  ;;  %v10287_v17 = vld [vmem:[#allocation15 + $0x864] sm:$0xf] }
 0x3e1   :  { %v8270_v47 = vor.u32 %v10112_v11, %v8267_v62  ;;  %v8183_v11 = vld [vmem:[#allocation15 + $0x25c] sm:$0xf0] }
 0x3e2   :  { %6229 = vmatpush.bf16.msrb.mxu3 %v8798_v1  ;;  %v8018_v1 = vor.u32 %v10049_v18, %v8015_v46  ;;  %6241 = vmatpush.bf16.msra.mxu0 %v9050_v43  ;;  %v9385_v18 = vld [vmem:[#allocation15 + $0xba8] sm:$0xf]  ;;  %v5907_v43 = vadd.f32 %v5906_v45, %v5894_v30  ;;  %v8629_v45 = vld [vmem:[#allocation15 + $0x5c0] sm:$0xf] }
 0x3e3   :  { %v7931_v46 = vld [vmem:[#allocation15 + $0x64] sm:$0xf0] }
 0x3e4   :  { %6163 = vmatpush.bf16.msra.mxu2 %v9494_v48  ;;  %6202 = vmatpush.bf16.msrb.mxu1 %v8378_v53  ;;  %v5920_v14 = vadd.f32 %v11062_v52, %v5907_v43  ;;  %v8714_v48 = vor.u32 %v10227_v40, %v8713_v42  ;;  %v7934_v53 = vor.u32 %v10028_v55, %v7931_v46  ;;  %v9301_v42 = vld [vmem:[#allocation15 + $0xb00] sm:$0xf]  ;;  %v10374_v40 = vld [vmem:[#allocation15 + $0xb18] sm:$0xf0]  ;;  %v10280_v43 = vld [vmem:[#allocation15 + $0x82c] sm:$0xf] }
 0x3e5   :  { %6230 = vmatmul.bf16.vlgmr.msrb.gmra.mxu3 %v11000_v27  ;;  %v8686_v52 = vor.u32 %v10220_v60, %v8685_v56  ;;  %v10084_v46 = vld [vmem:[#allocation15 + $0x20c] sm:$0xf]  ;;  %v10367_v56 = vld [vmem:[#allocation15 + $0xae0] sm:$0xf0]  ;;  %v10273_v60 = vld [vmem:[#allocation15 + $0x7f4] sm:$0xf] }
 0x3e6   :  { %6274 = vmatpush.bf16.msra.mxu3 %v8102_v4  ;;  %v9022_v4 = vor.u32 %v10304_v21, %v9021_v49  ;;  %v8239_v49 = vld [vmem:[#allocation15 + $0x2cc] sm:$0xf0]  ;;  %v9386_v21 = vor.u32 %v10395_v59, %v9385_v18  ;;  %v11096_v13 = vpop.f32.mrf.mxu0  ;;  %v5933_v30 = vadd.f32 %v11070_v54, %v5920_v14  ;;  %v5855_v18 = vadd.f32 %v11085_v20, %v11068_v44  ;;  %v8939_v59 = vld [vmem:[#allocation15 + $0x844] sm:$0xf0] }
 0x3e7   :  { %v8242_v2 = vor.u32 %v10105_v39, %v8239_v49  ;;  %v8601_v39 = vld [vmem:[#allocation15 + $0x588] sm:$0xf]  ;;  %v10199_v49 = vld [vmem:[#allocation15 + $0x5a0] sm:$0xf0]  ;;  %v8942_v20 = vor.u32 %v10280_v43, %v8939_v59  ;;  %v8519_v43 = vld [vmem:[#allocation15 + $0x4fc] sm:$0xf0] }
 0x3e8   :  { %6242 = vmatpush.bf16.msra.mxu0 %v9022_v4  ;;  %6164 = vmatpush.bf16.msra.mxu2 %v9466_v32  ;;  %v11090_v25 = vpop.f32.mrf.mxu3  ;;  %v8995_v4 = vld [vmem:[#allocation15 + $0x8b4] sm:$0xf0]  ;;  %v5908_v32 = vpop.f32.mrf.mxu2  ;;  %v5946_v54 = vadd.f32 %v11081_v3, %v5933_v30  ;;  %10488 = vtanh.f32 %v5855_v18  ;;  %v8911_v3 = vld [vmem:[#allocation15 + $0x80c] sm:$0xf0]  ;;  %v10175_v18 = vld [vmem:[#allocation15 + $0x4e4] sm:$0xf] }
 0x3e9   :  { %6203 = vmatpush.bf16.msrb.mxu1 %v8350_v9  ;;  %v9219_v32 = vld [vmem:[#allocation15 + $0xa74] sm:$0xf0]  ;;  %v10259_v59 = vld [vmem:[#allocation15 + $0x784] sm:$0xf] }
 0x3ea   :  { %6275 = vmatpush.bf16.msra.mxu3 %v8074_v22  ;;  %v8741_v22 = vld [vmem:[#allocation15 + $0x6a0] sm:$0xf] }
 0x3eb   :  { %v8742_v34 = vor.u32 %v10234_v24, %v8741_v22  ;;  %6165 = vmatmul.bf16.vlgmr.msra.gmra.mxu2 %v11033_v29  ;;  %6243 = vmatmul.bf16.vlgmr.msra.gmra.mxu0 %v11011_v15  ;;  %v10381_v22 = vld [vmem:[#allocation15 + $0xb50] sm:$0xf0]  ;;  %v5997_v24 = vpop.f32.mrf.mxu1 }
 0x3ec   :  { %6287 = vmatpush.bf16.msrb.mxu0 %v8326_v57  ;;  %6209 = vmatpush.bf16.msrb.mxu2 %v8770_v10  ;;  %v9358_v57 = vor.u32 %v10388_v0, %v9357_v61  ;;  %v8657_v10 = vld [vmem:[#allocation15 + $0x5f8] sm:$0xf] }
 0x3ed   :  { %6248 = vmatpush.bf16.msra.mxu1 %v9442_v58  ;;  %v8998_v58 = vor.u32 %v10294_v41, %v8995_v4  ;;  %v9245_v41 = vld [vmem:[#allocation15 + $0xa90] sm:$0xf]  ;;  %v10077_v4 = vld [vmem:[#allocation15 + $0x1d4] sm:$0xf] }
 0x3ee   :  { %6276 = vmatpush.bf16.msra.mxu3 %v8046_v37  ;;  %v7962_v37 = vor.u32 %v10035_v19, %v7959_v26  ;;  %6204 = vmatmul.bf16.vlgmr.msrb.gmra.mxu1 %v10989_v6  ;;  %v8967_v19 = vld [vmem:[#allocation15 + $0x87c] sm:$0xf0]  ;;  %v11099_v26 = vadd.f32 %v5997_v24, %v11083_v5  ;;  %v6038_v44 = vpop.f32.mrf.mxu0  ;;  %v8883_v24 = vld [vmem:[#allocation15 + $0x7d4] sm:$0xf0]  ;;  %v9246_v30 = vor.u32 %v10360_v23, %v9245_v41  ;;  %v8463_v23 = vld [vmem:[#allocation15 + $0x48c] sm:$0xf0] }
 0x3ef   :  { %v10168_v44 = vld [vmem:[#allocation15 + $0x4ac] sm:$0xf] }
 0x3f0   :  { %6288 = vmatpush.bf16.msrb.mxu0 %v8298_v28  ;;  %6210 = vmatpush.bf16.msrb.mxu2 %v8742_v34  ;;  %v6025_v7 = vpop.f32.mrf.mxu3  ;;  %v8658_v28 = vor.u32 %v10213_v35, %v8657_v10  ;;  %v10091_v34 = vld [vmem:[#allocation15 + $0x244] sm:$0xf]  ;;  %v5958_v14 = vpop.f32.mrf.mxu2  ;;  %v10465_v10 = vld [vmem:[#allocation15 + $0xdf0] sm:$0xf0]  ;;  %v10182_v35 = vld [vmem:[#allocation15 + $0x51c] sm:$0xf] }
 0x3f1   :  { %6249 = vmatpush.bf16.msra.mxu1 %v9414_v36  ;;  %v10206_v36 = vld [vmem:[#allocation15 + $0x5d8] sm:$0xf0]  ;;  %v8186_v5 = vor.u32 %v10091_v34, %v8183_v11  ;;  %v10343_v11 = vld [vmem:[#allocation15 + $0xa24] sm:$0xf] }
 0x3f2   :  { %6277 = vmatpush.bf16.msra.mxu3 %v8018_v1  ;;  %v10021_v1 = vld [vmem:[#allocation15 + $0x14] sm:$0xf]  ;;  %v8630_v55 = vor.u32 %v10206_v36, %v8629_v45  ;;  %v10350_v7 = vld [vmem:[#allocation15 + $0xa5c] sm:$0xf] }
 0x3f3   :  { %v7906_v9 = vor.u32 %v10021_v1, %v7903_v8  ;;  %v5999_v61 = vpop.f32.mrf.mxu1  ;;  %v8573_v1 = vld [vmem:[#allocation15 + $0x550] sm:$0xf]  ;;  %v10192_v8 = vld [vmem:[#allocation15 + $0x568] sm:$0xf0] }
 0x3f4   :  { %6289 = vmatpush.bf16.msrb.mxu0 %v8270_v47  ;;  %6211 = vmatpush.bf16.msrb.mxu2 %v8714_v48  ;;  %v8155_v47 = vld [vmem:[#allocation15 + $0x224] sm:$0xf0]  ;;  %v9302_v48 = vor.u32 %v10374_v40, %v9301_v42  ;;  %v9637_v42 = vld [vmem:[#allocation15 + $0xda0] sm:$0xf]  ;;  %v10458_v40 = vld [vmem:[#allocation15 + $0xdb8] sm:$0xf0] }
 0x3f5   :  { %6250 = vmatpush.bf16.msra.mxu1 %v9386_v21  ;;  %v5959_v21 = vadd.f32 %v5958_v14, %v5946_v54  ;;  %v8158_v0 = vor.u32 %v10084_v46, %v8155_v47  ;;  %v8855_v54 = vld [vmem:[#allocation15 + $0x79c] sm:$0xf0]  ;;  %v9638_v46 = vor.u32 %v10458_v40, %v9637_v42  ;;  %v10336_v47 = vld [vmem:[#allocation15 + $0x9ec] sm:$0xf]  ;;  %v9163_v14 = vld [vmem:[#allocation15 + $0xa04] sm:$0xf0] }
 0x3f6   :  { %6278 = vmatpush.bf16.msra.mxu3 %v7990_v33  ;;  %v9329_v33 = vld [vmem:[#allocation15 + $0xb38] sm:$0xf]  ;;  %v9166_v61 = vor.u32 %v10336_v47, %v9163_v14  ;;  %v8407_v47 = vld [vmem:[#allocation15 + $0x41c] sm:$0xf0] }
 0x3f7   :  { %v9330_v62 = vor.u32 %v10381_v22, %v9329_v33  ;;  %10490 = vtanh.f32 %v5959_v21  ;;  %v8547_v33 = vld [vmem:[#allocation15 + $0x534] sm:$0xf0]  ;;  %v10266_v22 = vld [vmem:[#allocation15 + $0x7bc] sm:$0xf]  ;;  %v10451_v21 = vld [vmem:[#allocation15 + $0xd80] sm:$0xf0] }
 0x3f8   :  { %6290 = vmatpush.bf16.msrb.mxu0 %v8242_v2  ;;  %6212 = vmatpush.bf16.msrb.mxu2 %v8686_v52  ;;  %v8602_v2 = vor.u32 %v10199_v49, %v8601_v39  ;;  %v8127_v52 = vld [vmem:[#allocation15 + $0x1ec] sm:$0xf0]  ;;  %v8550_v36 = vor.u32 %v10182_v35, %v8547_v33  ;;  %v8858_v39 = vor.u32 %v10259_v59, %v8855_v54  ;;  %v9609_v49 = vld [vmem:[#allocation15 + $0xd68] sm:$0xf]  ;;  %v10322_v35 = vld [vmem:[#allocation15 + $0x97c] sm:$0xf] }
 0x3f9   :  { %6251 = vmatpush.bf16.msra.mxu1 %v9358_v57  ;;  %v8914_v57 = vor.u32 %v10273_v60, %v8911_v3  ;;  %v8827_v60 = vld [vmem:[#allocation15 + $0x764] sm:$0xf0]  ;;  %v9610_v3 = vor.u32 %v10451_v21, %v9609_v49  ;;  %v9525_v59 = vld [vmem:[#allocation15 + $0xcc0] sm:$0xf]  ;;  %v10430_v54 = vld [vmem:[#allocation15 + $0xcd8] sm:$0xf0] }
 0x3fa   :  { %6279 = vmatpush.bf16.msra.mxu3 %v7962_v37  ;;  %v8970_v37 = vor.u32 %v10287_v17, %v8967_v19  ;;  %v9222_v17 = vor.u32 %v10350_v7, %v9219_v32  ;;  %v10489_v19 = vpop.eup %10488  ;;  %v10245_v7 = vld [vmem:[#allocation15 + $0x714] sm:$0xf]  ;;  %v8799_v32 = vld [vmem:[#allocation15 + $0x72c] sm:$0xf0]  ;;  %v9526_v49 = vor.u32 %v10430_v54, %v9525_v59  ;;  %v10308_v21 = vld [vmem:[#allocation15 + $0x90c] sm:$0xf] }
 0x3fb   :  { %v10231_v59 = vld [vmem:[#allocation15 + $0x6a4] sm:$0xf]  ;;  %v8743_v54 = vld [vmem:[#allocation15 + $0x6bc] sm:$0xf0] }
 0x3fc   :  { %6291 = vmatpush.bf16.msrb.mxu0 %v8214_v12  ;;  %6213 = vmatpush.bf16.msrb.mxu2 %v8658_v28  ;;  %v8574_v12 = vor.u32 %v10192_v8, %v8573_v1  ;;  %v5960_v28 = vpop.f32.mrf.mxu2  ;;  %v10329_v1 = vld [vmem:[#allocation15 + $0x9b4] sm:$0xf]  ;;  %v9135_v8 = vld [vmem:[#allocation15 + $0x9cc] sm:$0xf0] }
 0x3fd   :  { %6252 = vmatpush.bf16.msra.mxu1 %v9330_v62  ;;  %v9191_v62 = vld [vmem:[#allocation15 + $0xa3c] sm:$0xf0]  ;;  %v10491_v45 = vpop.eup %10490 }
 0x3fe   :  { %6280 = vmatpush.bf16.msra.mxu3 %v7934_v53  ;;  %v9273_v53 = vld [vmem:[#allocation15 + $0xac8] sm:$0xf] }
 0x3ff   :  { %v9274_v51 = vor.u32 %v10367_v56, %v9273_v53  ;;  %v8491_v53 = vld [vmem:[#allocation15 + $0x4c4] sm:$0xf0]  ;;  %v10252_v56 = vld [vmem:[#allocation15 + $0x74c] sm:$0xf] }
 0x400   :  { %6292 = vmatpush.bf16.msrb.mxu0 %v8186_v5  ;;  %6214 = vmatpush.bf16.msrb.mxu2 %v8630_v55  ;;  %v6489_v5 = vpack.c.bf16 %v10491_v45, %v10489_v19  ;;  %v9194_v55 = vor.u32 %v10343_v11, %v9191_v62  ;;  %v8830_v41 = vor.u32 %v10252_v56, %v8827_v60  ;;  %v8077_v45 = vld [vmem:[#allocation15 + $0x168] sm:$0xf]  ;;  %v10423_v60 = vld [vmem:[#allocation15 + $0xca0] sm:$0xf0] }
 0x401   :  { %6253 = vmatpush.bf16.msra.mxu1 %v9302_v48  ;;  %v8522_v48 = vor.u32 %v10175_v18, %v8519_v43  ;;  %v10315_v18 = vld [vmem:[#allocation15 + $0x944] sm:$0xf]  ;;  %v9497_v56 = vld [vmem:[#allocation15 + $0xc88] sm:$0xf] }
 0x402   :  { %6281 = vmatpush.bf16.msra.mxu3 %v7906_v9  ;;  %v9665_v9 = vld [vmem:[#allocation15 + $0xdd8] sm:$0xf]  ;;  %6493 = vst [vmem:[%s11195_s11] sm:$0xff] %v6489_v5  ;;  %v9079_v5 = vld [vmem:[#allocation15 + $0x95c] sm:$0xf0] }
 0x403   :  { %v9666_v34 = vor.u32 %v10465_v10, %v9665_v9  ;;  %v8105_v9 = vld [vmem:[#allocation15 + $0x1a0] sm:$0xf]  ;;  %v10074_v10 = vld [vmem:[#allocation15 + $0x1b8] sm:$0xf0]  ;;  %v9082_v14 = vor.u32 %v10315_v18, %v9079_v5  ;;  %v8301_v18 = vld [vmem:[#allocation15 + $0x328] sm:$0xf] }
 0x404   :  { %6293 = vmatpush.bf16.msrb.mxu0 %v8158_v0  ;;  %6215 = vmatpush.bf16.msrb.mxu2 %v8602_v2  ;;  %v3439_v0 = vperm.slane %v11078_v38, 3  ;;  %v8494_v2 = vor.u32 %v10168_v44, %v8491_v53  ;;  %v8106_v28 = vor.u32 %v10074_v10, %v8105_v9  ;;  %v9051_v44 = vld [vmem:[#allocation15 + $0x924] sm:$0xf0]  ;;  %v10301_v9 = vld [vmem:[#allocation15 + $0x8d4] sm:$0xf] }
 0x405   :  { %6282 = vmatmul.bf16.vlgmr.msra.gmra.mxu3 %v10971_v63  ;;  %6254 = vmatpush.bf16.msra.mxu1 %v9274_v51  ;;  %v10161_v51 = vld [vmem:[#allocation15 + $0x474] sm:$0xf]  ;;  %v9023_v10 = vld [vmem:[#allocation15 + $0x8ec] sm:$0xf0]  ;;  %v10123_v5 = vld [vmem:[#allocation15 + $0x340] sm:$0xf0] }
 0x406   :  { %6326 = vmatpush.bf16.msrb.mxu3 %v8998_v58  ;;  %v8130_v58 = vor.u32 %v10077_v4, %v8127_v52  ;;  %v9581_v4 = vld [vmem:[#allocation15 + $0xd30] sm:$0xf]  ;;  %v10444_v52 = vld [vmem:[#allocation15 + $0xd48] sm:$0xf0]  ;;  %v8466_v33 = vor.u32 %v10161_v51, %v8463_v23  ;;  %v6088_v11 = vpop.f32.mrf.mxu0 }
 0x407   :  { %v9582_v38 = vor.u32 %v10444_v52, %v9581_v4  ;;  %v10053_v4 = vld [vmem:[#allocation15 + $0x110] sm:$0xf0]  ;;  %v9469_v52 = vld [vmem:[#allocation15 + $0xc50] sm:$0xf]  ;;  %v10416_v51 = vld [vmem:[#allocation15 + $0xc68] sm:$0xf0] }
 0x408   :  { %6294 = vmatpush.bf16.msrb.mxu0 %v8130_v58  ;;  %6216 = vmatpush.bf16.msrb.mxu2 %v8574_v12  ;;  %v9107_v58 = vld [vmem:[#allocation15 + $0x994] sm:$0xf0]  ;;  %v10437_v12 = vld [vmem:[#allocation15 + $0xd10] sm:$0xf0] }
 0x409   :  { %6255 = vmatpush.bf16.msra.mxu1 %v9246_v30  ;;  %v10154_v30 = vld [vmem:[#allocation15 + $0x43c] sm:$0xf]  ;;  %v9110_v62 = vor.u32 %v10322_v35, %v9107_v58  ;;  %v8329_v35 = vld [vmem:[#allocation15 + $0x360] sm:$0xf] }
 0x40a   :  { %6327 = vmatpush.bf16.msrb.mxu3 %v8970_v37  ;;  %v8886_v37 = vor.u32 %v10266_v22, %v8883_v24  ;;  %v8802_v22 = vor.u32 %v10245_v7, %v8799_v32  ;;  %v9553_v24 = vld [vmem:[#allocation15 + $0xcf8] sm:$0xf]  ;;  %v9498_v32 = vor.u32 %v10423_v60, %v9497_v56  ;;  %v10130_v58 = vld [vmem:[#allocation15 + $0x378] sm:$0xf0]  ;;  %v10392_v56 = vld [vmem:[#allocation15 + $0xbac] sm:$0xf] }
 0x40b   :  { %6217 = vmatmul.bf16.vlgmr.msrb.gmra.mxu2 %v10992_v31  ;;  %6295 = vmatmul.bf16.vlgmr.msrb.gmra.mxu0 %v10978_v16  ;;  %v9554_v40 = vor.u32 %v10437_v12, %v9553_v24  ;;  %v8771_v24 = vld [vmem:[#allocation15 + $0x6f4] sm:$0xf0]  ;;  %v10406_v12 = vld [vmem:[#allocation15 + $0xc1c] sm:$0xf] }
 0x40c   :  { %6339 = vmatpush.bf16.msra.mxu0 %v9222_v17  ;;  %6261 = vmatpush.bf16.msra.mxu2 %v9666_v34  ;;  %v8435_v34 = vld [vmem:[#allocation15 + $0x454] sm:$0xf0] }
 0x40d   :  { %6300 = vmatpush.bf16.msrb.mxu1 %v8550_v36  ;;  %v10067_v36 = vld [vmem:[#allocation15 + $0x180] sm:$0xf0]  ;;  %v8438_v43 = vor.u32 %v10154_v30, %v8435_v34  ;;  %v10046_v30 = vld [vmem:[#allocation15 + $0xd8] sm:$0xf0]  ;;  %v9470_v34 = vor.u32 %v10416_v51, %v9469_v52  ;;  %v10217_v51 = vld [vmem:[#allocation15 + $0x634] sm:$0xf] }
 0x40e   :  { %6328 = vmatpush.bf16.msrb.mxu3 %v8942_v20  ;;  %v6075_v20 = vpop.f32.mrf.mxu3  ;;  %6256 = vmatmul.bf16.vlgmr.msra.gmra.mxu1 %v11020_v50 }
 0x40f   :  { %v6076_v17 = vadd.f32 %v6075_v20, %v3439_v0  ;;  %v6010_v20 = vpop.f32.mrf.mxu2 }
 0x410   :  { %6340 = vmatpush.bf16.msra.mxu0 %v9194_v55  ;;  %6262 = vmatpush.bf16.msra.mxu2 %v9638_v46  ;;  %v8078_v55 = vor.u32 %v10067_v36, %v8077_v45  ;;  %v10147_v46 = vld [vmem:[#allocation15 + $0x404] sm:$0xf] }
 0x411   :  { %6301 = vmatpush.bf16.msrb.mxu1 %v8522_v48  ;;  %v11115_v42 = vadd.f32 %v6088_v11, %v6076_v17  ;;  %v8049_v48 = vld [vmem:[#allocation15 + $0x130] sm:$0xf]  ;;  %v8410_v53 = vor.u32 %v10147_v46, %v8407_v47  ;;  %v8330_v11 = vor.u32 %v10130_v58, %v8329_v35  ;;  %v9415_v46 = vld [vmem:[#allocation15 + $0xbfc] sm:$0xf0]  ;;  %v7965_v47 = vld [vmem:[#allocation15 + $0x88] sm:$0xf] }
 0x412   :  { %6329 = vmatpush.bf16.msrb.mxu3 %v8914_v57  ;;  %v9138_v57 = vor.u32 %v10329_v1, %v9135_v8  ;;  %v8379_v1 = vld [vmem:[#allocation15 + $0x3e4] sm:$0xf0]  ;;  %v8021_v8 = vld [vmem:[#allocation15 + $0xf8] sm:$0xf]  ;;  %v8217_v58 = vld [vmem:[#allocation15 + $0x280] sm:$0xf] }
 0x414   :  { %6341 = vmatpush.bf16.msra.mxu0 %v9166_v61  ;;  %6263 = vmatpush.bf16.msra.mxu2 %v9610_v3  ;;  %v6011_v61 = vadd.f32 %v6010_v20, %v11099_v26  ;;  %v10140_v3 = vld [vmem:[#allocation15 + $0x3cc] sm:$0xf] }
 0x415   :  { %6302 = vmatpush.bf16.msrb.mxu1 %v8494_v2  ;;  %v6090_v2 = vpop.f32.mrf.mxu0  ;;  %v8382_v26 = vor.u32 %v10140_v3, %v8379_v1  ;;  %v10224_v20 = vld [vmem:[#allocation15 + $0x66c] sm:$0xf] }
 0x416   :  { %6330 = vmatpush.bf16.msrb.mxu3 %v8886_v37  ;;  %v6077_v19 = vpop.f32.mrf.mxu3  ;;  %v11113_v37 = vpop.f32.mrf.mxu1  ;;  %v6024_v23 = vadd.f32 %v11090_v25, %v6011_v61  ;;  %v9026_v25 = vor.u32 %v10301_v9, %v9023_v10  ;;  %v9387_v61 = vld [vmem:[#allocation15 + $0xbc4] sm:$0xf0]  ;;  %v10032_v3 = vld [vmem:[#allocation15 + $0x68] sm:$0xf0]  ;;  %v8245_v2 = vld [vmem:[#allocation15 + $0x2b8] sm:$0xf] }
 0x417   :  { %v9443_v19 = vld [vmem:[#allocation15 + $0xc34] sm:$0xf0]  ;;  %v6012_v45 = vpop.f32.mrf.mxu2  ;;  %v10025_v9 = vld [vmem:[#allocation15 + $0x30] sm:$0xf0] }
 0x418   :  { %6342 = vmatpush.bf16.msra.mxu0 %v9138_v57  ;;  %6264 = vmatpush.bf16.msra.mxu2 %v9582_v38  ;;  %v10133_v57 = vld [vmem:[#allocation15 + $0x394] sm:$0xf]  ;;  %v8351_v38 = vld [vmem:[#allocation15 + $0x3ac] sm:$0xf0]  ;;  %v6037_v17 = vadd.f32 %v11096_v13, %v6024_v23  ;;  %v8973_v45 = vld [vmem:[#allocation15 + $0x868] sm:$0xf] }
 0x419   :  { %6303 = vmatpush.bf16.msrb.mxu1 %v8466_v33  ;;  %v8022_v33 = vor.u32 %v10053_v4, %v8021_v8  ;;  %v8354_v36 = vor.u32 %v10133_v57, %v8351_v38  ;;  %v9390_v4 = vor.u32 %v10392_v56, %v9387_v61  ;;  %v8687_v23 = vld [vmem:[#allocation15 + $0x64c] sm:$0xf0]  ;;  %v7909_v57 = vld [vmem:[#allocation15 + $0x18] sm:$0xf]  ;;  %v10298_v38 = vld [vmem:[#allocation15 + $0x8b8] sm:$0xf0] }
 0x41a   :  { %6331 = vmatpush.bf16.msrb.mxu3 %v8858_v39  ;;  %v10060_v39 = vld [vmem:[#allocation15 + $0x148] sm:$0xf0]  ;;  %v8690_v35 = vor.u32 %v10217_v51, %v8687_v23  ;;  %v8603_v56 = vld [vmem:[#allocation15 + $0x5a4] sm:$0xf0]  ;;  %v10357_v23 = vld [vmem:[#allocation15 + $0xa94] sm:$0xf] }
 0x41b   :  { %v8050_v0 = vor.u32 %v10060_v39, %v8049_v48  ;;  %v8746_v48 = vor.u32 %v10231_v59, %v8743_v54  ;;  %v8273_v39 = vld [vmem:[#allocation15 + $0x2f0] sm:$0xf]  ;;  %v10203_v59 = vld [vmem:[#allocation15 + $0x5c4] sm:$0xf]  ;;  %v8631_v54 = vld [vmem:[#allocation15 + $0x5dc] sm:$0xf0] }
 0x41c   :  { %6343 = vmatpush.bf16.msra.mxu0 %v9110_v62  ;;  %6265 = vmatpush.bf16.msra.mxu2 %v9554_v40  ;;  %v11122_v62 = vadd.f32 %v11113_v37, %v6037_v17  ;;  %v8302_v37 = vor.u32 %v10123_v5, %v8301_v18  ;;  %v8659_v17 = vld [vmem:[#allocation15 + $0x614] sm:$0xf0]  ;;  %v8189_v5 = vld [vmem:[#allocation15 + $0x248] sm:$0xf] }
 0x41d   :  { %6304 = vmatpush.bf16.msrb.mxu1 %v8438_v43  ;;  %v9446_v43 = vor.u32 %v10406_v12, %v9443_v19  ;;  %v10210_v12 = vld [vmem:[#allocation15 + $0x5fc] sm:$0xf] }
 0x41e   :  { %6332 = vmatpush.bf16.msrb.mxu3 %v8830_v41  ;;  %v9054_v41 = vor.u32 %v10308_v21, %v9051_v44  ;;  %v6051_v7 = vpop.f32.mrf.mxu1  ;;  %v8662_v18 = vor.u32 %v10210_v12, %v8659_v17  ;;  %v8889_v12 = vld [vmem:[#allocation15 + $0x7c0] sm:$0xf]  ;;  %v10270_v17 = vld [vmem:[#allocation15 + $0x7d8] sm:$0xf0] }
 0x41f   :  { %v10385_v7 = vld [vmem:[#allocation15 + $0xb74] sm:$0xf] }
 0x420   :  { %6344 = vmatpush.bf16.msra.mxu0 %v9082_v14  ;;  %6266 = vmatpush.bf16.msra.mxu2 %v9526_v49  ;;  %v10039_v14 = vld [vmem:[#allocation15 + $0xa0] sm:$0xf0]  ;;  %v10116_v49 = vld [vmem:[#allocation15 + $0x308] sm:$0xf0] }
 0x421   :  { %6305 = vmatpush.bf16.msrb.mxu1 %v8410_v53  ;;  %v7966_v44 = vor.u32 %v10039_v14, %v7965_v47  ;;  %v8715_v53 = vld [vmem:[#allocation15 + $0x684] sm:$0xf0]  ;;  %v8274_v1 = vor.u32 %v10116_v49, %v8273_v39  ;;  %v9303_v47 = vld [vmem:[#allocation15 + $0xb1c] sm:$0xf0]  ;;  %v8634_v39 = vor.u32 %v10203_v59, %v8631_v54  ;;  %v8161_v49 = vld [vmem:[#allocation15 + $0x210] sm:$0xf] }
 0x422   :  { %6333 = vmatpush.bf16.msrb.mxu3 %v8802_v22  ;;  %v10238_v22 = vld [vmem:[#allocation15 + $0x6dc] sm:$0xf]  ;;  %v8718_v8 = vor.u32 %v10224_v20, %v8715_v53  ;;  %v10196_v53 = vld [vmem:[#allocation15 + $0x58c] sm:$0xf]  ;;  %v8525_v59 = vld [vmem:[#allocation15 + $0x4e8] sm:$0xf] }
 0x423   :  { %v8774_v40 = vor.u32 %v10238_v22, %v8771_v24  ;;  %v7910_v24 = vor.u32 %v10025_v9, %v7909_v57  ;;  %v8606_v51 = vor.u32 %v10196_v53, %v8603_v56  ;;  %v9247_v9 = vld [vmem:[#allocation15 + $0xaac] sm:$0xf0]  ;;  %v10179_v54 = vld [vmem:[#allocation15 + $0x500] sm:$0xf0] }
 0x424   :  { %6345 = vmatpush.bf16.msra.mxu0 %v9054_v41  ;;  %6267 = vmatpush.bf16.msra.mxu2 %v9498_v32  ;;  %v10109_v41 = vld [vmem:[#allocation15 + $0x2d0] sm:$0xf0]  ;;  %v9359_v32 = vld [vmem:[#allocation15 + $0xb8c] sm:$0xf0] }
 0x425   :  { %6334 = vmatmul.bf16.vlgmr.msrb.gmra.mxu3 %v11000_v27  ;;  %6306 = vmatpush.bf16.msrb.mxu1 %v8382_v26  ;;  %v8246_v10 = vor.u32 %v10109_v41, %v8245_v2  ;;  %v9001_v26 = vld [vmem:[#allocation15 + $0x8a0] sm:$0xf]  ;;  %v9362_v22 = vor.u32 %v10385_v7, %v9359_v32  ;;  %v10277_v41 = vld [vmem:[#allocation15 + $0x810] sm:$0xf0]  ;;  %v8133_v7 = vld [vmem:[#allocation15 + $0x1d8] sm:$0xf] }
 0x426   :  { %6378 = vmatpush.bf16.msra.mxu3 %v8106_v28  ;;  %v7993_v28 = vld [vmem:[#allocation15 + $0xc0] sm:$0xf]  ;;  %v9002_v19 = vor.u32 %v10298_v38, %v9001_v26  ;;  %v10081_v32 = vld [vmem:[#allocation15 + $0x1f0] sm:$0xf0]  ;;  %v10354_v26 = vld [vmem:[#allocation15 + $0xa78] sm:$0xf0] }
 0x427   :  { %v7994_v13 = vor.u32 %v10046_v30, %v7993_v28  ;;  %v10378_v28 = vld [vmem:[#allocation15 + $0xb3c] sm:$0xf]  ;;  %v9331_v30 = vld [vmem:[#allocation15 + $0xb54] sm:$0xf0]  ;;  %v8497_v53 = vld [vmem:[#allocation15 + $0x4b0] sm:$0xf] }
 0x428   :  { %6346 = vmatpush.bf16.msra.mxu0 %v9026_v25  ;;  %6268 = vmatpush.bf16.msra.mxu2 %v9470_v34  ;;  %v11124_v60 = vpop.f32.mrf.mxu3  ;;  %v11129_v34 = vpop.f32.mrf.mxu0 }
 0x429   :  { %6307 = vmatpush.bf16.msrb.mxu1 %v8354_v36  ;;  %v10291_v36 = vld [vmem:[#allocation15 + $0x880] sm:$0xf0] }
 0x42a   :  { %6379 = vmatpush.bf16.msra.mxu3 %v8078_v55  ;;  %v10399_v55 = vld [vmem:[#allocation15 + $0xbe4] sm:$0xf] }
 0x42b   :  { %v9418_v21 = vor.u32 %v10399_v55, %v9415_v46  ;;  %6269 = vmatmul.bf16.vlgmr.msra.gmra.mxu2 %v11033_v29  ;;  %6347 = vmatmul.bf16.vlgmr.msra.gmra.mxu0 %v11011_v15  ;;  %v8974_v55 = vor.u32 %v10291_v36, %v8973_v45  ;;  %v10371_v46 = vld [vmem:[#allocation15 + $0xb04] sm:$0xf]  ;;  %v9197_v45 = vld [vmem:[#allocation15 + $0xa28] sm:$0xf] }
 0x42c   :  { %6391 = vmatpush.bf16.msrb.mxu0 %v8330_v11  ;;  %6313 = vmatpush.bf16.msrb.mxu2 %v8774_v40  ;;  %v11131_v40 = vpop.f32.mrf.mxu1  ;;  %v9306_v20 = vor.u32 %v10371_v46, %v9303_v47  ;;  %v10347_v36 = vld [vmem:[#allocation15 + $0xa40] sm:$0xf0] }
 0x42d   :  { %6352 = vmatpush.bf16.msra.mxu1 %v9446_v43  ;;  %v10095_v43 = vld [vmem:[#allocation15 + $0x260] sm:$0xf0]  ;;  %v9198_v47 = vor.u32 %v10347_v36, %v9197_v45 }
 0x42e   :  { %6380 = vmatpush.bf16.msra.mxu3 %v8050_v0  ;;  %v7937_v0 = vld [vmem:[#allocation15 + $0x50] sm:$0xf]  ;;  %6308 = vmatmul.bf16.vlgmr.msrb.gmra.mxu1 %v10989_v6  ;;  %v8190_v14 = vor.u32 %v10095_v43, %v8189_v5  ;;  %v8890_v5 = vor.u32 %v10270_v17, %v8889_v12  ;;  %v10455_v43 = vld [vmem:[#allocation15 + $0xda4] sm:$0xf] }
 0x42f   :  { %v7938_v52 = vor.u32 %v10032_v3, %v7937_v0  ;;  %v10364_v0 = vld [vmem:[#allocation15 + $0xacc] sm:$0xf]  ;;  %v9275_v3 = vld [vmem:[#allocation15 + $0xae4] sm:$0xf0]  ;;  %v10263_v46 = vld [vmem:[#allocation15 + $0x7a0] sm:$0xf0] }
 0x430   :  { %6392 = vmatpush.bf16.msrb.mxu0 %v8302_v37  ;;  %6314 = vmatpush.bf16.msrb.mxu2 %v8746_v48  ;;  %v6129_v25 = vpop.f32.mrf.mxu3  ;;  %v8945_v37 = vld [vmem:[#allocation15 + $0x830] sm:$0xf]  ;;  %v10284_v48 = vld [vmem:[#allocation15 + $0x848] sm:$0xf0]  ;;  %v9278_v57 = vor.u32 %v10364_v0, %v9275_v3 }
 0x431   :  { %6353 = vmatpush.bf16.msra.mxu1 %v9418_v21  ;;  %v10088_v21 = vld [vmem:[#allocation15 + $0x228] sm:$0xf0]  ;;  %v8946_v61 = vor.u32 %v10284_v48, %v8945_v37  ;;  %v9169_v37 = vld [vmem:[#allocation15 + $0x9f0] sm:$0xf] }
 0x432   :  { %6381 = vmatpush.bf16.msra.mxu3 %v8022_v33  ;;  %v10102_v33 = vld [vmem:[#allocation15 + $0x298] sm:$0xf0]  ;;  %v8162_v2 = vor.u32 %v10088_v21, %v8161_v49  ;;  %v10340_v48 = vld [vmem:[#allocation15 + $0xa08] sm:$0xf0]  ;;  %v8833_v0 = vld [vmem:[#allocation15 + $0x750] sm:$0xf] }
 0x433   :  { %v8218_v11 = vor.u32 %v10102_v33, %v8217_v58  ;;  %v9667_v58 = vld [vmem:[#allocation15 + $0xdf4] sm:$0xf0]  ;;  %v8553_v33 = vld [vmem:[#allocation15 + $0x520] sm:$0xf]  ;;  %v10448_v21 = vld [vmem:[#allocation15 + $0xd6c] sm:$0xf] }
 0x434   :  { %6393 = vmatpush.bf16.msrb.mxu0 %v8274_v1  ;;  %6315 = vmatpush.bf16.msrb.mxu2 %v8718_v8  ;;  %v8917_v1 = vld [vmem:[#allocation15 + $0x7f8] sm:$0xf]  ;;  %v6142_v8 = vpop.f32.mrf.mxu0  ;;  %v10256_v3 = vld [vmem:[#allocation15 + $0x768] sm:$0xf0] }
 0x435   :  { %6354 = vmatpush.bf16.msra.mxu1 %v9390_v4  ;;  %v8575_v4 = vld [vmem:[#allocation15 + $0x56c] sm:$0xf0]  ;;  %v8918_v38 = vor.u32 %v10277_v41, %v8917_v1  ;;  %v9170_v1 = vor.u32 %v10340_v48, %v9169_v37  ;;  %v11139_v8 = vld [vmem:[#allocation16] sm:$0xff]  ;;  %v10312_v48 = vld [vmem:[#allocation15 + $0x928] sm:$0xf0] }
 0x436   :  { %6382 = vmatpush.bf16.msra.mxu3 %v7994_v13  ;;  %v9334_v13 = vor.u32 %v10378_v28, %v9331_v30  ;;  %v9250_v30 = vor.u32 %v10357_v23, %v9247_v9  ;;  %v9583_v23 = vld [vmem:[#allocation15 + $0xd4c] sm:$0xf0]  ;;  %v10249_v9 = vld [vmem:[#allocation15 + $0x730] sm:$0xf0] }
 0x437   :  { %v9057_v37 = vld [vmem:[#allocation15 + $0x910] sm:$0xf] }
 0x438   :  { %6394 = vmatpush.bf16.msrb.mxu0 %v8246_v10  ;;  %6316 = vmatpush.bf16.msrb.mxu2 %v8690_v35  ;;  %v9225_v10 = vld [vmem:[#allocation15 + $0xa60] sm:$0xf]  ;;  %v10462_v35 = vld [vmem:[#allocation15 + $0xddc] sm:$0xf] }
 0x439   :  { %6355 = vmatpush.bf16.msra.mxu1 %v9362_v22  ;;  %v8134_v22 = vor.u32 %v10081_v32, %v8133_v7  ;;  %v8469_v7 = vld [vmem:[#allocation15 + $0x478] sm:$0xf]  ;;  %v10165_v32 = vld [vmem:[#allocation15 + $0x490] sm:$0xf0] }
 0x43a   :  { %6383 = vmatpush.bf16.msra.mxu3 %v7966_v44  ;;  %v11134_v44 = vpop.f32.mrf.mxu2 }
 0x43c   :  { %6395 = vmatpush.bf16.msrb.mxu0 %v8218_v11  ;;  %6317 = vmatpush.bf16.msrb.mxu2 %v8662_v18  ;;  %v9670_v11 = vor.u32 %v10462_v35, %v9667_v58  ;;  %v10326_v35 = vld [vmem:[#allocation15 + $0x998] sm:$0xf0]  ;;  %v8470_v58 = vor.u32 %v10165_v32, %v8469_v7  ;;  %v9449_v32 = vld [vmem:[#allocation15 + $0xc20] sm:$0xf] }
 0x43d   :  { %6356 = vmatpush.bf16.msra.mxu1 %v9334_v13  ;;  %v9639_v13 = vld [vmem:[#allocation15 + $0xdbc] sm:$0xf0] }
 0x43e   :  { %6384 = vmatpush.bf16.msra.mxu3 %v7938_v52  ;;  %v6103_v52 = vpop.f32.mrf.mxu1 }
 0x440   :  { %6396 = vmatpush.bf16.msrb.mxu0 %v8190_v14  ;;  %6318 = vmatpush.bf16.msrb.mxu2 %v8634_v39  ;;  %v9642_v14 = vor.u32 %v10455_v43, %v9639_v13  ;;  %v8526_v39 = vor.u32 %v10179_v54, %v8525_v59  ;;  %v10427_v13 = vld [vmem:[#allocation15 + $0xcc4] sm:$0xf]  ;;  %v9527_v59 = vld [vmem:[#allocation15 + $0xcdc] sm:$0xf0]  ;;  %v8413_v54 = vld [vmem:[#allocation15 + $0x408] sm:$0xf] }
 0x441   :  { %6357 = vmatpush.bf16.msra.mxu1 %v9306_v20  ;;  %v9611_v20 = vld [vmem:[#allocation15 + $0xd84] sm:$0xf0] }
 0x442   :  { %6385 = vmatpush.bf16.msra.mxu3 %v7910_v24  ;;  %v10186_v24 = vld [vmem:[#allocation15 + $0x538] sm:$0xf0]  ;;  %v6064_v28 = vpop.f32.mrf.mxu2  ;;  %v9614_v41 = vor.u32 %v10448_v21, %v9611_v20  ;;  %v10420_v21 = vld [vmem:[#allocation15 + $0xc8c] sm:$0xf]  ;;  %v9499_v20 = vld [vmem:[#allocation15 + $0xca4] sm:$0xf0] }
 0x443   :  { %v8554_v18 = vor.u32 %v10186_v24, %v8553_v33  ;;  %v9555_v24 = vld [vmem:[#allocation15 + $0xd14] sm:$0xf0] }
 0x444   :  { %6397 = vmatpush.bf16.msrb.mxu0 %v8162_v2  ;;  %6319 = vmatpush.bf16.msrb.mxu2 %v8606_v51  ;;  %v3440_v2 = vperm.slane %v11139_v8, 4  ;;  %v8834_v51 = vor.u32 %v10256_v3, %v8833_v0  ;;  %v9058_v3 = vor.u32 %v10312_v48, %v9057_v37  ;;  %v10382_v37 = vld [vmem:[#allocation15 + $0xb58] sm:$0xf0] }
 0x445   :  { %6386 = vmatmul.bf16.vlgmr.msra.gmra.mxu3 %v10971_v63  ;;  %v10189_v63 = vld [vmem:[#allocation15 + $0x554] sm:$0xf]  ;;  %6358 = vmatpush.bf16.msra.mxu1 %v9278_v57  ;;  %v8805_v57 = vld [vmem:[#allocation15 + $0x718] sm:$0xf] }
 0x446   :  { %6430 = vmatpush.bf16.msrb.mxu3 %v9002_v19  ;;  %v8578_v25 = vor.u32 %v10189_v63, %v8575_v4  ;;  %v9226_v19 = vor.u32 %v10354_v26, %v9225_v10  ;;  %v9141_v63 = vld [vmem:[#allocation15 + $0x9b8] sm:$0xf]  ;;  %v10333_v4 = vld [vmem:[#allocation15 + $0x9d0] sm:$0xf0]  ;;  %v8806_v33 = vor.u32 %v10249_v9, %v8805_v57  ;;  %v6192_v28 = vpop.f32.mrf.mxu0  ;;  %v10410_v57 = vld [vmem:[#allocation15 + $0xc38] sm:$0xf0] }
 0x447   :  { %v9142_v10 = vor.u32 %v10333_v4, %v9141_v63  ;;  %v10413_v63 = vld [vmem:[#allocation15 + $0xc54] sm:$0xf]  ;;  %v9471_v4 = vld [vmem:[#allocation15 + $0xc6c] sm:$0xf0] }
 0x448   :  { %6398 = vmatpush.bf16.msrb.mxu0 %v8134_v22  ;;  %6320 = vmatpush.bf16.msrb.mxu2 %v8578_v25  ;;  %v6179_v56 = vpop.f32.mrf.mxu3  ;;  %v10434_v22 = vld [vmem:[#allocation15 + $0xcfc] sm:$0xf]  ;;  %v8441_v25 = vld [vmem:[#allocation15 + $0x440] sm:$0xf] }
 0x449   :  { %6359 = vmatpush.bf16.msra.mxu1 %v9250_v30  ;;  %v6180_v12 = vadd.f32 %v6179_v56, %v3440_v2  ;;  %v9558_v36 = vor.u32 %v10434_v22, %v9555_v24  ;;  %v8385_v56 = vld [vmem:[#allocation15 + $0x3d0] sm:$0xf]  ;;  %v10305_v2 = vld [vmem:[#allocation15 + $0x8f0] sm:$0xf0]  ;;  %v10403_v22 = vld [vmem:[#allocation15 + $0xc00] sm:$0xf0] }
 0x44a   :  { %6431 = vmatpush.bf16.msrb.mxu3 %v8974_v55  ;;  %v8861_v55 = vld [vmem:[#allocation15 + $0x788] sm:$0xf] }
 0x44b   :  { %v8862_v49 = vor.u32 %v10263_v46, %v8861_v55  ;;  %6321 = vmatmul.bf16.vlgmr.msrb.gmra.mxu2 %v10992_v31  ;;  %6399 = vmatmul.bf16.vlgmr.msrb.gmra.mxu0 %v10978_v16  ;;  %v10441_v16 = vld [vmem:[#allocation15 + $0xd34] sm:$0xf]  ;;  %v11144_v45 = vadd.f32 %v6192_v28, %v6180_v12  ;;  %v10151_v55 = vld [vmem:[#allocation15 + $0x420] sm:$0xf0]  ;;  %v9393_v28 = vld [vmem:[#allocation15 + $0xbb0] sm:$0xf] }
 0x44c   :  { %6443 = vmatpush.bf16.msra.mxu0 %v9226_v19  ;;  %6365 = vmatpush.bf16.msra.mxu2 %v9670_v11  ;;  %v9586_v26 = vor.u32 %v10441_v16, %v9583_v23  ;;  %v10158_v19 = vld [vmem:[#allocation15 + $0x458] sm:$0xf0]  ;;  %v11142_v11 = vpop.f32.mrf.mxu1  ;;  %v8777_v16 = vld [vmem:[#allocation15 + $0x6e0] sm:$0xf] }
 0x44d   :  { %6404 = vmatpush.bf16.msrb.mxu1 %v8554_v18  ;;  %v9085_v18 = vld [vmem:[#allocation15 + $0x948] sm:$0xf]  ;;  %v8442_v43 = vor.u32 %v10158_v19, %v8441_v25  ;;  %v10242_v23 = vld [vmem:[#allocation15 + $0x6f8] sm:$0xf0]  ;;  %v10228_v25 = vld [vmem:[#allocation15 + $0x688] sm:$0xf0] }
 0x44e   :  { %6432 = vmatpush.bf16.msrb.mxu3 %v8946_v61  ;;  %v10172_v61 = vld [vmem:[#allocation15 + $0x4c8] sm:$0xf0]  ;;  %6360 = vmatmul.bf16.vlgmr.msra.gmra.mxu1 %v11020_v50  ;;  %v6194_v0 = vpop.f32.mrf.mxu0 }
 0x44f   :  { %v8498_v52 = vor.u32 %v10172_v61, %v8497_v53  ;;  %v10144_v61 = vld [vmem:[#allocation15 + $0x3e8] sm:$0xf0]  ;;  %v10375_v0 = vld [vmem:[#allocation15 + $0xb20] sm:$0xf0] }
 0x450   :  { %6444 = vmatpush.bf16.msra.mxu0 %v9198_v47  ;;  %6366 = vmatpush.bf16.msra.mxu2 %v9642_v14  ;;  %v6181_v17 = vpop.f32.mrf.mxu3  ;;  %v6102_v47 = vadd.f32 %v11131_v40, %v11115_v42  ;;  %v9530_v14 = vor.u32 %v10427_v13, %v9527_v59  ;;  %v9029_v40 = vld [vmem:[#allocation15 + $0x8d8] sm:$0xf]  ;;  %v10389_v59 = vld [vmem:[#allocation15 + $0xb90] sm:$0xf0] }
 0x451   :  { %6405 = vmatpush.bf16.msrb.mxu1 %v8526_v39  ;;  %v6114_v39 = vpop.f32.mrf.mxu2  ;;  %v9030_v7 = vor.u32 %v10305_v2, %v9029_v40  ;;  %v8721_v17 = vld [vmem:[#allocation15 + $0x670] sm:$0xf]  ;;  %v9365_v13 = vld [vmem:[#allocation15 + $0xb78] sm:$0xf] }
 0x452   :  { %6433 = vmatpush.bf16.msrb.mxu3 %v8918_v38  ;;  %v9113_v38 = vld [vmem:[#allocation15 + $0x980] sm:$0xf]  ;;  %v6115_v53 = vadd.f32 %v6114_v39, %v6102_v47 }
 0x453   :  { %v9114_v30 = vor.u32 %v10326_v35, %v9113_v38  ;;  %v9450_v38 = vor.u32 %v10410_v57, %v9449_v32  ;;  %v8749_v35 = vld [vmem:[#allocation15 + $0x6a8] sm:$0xf]  ;;  %v10466_v32 = vld [vmem:[#allocation15 + $0xdf8] sm:$0xf0] }
 0x454   :  { %6445 = vmatpush.bf16.msra.mxu0 %v9170_v1  ;;  %6367 = vmatpush.bf16.msra.mxu2 %v9614_v41  ;;  %v11150_v1 = vadd.f32 %v11124_v60, %v6115_v53  ;;  %v6155_v42 = vpop.f32.mrf.mxu1  ;;  %v8386_v41 = vor.u32 %v10144_v61, %v8385_v56  ;;  %v9474_v60 = vor.u32 %v10413_v63, %v9471_v4  ;;  %v8637_v53 = vld [vmem:[#allocation15 + $0x5c8] sm:$0xf]  ;;  %v10207_v56 = vld [vmem:[#allocation15 + $0x5e0] sm:$0xf0]  ;;  %v10368_v63 = vld [vmem:[#allocation15 + $0xae8] sm:$0xf0] }
 0x455   :  { %6406 = vmatpush.bf16.msrb.mxu1 %v8498_v52  ;;  %v8357_v52 = vld [vmem:[#allocation15 + $0x398] sm:$0xf]  ;;  %v9309_v61 = vld [vmem:[#allocation15 + $0xb08] sm:$0xf] }
 0x456   :  { %6434 = vmatpush.bf16.msrb.mxu3 %v8890_v5  ;;  %v10319_v5 = vld [vmem:[#allocation15 + $0x960] sm:$0xf0]  ;;  %v9310_v2 = vor.u32 %v10375_v0, %v9309_v61  ;;  %v9477_v61 = vld [vmem:[#allocation15 + $0xc58] sm:$0xf]  ;;  %v10417_v0 = vld [vmem:[#allocation15 + $0xc70] sm:$0xf0] }
 0x457   :  { %v9086_v46 = vor.u32 %v10319_v5, %v9085_v18  ;;  %v8693_v5 = vld [vmem:[#allocation15 + $0x638] sm:$0xf] }
 0x458   :  { %6446 = vmatpush.bf16.msra.mxu0 %v9142_v10  ;;  %6368 = vmatpush.bf16.msra.mxu2 %v9586_v26  ;;  %v8778_v26 = vor.u32 %v10242_v23, %v8777_v16  ;;  %v10193_v16 = vld [vmem:[#allocation15 + $0x570] sm:$0xf0] }
 0x459   :  { %6407 = vmatpush.bf16.msrb.mxu1 %v8470_v58  ;;  %v6116_v9 = vpop.f32.mrf.mxu2  ;;  %v10235_v58 = vld [vmem:[#allocation15 + $0x6c0] sm:$0xf0]  ;;  %v10361_v23 = vld [vmem:[#allocation15 + $0xab0] sm:$0xf0] }
 0x45a   :  { %6435 = vmatpush.bf16.msrb.mxu3 %v8862_v49  ;;  %v8414_v49 = vor.u32 %v10151_v55, %v8413_v54  ;;  %v8750_v24 = vor.u32 %v10235_v58, %v8749_v35  ;;  %v9366_v54 = vor.u32 %v10389_v59, %v9365_v13  ;;  %v8665_v55 = vld [vmem:[#allocation15 + $0x600] sm:$0xf]  ;;  %v9645_v35 = vld [vmem:[#allocation15 + $0xda8] sm:$0xf]  ;;  %v10459_v58 = vld [vmem:[#allocation15 + $0xdc0] sm:$0xf0] }
 0x45c   :  { %6447 = vmatpush.bf16.msra.mxu0 %v9114_v30  ;;  %6369 = vmatpush.bf16.msra.mxu2 %v9558_v36  ;;  %v10396_v30 = vld [vmem:[#allocation15 + $0xbc8] sm:$0xf0]  ;;  %v8722_v36 = vor.u32 %v10228_v25, %v8721_v17 }
 0x45d   :  { %6408 = vmatpush.bf16.msrb.mxu1 %v8442_v43  ;;  %v9394_v18 = vor.u32 %v10396_v30, %v9393_v28  ;;  %v10221_v43 = vld [vmem:[#allocation15 + $0x650] sm:$0xf0]  ;;  %v9589_v28 = vld [vmem:[#allocation15 + $0xd38] sm:$0xf] }
 0x45e   :  { %6436 = vmatpush.bf16.msrb.mxu3 %v8834_v51  ;;  %v10137_v51 = vld [vmem:[#allocation15 + $0x3b0] sm:$0xf0] }
 0x45f   :  { %v8358_v10 = vor.u32 %v10137_v51, %v8357_v52  ;;  %v10445_v30 = vld [vmem:[#allocation15 + $0xd50] sm:$0xf0] }
 0x460   :  { %6448 = vmatpush.bf16.msra.mxu0 %v9086_v46  ;;  %6370 = vmatpush.bf16.msra.mxu2 %v9530_v14  ;;  %v10214_v46 = vld [vmem:[#allocation15 + $0x618] sm:$0xf0]  ;;  %v9337_v14 = vld [vmem:[#allocation15 + $0xb40] sm:$0xf] }
 0x461   :  { %6409 = vmatpush.bf16.msrb.mxu1 %v8414_v49  ;;  %v8666_v39 = vor.u32 %v10214_v46, %v8665_v55  ;;  %v6141_v49 = vadd.f32 %v11129_v34, %v11150_v1  ;;  %v8609_v34 = vld [vmem:[#allocation15 + $0x590] sm:$0xf]  ;;  %v10200_v1 = vld [vmem:[#allocation15 + $0x5a8] sm:$0xf0] }
 0x462   :  { %6437 = vmatpush.bf16.msrb.mxu3 %v8806_v33  ;;  %v9421_v33 = vld [vmem:[#allocation15 + $0xbe8] sm:$0xf]  ;;  %v8610_v51 = vor.u32 %v10200_v1, %v8609_v34 }
 0x463   :  { %v9422_v12 = vor.u32 %v10403_v22, %v9421_v33  ;;  %v6154_v42 = vadd.f32 %v11142_v11, %v6141_v49  ;;  %v9253_v11 = vld [vmem:[#allocation15 + $0xa98] sm:$0xf]  ;;  %v9646_v22 = vor.u32 %v10459_v58, %v9645_v35 }
 0x464   :  { %6449 = vmatpush.bf16.msra.mxu0 %v9058_v3  ;;  %v6063_v3 = vadd.f32 %v11134_v44, %v11122_v62  ;;  %v8581_v44 = vld [vmem:[#allocation15 + $0x558] sm:$0xf] }
 0x465   :  { %6438 = vmatmul.bf16.vlgmr.msrb.gmra.mxu3 %v11000_v27  ;;  %v9502_v27 = vor.u32 %v10420_v21, %v9499_v20  ;;  %6410 = vmatpush.bf16.msrb.mxu1 %v8386_v41  ;;  %v9338_v20 = vor.u32 %v10382_v37, %v9337_v14  ;;  %v9281_v41 = vld [vmem:[#allocation15 + $0xad0] sm:$0xf]  ;;  %v8582_v57 = vor.u32 %v10193_v16, %v8581_v44 }
 0x466   :  { %10492 = vtanh.f32 %v6063_v3  ;;  %v9282_v62 = vor.u32 %v10368_v63, %v9281_v41  ;;  %v9505_v37 = vld [vmem:[#allocation15 + $0xc90] sm:$0xf] }
 0x467   :  { %6371 = vmatpush.bf16.msra.mxu2 %v9502_v27  ;;  %v8638_v27 = vor.u32 %v10207_v56, %v8637_v53 }
 0x468   :  { %6450 = vmatpush.bf16.msra.mxu0 %v9030_v7  ;;  %v11153_v19 = vpop.f32.mrf.mxu3  ;;  %v11157_v48 = vpop.f32.mrf.mxu0  ;;  %v9673_v7 = vld [vmem:[#allocation15 + $0xde0] sm:$0xf] }
 0x469   :  { %6411 = vmatpush.bf16.msrb.mxu1 %v8358_v10  ;;  %v9254_v10 = vor.u32 %v10361_v23, %v9253_v11 }
 0x46b   :  { %6372 = vmatpush.bf16.msra.mxu2 %v9474_v60  ;;  %6451 = vmatmul.bf16.vlgmr.msra.gmra.mxu0 %v11011_v15  ;;  %v8694_v15 = vor.u32 %v10221_v43, %v8693_v5  ;;  %v9561_v5 = vld [vmem:[#allocation15 + $0xd00] sm:$0xf]  ;;  %v10438_v43 = vld [vmem:[#allocation15 + $0xd18] sm:$0xf0] }
 0x46c   :  { %6412 = vmatmul.bf16.vlgmr.msrb.gmra.mxu1 %v10989_v6  ;;  %v6205_v6 = vpop.f32.mrf.mxu1  ;;  %v10493_v60 = vpop.eup %10492  ;;  %v9562_v46 = vor.u32 %v10438_v43, %v9561_v5 }
 0x46d   :  { %6456 = vmatpush.bf16.msra.mxu1 %v9450_v38  ;;  %v11162_v21 = vadd.f32 %v6205_v6, %v11144_v45  ;;  %v10424_v6 = vld [vmem:[#allocation15 + $0xca8] sm:$0xf0] }
 0x46e   :  { %6373 = vmatmul.bf16.vlgmr.msra.gmra.mxu2 %v11033_v29  ;;  %v6166_v40 = vpop.f32.mrf.mxu2  ;;  %v9506_v56 = vor.u32 %v10424_v6, %v9505_v37 }
 0x46f   :  { %6417 = vmatpush.bf16.msrb.mxu2 %v8778_v26  ;;  %v6167_v45 = vadd.f32 %v6166_v40, %v6154_v42  ;;  %v9674_v26 = vor.u32 %v10466_v32, %v9673_v7  ;;  %v9478_v42 = vor.u32 %v10417_v0, %v9477_v61 }
 0x470   :  { %v6233_v47 = vpop.f32.mrf.mxu3  ;;  %v6246_v4 = vpop.f32.mrf.mxu0 }
 0x471   :  { %6457 = vmatpush.bf16.msra.mxu1 %v9422_v12  ;;  %10494 = vtanh.f32 %v6167_v45  ;;  %v10452_v12 = vld [vmem:[#allocation15 + $0xd88] sm:$0xf0]  ;;  %v10431_v47 = vld [vmem:[#allocation15 + $0xce0] sm:$0xf0] }
 0x473   :  { %6418 = vmatpush.bf16.msrb.mxu2 %v8750_v24  ;;  %v9617_v24 = vld [vmem:[#allocation15 + $0xd70] sm:$0xf] }
 0x474   :  { %v6207_v52 = vpop.f32.mrf.mxu1  ;;  %v9618_v25 = vor.u32 %v10452_v12, %v9617_v24 }
 0x475   :  { %6458 = vmatpush.bf16.msra.mxu1 %v9394_v18  ;;  %v9590_v18 = vor.u32 %v10445_v30, %v9589_v28  ;;  %v3442_v52 = vperm.slane %v11139_v8, 6 }
 0x476   :  { %v6168_v9 = vpop.f32.mrf.mxu2 }
 0x477   :  { %6419 = vmatpush.bf16.msrb.mxu2 %v8722_v36  ;;  %v10495_v38 = vpop.eup %10494  ;;  %v3441_v36 = vperm.slane %v11139_v8, 5 }
 0x478   :  { %v6490_v33 = vpack.c.bf16 %v10495_v38, %v10493_v60 }
 0x479   :  { %6459 = vmatpush.bf16.msra.mxu1 %v9366_v54 }
 0x47a   :  { %6494 = vst [vmem:[%s11195_s11 + $0x8] sm:$0xff] %v6490_v33 }
 0x47b   :  { %6420 = vmatpush.bf16.msrb.mxu2 %v8694_v15 }
 0x47d   :  { %6460 = vmatpush.bf16.msra.mxu1 %v9338_v20 }
 0x47f   :  { %6421 = vmatpush.bf16.msrb.mxu2 %v8666_v39 }
 0x481   :  { %6461 = vmatpush.bf16.msra.mxu1 %v9310_v2 }
 0x483   :  { %6422 = vmatpush.bf16.msrb.mxu2 %v8638_v27 }
 0x485   :  { %6462 = vmatpush.bf16.msra.mxu1 %v9282_v62 }
 0x487   :  { %6423 = vmatpush.bf16.msrb.mxu2 %v8610_v51 }
 0x488   :  { %v6283_v17 = vpop.f32.mrf.mxu3  ;;  %v6296_v15 = vpop.f32.mrf.mxu0 }
 0x489   :  { %6463 = vmatpush.bf16.msra.mxu1 %v9254_v10  ;;  %v6284_v13 = vadd.f32 %v6283_v17, %v3441_v36 }
 0x48b   :  { %6424 = vmatpush.bf16.msrb.mxu2 %v8582_v57  ;;  %v6257_v54 = vpop.f32.mrf.mxu1  ;;  %v6297_v55 = vadd.f32 %v6296_v15, %v6284_v13 }
 0x48c   :  { %6464 = vmatmul.bf16.vlgmr.msra.gmra.mxu1 %v11020_v50 }
 0x48e   :  { %6425 = vmatmul.bf16.vlgmr.msrb.gmra.mxu2 %v10992_v31  ;;  %v9533_v31 = vld [vmem:[#allocation15 + $0xcc8] sm:$0xf]  ;;  %v6218_v14 = vpop.f32.mrf.mxu2 }
 0x48f   :  { %6469 = vmatpush.bf16.msra.mxu2 %v9674_v26  ;;  %v9534_v50 = vor.u32 %v10431_v47, %v9533_v31  ;;  %v6219_v39 = vadd.f32 %v6218_v14, %v11162_v21 }
 0x490   :  { %v6285_v59 = vpop.f32.mrf.mxu3  ;;  %v6298_v49 = vpop.f32.mrf.mxu0 }
 0x491   :  { %v6232_v20 = vadd.f32 %v11153_v19, %v6219_v39 }
 0x493   :  { %6470 = vmatpush.bf16.msra.mxu2 %v9646_v22  ;;  %v6259_v53 = vpop.f32.mrf.mxu1  ;;  %v6245_v3 = vadd.f32 %v11157_v48, %v6232_v20 }
 0x495   :  { %v6258_v27 = vadd.f32 %v6257_v54, %v6245_v3 }
 0x496   :  { %v6220_v40 = vpop.f32.mrf.mxu2 }
 0x497   :  { %6471 = vmatpush.bf16.msra.mxu2 %v9618_v25 }
 0x49b   :  { %6472 = vmatpush.bf16.msra.mxu2 %v9590_v18 }
 0x49f   :  { %6473 = vmatpush.bf16.msra.mxu2 %v9562_v46 }
 0x4a3   :  { %6474 = vmatpush.bf16.msra.mxu2 %v9534_v50 }
 0x4a7   :  { %6475 = vmatpush.bf16.msra.mxu2 %v9506_v56 }
 0x4a8   :  { %v6335_v2 = vpop.f32.mrf.mxu3  ;;  %v6348_v21 = vpop.f32.mrf.mxu0 }
 0x4ab   :  { %6476 = vmatpush.bf16.msra.mxu2 %v9478_v42  ;;  %v6309_v1 = vpop.f32.mrf.mxu1 }
 0x4ac   :  { %v6310_v11 = vadd.f32 %v6309_v1, %v6297_v55 }
 0x4ae   :  { %6477 = vmatmul.bf16.vlgmr.msra.gmra.mxu2 %v11033_v29  ;;  %v6270_v45 = vpop.f32.mrf.mxu2 }
 0x4af   :  { %v6271_v58 = vadd.f32 %v6270_v45, %v6258_v27 }
 0x4b0   :  { %v6337_v34 = vpop.f32.mrf.mxu3  ;;  %v6350_v19 = vpop.f32.mrf.mxu0 }
 0x4b1   :  { %10496 = vtanh.f32 %v6271_v58 }
 0x4b3   :  { %v6311_v41 = vpop.f32.mrf.mxu1 }
 0x4b6   :  { %v6272_v63 = vpop.f32.mrf.mxu2 }
 0x4b7   :  { %v10497_v17 = vpop.eup %10496 }
 0x4c8   :  { %v6387_v4 = vpop.f32.mrf.mxu3  ;;  %v6400_v62 = vpop.f32.mrf.mxu0 }
 0x4c9   :  { %v6388_v51 = vadd.f32 %v6387_v4, %v3442_v52 }
 0x4cb   :  { %v6361_v44 = vpop.f32.mrf.mxu1  ;;  %v6401_v16 = vadd.f32 %v6400_v62, %v6388_v51 }
 0x4ce   :  { %v6322_v23 = vpop.f32.mrf.mxu2 }
 0x4cf   :  { %v6323_v7 = vadd.f32 %v6322_v23, %v6310_v11 }
 0x4d0   :  { %v6389_v48 = vpop.f32.mrf.mxu3  ;;  %v6402_v32 = vpop.f32.mrf.mxu0 }
 0x4d1   :  { %v6336_v29 = vadd.f32 %v6335_v2, %v6323_v7 }
 0x4d3   :  { %v6363_v57 = vpop.f32.mrf.mxu1  ;;  %v6349_v35 = vadd.f32 %v6348_v21, %v6336_v29 }
 0x4d5   :  { %v6362_v33 = vadd.f32 %v6361_v44, %v6349_v35 }
 0x4d6   :  { %v6324_v60 = vpop.f32.mrf.mxu2 }
 0x4e8   :  { %v6439_v9 = vpop.f32.mrf.mxu3  ;;  %v6452_v26 = vpop.f32.mrf.mxu0 }
 0x4e9   :  { %v6413_v38 = vpop.f32.mrf.mxu1 }
 0x4ea   :  { %v6414_v18 = vadd.f32 %v6413_v38, %v6401_v16 }
 0x4f0   :  { %v6441_v10 = vpop.f32.mrf.mxu3  ;;  %v6454_v24 = vpop.f32.mrf.mxu0 }
 0x4f1   :  { %v6374_v8 = vpop.f32.mrf.mxu2  ;;  %v6415_v12 = vpop.f32.mrf.mxu1 }
 0x4f2   :  { %v6375_v22 = vadd.f32 %v6374_v8, %v6362_v33 }
 0x4f4   :  { %10498 = vtanh.f32 %v6375_v22 }
 0x4f9   :  { %v6376_v25 = vpop.f32.mrf.mxu2 }
 0x4fa   :  { %v10499_v28 = vpop.eup %10498 }
 0x4fb   :  { %v6491_v30 = vpack.c.bf16 %v10499_v28, %v10497_v17 }
 0x4fd   :  { %6495 = vst [vmem:[%s11195_s11 + $0x10] sm:$0xff] %v6491_v30 }
 0x509   :  { %v6465_v36 = vpop.f32.mrf.mxu1 }
 0x511   :  { %v6426_v5 = vpop.f32.mrf.mxu2  ;;  %v6467_v59 = vpop.f32.mrf.mxu1 }
 0x512   :  { %v6427_v43 = vadd.f32 %v6426_v5, %v6414_v18 }
 0x514   :  { %v6440_v13 = vadd.f32 %v6439_v9, %v6427_v43 }
 0x516   :  { %v6453_v54 = vadd.f32 %v6452_v26, %v6440_v13 }
 0x518   :  { %v6466_v55 = vadd.f32 %v6465_v36, %v6453_v54 }
 0x519   :  { %v6428_v15 = vpop.f32.mrf.mxu2 }
 0x531   :  { %v6478_v46 = vpop.f32.mrf.mxu2 }
 0x532   :  { %v6479_v31 = vadd.f32 %v6478_v46, %v6466_v55 }
 0x534   :  { %10500 = vtanh.f32 %v6479_v31 }
 0x539   :  { %v6480_v47 = vpop.f32.mrf.mxu2 }
 0x53a   :  { %v10501_v50 = vpop.eup %10500 }
 0x53b   :  { %v6492_v14 = vpack.c.bf16 %v10501_v50, %v10501_v50 }
 0x53d   :  { %6496 = vst [vmem:[%s11195_s11 + $0x18] sm:$0xf] %v6492_v14 }
 0x53e   :  { %6501 = vsyncpa [#allocation3], 1 }
 0x53f   :  { %6502 = vsyncpa [#allocation5], 1 }
 0x540   :  { %6503 = vsyncpa [#allocation8], 1 }
 0x541   :  { %6504 = vsyncpa [#allocation11], 1 }
 0x542   :  { %6505 = vsyncpa [#allocation14], 1 }
 0x543   :  { %6506 = vsyncpa [#allocation17], 1 }

</bundles_post_ra>
